<compile_context>
chip_gen: v5e
topology: v5e:2x2
jax: 0.10.0
libtpu: 0.0.40
codegen_flags: <defaults>
</compile_context>

<pallas_src>
import functools
import math

import jax
import jax.numpy as jnp
from jax.experimental import pallas as pl
from jax.experimental.pallas import tpu as pltpu

LANE = 128
NEG_BIG = -1e4          # additive mask value (matches "masked_fill(-10000)" refs)
MAX_TM = 256            # sublane tile cap (v5e-friendly; safe on v6e/v7x)
MAX_TN = 512
MAX_TK = 512
LN_EPS = 1e-5


def _round_up(x, m):
    return ((x + m - 1) // m) * m


def _pick_tile(dim, max_tile, mult=LANE):
    """Largest multiple of `mult` <= max_tile that divides `dim` (dim % mult == 0)."""
    best = mult
    c = mult
    while c <= min(max_tile, dim):
        if dim % c == 0:
            best = c
        c += mult
    return best


def _pad_rows(x, mp):
    m = x.shape[0]
    return x if m == mp else jnp.pad(x, ((0, mp - m), (0, 0)))


def _layernorm_rows(h, g, b, d_valid, eps):
    """Row LayerNorm in f32 over the first `d_valid` (un-padded) lanes."""
    np_cols = h.shape[-1]
    if d_valid == np_cols:
        mean = jnp.mean(h, axis=-1, keepdims=True)
        var = jnp.mean((h - mean) ** 2, axis=-1, keepdims=True)
        return (h - mean) * jax.lax.rsqrt(var + eps) * g + b
    col = jax.lax.broadcasted_iota(jnp.int32, h.shape, h.ndim - 1)
    valid = col < d_valid
    inv_n = 1.0 / d_valid
    mean = jnp.sum(jnp.where(valid, h, 0.0), axis=-1, keepdims=True) * inv_n
    cent = jnp.where(valid, h - mean, 0.0)
    var = jnp.sum(cent * cent, axis=-1, keepdims=True) * inv_n
    # gamma/beta are zero on padded lanes -> padded output lanes stay exactly 0.
    return (h - mean) * jax.lax.rsqrt(var + eps) * g + b


# -----------------------------------------------------------------------------
# Tiled linear (K-axis accumulator, bf16 in, f32 accumulate, bf16/f32 out)
# -----------------------------------------------------------------------------
def _matmul_kernel(x_ref, w_ref, b_ref, o_ref, acc_ref, *, activation):
    @pl.when(pl.program_id(2) == 0)
    def _():
        acc_ref[...] = jnp.zeros_like(acc_ref)

    acc_ref[...] += jnp.dot(x_ref[...], w_ref[...],
                            preferred_element_type=jnp.float32)

    @pl.when(pl.program_id(2) == pl.num_programs(2) - 1)
    def _():
        y = acc_ref[...] + b_ref[...]           # bias / ReLU in f32 (VPU)
        if activation == "relu":
            y = jnp.maximum(y, 0.0)
        o_ref[...] = y.astype(o_ref.dtype)


def linear(x2d, w, b, out_dtype=jnp.bfloat16, activation="none"):
    """x2d: [M, Kp] bf16 (lane-padded), w: [Kp, Np] bf16 packed, b: [1, Np] f32."""
    M, Kp = x2d.shape
    Np = w.shape[1]
    tm = min(_round_up(M, 8), MAX_TM)
    tn = _pick_tile(Np, MAX_TN)
    tk = _pick_tile(Kp, MAX_TK)
    Mp = _round_up(M, tm)
    xp = _pad_rows(x2d, Mp)

    out_bytes = 4 if out_dtype == jnp.float32 else 2
    cost = pl.CostEstimate(
        flops=2 * Mp * Np * Kp, transcendentals=0,
        bytes_accessed=Mp * Kp * 2 + Kp * Np * 2 + Np * 4 + Mp * Np * out_bytes)

    out = pl.pallas_call(
        functools.partial(_matmul_kernel, activation=activation),
        out_shape=jax.ShapeDtypeStruct((Mp, Np), out_dtype),
        grid=(Mp // tm, Np // tn, Kp // tk),
        in_specs=[
            pl.BlockSpec((tm, tk), lambda i, j, k: (i, k)),
            pl.BlockSpec((tk, tn), lambda i, j, k: (k, j)),
            pl.BlockSpec((1, tn), lambda i, j, k: (0, j)),
        ],
        out_specs=pl.BlockSpec((tm, tn), lambda i, j, k: (i, j)),
        scratch_shapes=[pltpu.VMEM((tm, tn), jnp.float32)],
        compiler_params=pltpu.CompilerParams(
            dimension_semantics=("parallel", "parallel", "arbitrary")),
        cost_estimate=cost,
    )(xp, w, b)
    return out if Mp == M else out[:M]


# -----------------------------------------------------------------------------
# Fused: (x @ wo + bo) + residual -> LayerNorm  (wo-projection epilogue)
# -----------------------------------------------------------------------------
def _matmul_res_ln_kernel(x_ref, w_ref, b_ref, r_ref, g_ref, bt_ref, o_ref,
                          acc_ref, *, d_valid, eps):
    @pl.when(pl.program_id(1) == 0)
    def _():
        acc_ref[...] = jnp.zeros_like(acc_ref)

    acc_ref[...] += jnp.dot(x_ref[...], w_ref[...],
                            preferred_element_type=jnp.float32)

    @pl.when(pl.program_id(1) == pl.num_programs(1) - 1)
    def _():
        h = acc_ref[...] + b_ref[...] + r_ref[...].astype(jnp.float32)
        y = _layernorm_rows(h, g_ref[...], bt_ref[...], d_valid, eps)
        o_ref[...] = y.astype(o_ref.dtype)


def linear_residual_ln(x2d, w, b, residual, gamma, beta, d_valid,
                       out_dtype=jnp.bfloat16, eps=LN_EPS):
    """LN((x @ w + b) + residual); x/residual bf16 [M, *], w [Kp, Np] bf16."""
    M, Kp = x2d.shape
    Np = w.shape[1]
    tm = min(_round_up(M, 8), MAX_TM)
    tk = _pick_tile(Kp, MAX_TK)
    Mp = _round_up(M, tm)
    xp = _pad_rows(x2d, Mp)
    rp = _pad_rows(residual, Mp)

    out = pl.pallas_call(
        functools.partial(_matmul_res_ln_kernel, d_valid=d_valid, eps=eps),
        out_shape=jax.ShapeDtypeStruct((Mp, Np), out_dtype),
        grid=(Mp // tm, Kp // tk),
        in_specs=[
            pl.BlockSpec((tm, tk), lambda i, k: (i, k)),
            pl.BlockSpec((tk, Np), lambda i, k: (k, 0)),
            pl.BlockSpec((1, Np), lambda i, k: (0, 0)),
            pl.BlockSpec((tm, Np), lambda i, k: (i, 0)),
            pl.BlockSpec((1, Np), lambda i, k: (0, 0)),
            pl.BlockSpec((1, Np), lambda i, k: (0, 0)),
        ],
        out_specs=pl.BlockSpec((tm, Np), lambda i, k: (i, 0)),
        scratch_shapes=[pltpu.VMEM((tm, Np), jnp.float32)],
        compiler_params=pltpu.CompilerParams(
            dimension_semantics=("parallel", "arbitrary")),
    )(xp, w, b, rp, gamma, beta)
    return out if Mp == M else out[:M]


# -----------------------------------------------------------------------------
# Fused FFN + residual + LayerNorm:  LN(relu(x@w1+b1)@w2 + b2 + residual)
# -----------------------------------------------------------------------------
def _ffn_res_ln_kernel(x_ref, w1_ref, b1_ref, w2_ref, b2_ref, r_ref, g_ref,
                       bt_ref, o_ref, *, d_valid, eps):
    h = jnp.dot(x_ref[...], w1_ref[...],
                preferred_element_type=jnp.float32) + b1_ref[...]
    h = jnp.maximum(h, 0.0)
    y = jnp.dot(h.astype(jnp.bfloat16), w2_ref[...],
                preferred_element_type=jnp.float32) + b2_ref[...]
    y = y + r_ref[...].astype(jnp.float32)
    y = _layernorm_rows(y, g_ref[...], bt_ref[...], d_valid, eps)
    o_ref[...] = y.astype(o_ref.dtype)


def ffn_residual_ln(x2d, p, residual, gamma, beta, d_valid,
                    out_dtype=jnp.bfloat16, eps=LN_EPS):
    M, Dp = x2d.shape
    Hp = p["w1"].shape[1]
    tm = min(_round_up(M, 8), MAX_TM)
    Mp = _round_up(M, tm)
    xp = _pad_rows(x2d, Mp)
    rp = _pad_rows(residual, Mp)

    # TODO(synk): for production-scale D / n_hidden (v7x 64 MiB VMEM), K/N-tile
    # w1/w2 with an accumulator (as in linear) or single-buffer the constant
    # weight blocks instead of holding both whole weights double-buffered.
    cost = pl.CostEstimate(
        flops=4 * Mp * Dp * Hp, transcendentals=0,
        bytes_accessed=Mp * Dp * 2 * 3 + 2 * Dp * Hp * 2 + Mp * Dp * 2)

    out = pl.pallas_call(
        functools.partial(_ffn_res_ln_kernel, d_valid=d_valid, eps=eps),
        out_shape=jax.ShapeDtypeStruct((Mp, Dp), out_dtype),
        grid=(Mp // tm,),
        in_specs=[
            pl.BlockSpec((tm, Dp), lambda i: (i, 0)),
            pl.BlockSpec((Dp, Hp), lambda i: (0, 0)),
            pl.BlockSpec((1, Hp), lambda i: (0, 0)),
            pl.BlockSpec((Hp, Dp), lambda i: (0, 0)),
            pl.BlockSpec((1, Dp), lambda i: (0, 0)),
            pl.BlockSpec((tm, Dp), lambda i: (i, 0)),
            pl.BlockSpec((1, Dp), lambda i: (0, 0)),
            pl.BlockSpec((1, Dp), lambda i: (0, 0)),
        ],
        out_specs=pl.BlockSpec((tm, Dp), lambda i: (i, 0)),
        compiler_params=pltpu.CompilerParams(dimension_semantics=("parallel",)),
        cost_estimate=cost,
    )(xp, p["w1"], p["b1"], p["w2"], p["b2"], rp, gamma, beta)
    return out if Mp == M else out[:M]


# -----------------------------------------------------------------------------
# Multi-head scaled-dot-product attention.
#   - fused QKV / KV inputs split in-kernel at 128-aligned lane boundaries
#   - mask hoisted to one additive bias per grid step
#   - per-head results written straight into the lane-dense output block
# -----------------------------------------------------------------------------
def _build_bias(kbias, lq, lk, causal):
    bias = jnp.broadcast_to(kbias, (lq, lk))      # hoisted once, reused per head
    if causal:
        row = jax.lax.broadcasted_iota(jnp.int32, (lq, lk), 0)
        col = jax.lax.broadcasted_iota(jnp.int32, (lq, lk), 1)
        bias = bias + jnp.where(col <= row, 0.0, NEG_BIG)
    return bias


def _attn_core(q, k, v, bias2d, o_ref, *, scale, n_head, dh):
    # zero-init keeps lane-padded columns (>= n_head*dh) exactly zero.
    o_ref[...] = jnp.zeros(o_ref.shape, o_ref.dtype)
    # TODO(synk): for real Dh (>=64) batch heads into one dot_general with a
    # leading head batch dim and tile Lk flash-style to raise MXU fill on v7x.
    for h in range(n_head):
        sl = slice(h * dh, (h + 1) * dh)
        s = jax.lax.dot_general(q[:, sl], k[:, sl], (((1,), (1,)), ((), ())),
                                preferred_element_type=jnp.float32)
        s = s * scale + bias2d
        s = s - jnp.max(s, axis=-1, keepdims=True)
        p = jnp.exp(s)
        p = p * pl.reciprocal(jnp.sum(p, axis=-1, keepdims=True), approx=True)
        o = jnp.dot(p.astype(jnp.bfloat16), v[:, sl],
                    preferred_element_type=jnp.float32)
        o_ref[0, :, sl] = o.astype(o_ref.dtype)


def _self_attn_kernel(qkv_ref, kb_ref, o_ref, *, scale, causal, n_head, dh, dp):
    qkv = qkv_ref[0]                                  # [L, 3*Dp] bf16
    q = qkv[:, :dp]
    k = qkv[:, dp:2 * dp]
    v = qkv[:, 2 * dp:3 * dp]
    bias = _build_bias(kb_ref[0], q.shape[0], k.shape[0], causal)
    _attn_core(q, k, v, bias, o_ref, scale=scale, n_head=n_head, dh=dh)


def _cross_attn_kernel(q_ref, kv_ref, kb_ref, o_ref, *, scale, n_head, dh, dp):
    q = q_ref[0]                                      # [Lq, Dp] bf16
    kv = kv_ref[0]                                    # [Lk, 2*Dp] bf16
    k = kv[:, :dp]
    v = kv[:, dp:2 * dp]
    bias = _build_bias(kb_ref[0], q.shape[0], k.shape[0], False)
    _attn_core(q, k, v, bias, o_ref, scale=scale, n_head=n_head, dh=dh)


def self_attention(qkv, kbias, causal, n_head, d_model):
    """qkv: [B, L, 3*Dp] bf16, kbias: [B, 1, L] f32 -> [B, L, Dp] bf16."""
    B, L, threedp = qkv.shape
    Dp = threedp // 3
    dh = d_model // n_head
    scale = 1.0 / math.sqrt(dh)
    return pl.pallas_call(
        functools.partial(_self_attn_kernel, scale=scale, causal=causal,
                          n_head=n_head, dh=dh, dp=Dp),
        out_shape=jax.ShapeDtypeStruct((B, L, Dp), jnp.bfloat16),
        grid=(B,),
        in_specs=[
            pl.BlockSpec((1, L, threedp), lambda b: (b, 0, 0)),
            pl.BlockSpec((1, 1, L), lambda b: (b, 0, 0)),
        ],
        out_specs=pl.BlockSpec((1, L, Dp), lambda b: (b, 0, 0)),
        compiler_params=pltpu.CompilerParams(dimension_semantics=("parallel",)),
    )(qkv, kbias)


def cross_attention(q, kv, kbias, n_head, d_model):
    """q: [B, Lq, Dp], kv: [B, Lk, 2*Dp], kbias: [B, 1, Lk] -> [B, Lq, Dp]."""
    B, Lq, Dp = q.shape
    Lk = kv.shape[1]
    dh = d_model // n_head
    scale = 1.0 / math.sqrt(dh)
    return pl.pallas_call(
        functools.partial(_cross_attn_kernel, scale=scale, n_head=n_head,
                          dh=dh, dp=Dp),
        out_shape=jax.ShapeDtypeStruct((B, Lq, Dp), jnp.bfloat16),
        grid=(B,),
        in_specs=[
            pl.BlockSpec((1, Lq, Dp), lambda b: (b, 0, 0)),
            pl.BlockSpec((1, Lk, 2 * Dp), lambda b: (b, 0, 0)),
            pl.BlockSpec((1, 1, Lk), lambda b: (b, 0, 0)),
        ],
        out_specs=pl.BlockSpec((1, Lq, Dp), lambda b: (b, 0, 0)),
        compiler_params=pltpu.CompilerParams(dimension_semantics=("parallel",)),
    )(q, kv, kbias)


# -----------------------------------------------------------------------------
# Model glue (plain JAX)
# -----------------------------------------------------------------------------
def positional_encoding(max_len, d_model):
    pos = jnp.arange(max_len, dtype=jnp.float32)[:, None]
    two_i = jnp.arange(0, d_model, 2, dtype=jnp.float32)[None, :]
    angle = pos / jnp.power(10000.0, two_i / d_model)
    pe = jnp.zeros((max_len, d_model), jnp.float32)
    pe = pe.at[:, 0::2].set(jnp.sin(angle))
    pe = pe.at[:, 1::2].set(jnp.cos(angle))
    return pe


def embed(tokens, tok_emb_p, pos_enc_p):
    L = tokens.shape[1]
    x = jnp.take(tok_emb_p, tokens, axis=0) + pos_enc_p[:L][None, :, :]
    return x.astype(jnp.bfloat16)               # matmul consumers are bf16


def encoder_layer(x, src_bias, p, n_head, d_model):
    B, L, Dp = x.shape
    M = B * L
    x2 = x.reshape(M, Dp)
    qkv = linear(x2, p["attn"]["w_qkv"], p["attn"]["b_qkv"])           # [M, 3Dp] bf16
    o = self_attention(qkv.reshape(B, L, 3 * Dp), src_bias, False, n_head, d_model)
    x2 = linear_residual_ln(o.reshape(M, Dp), p["attn"]["wo"], p["attn"]["bo"],
                            x2, p["ln1_g"], p["ln1_b"], d_model)
    x2 = ffn_residual_ln(x2, p["ffn"], x2, p["ln2_g"], p["ln2_b"], d_model)
    return x2.reshape(B, L, Dp)


def decoder_layer(y, enc, trg_bias, src_bias, p, n_head, d_model):
    B, T, Dp = y.shape
    S = enc.shape[1]
    M = B * T
    y2 = y.reshape(M, Dp)
    # masked self-attention
    qkv = linear(y2, p["self_attn"]["w_qkv"], p["self_attn"]["b_qkv"])
    o = self_attention(qkv.reshape(B, T, 3 * Dp), trg_bias, True, n_head, d_model)
    y2 = linear_residual_ln(o.reshape(M, Dp), p["self_attn"]["wo"],
                            p["self_attn"]["bo"], y2, p["ln1_g"], p["ln1_b"],
                            d_model)
    # cross-attention: Q from decoder, fused K|V from encoder output
    q = linear(y2, p["cross_attn"]["w_q"], p["cross_attn"]["b_q"])
    kv = linear(enc.reshape(B * S, Dp), p["cross_attn"]["w_kv"],
                p["cross_attn"]["b_kv"])
    o = cross_attention(q.reshape(B, T, Dp), kv.reshape(B, S, 2 * Dp),
                        src_bias, n_head, d_model)
    y2 = linear_residual_ln(o.reshape(M, Dp), p["cross_attn"]["wo"],
                            p["cross_attn"]["bo"], y2, p["ln2_g"], p["ln2_b"],
                            d_model)
    # position-wise feed-forward
    y2 = ffn_residual_ln(y2, p["ffn"], y2, p["ln3_g"], p["ln3_b"], d_model)
    return y2.reshape(B, T, Dp)


def transformer_forward(src, trg, pp, *, src_pad_idx, trg_pad_idx, n_head,
                        d_model, tgt_vocab):
    # make_src_mask / make_trg_mask: additive key-bias vectors [B,1,L];
    # the causal part of the target mask is built in-kernel via iota.
    src_bias = jnp.where(src == src_pad_idx, NEG_BIG, 0.0
                         ).astype(jnp.float32)[:, None, :]
    trg_bias = jnp.where(trg == trg_pad_idx, NEG_BIG, 0.0
                         ).astype(jnp.float32)[:, None, :]

    x = embed(src, pp["enc_tok_emb"], pp["pos_enc"])
    for lp in pp["enc_layers"]:
        x = encoder_layer(x, src_bias, lp, n_head, d_model)
    enc = x

    y = embed(trg, pp["dec_tok_emb"], pp["pos_enc"])
    for lp in pp["dec_layers"]:
        y = decoder_layer(y, enc, trg_bias, src_bias, lp, n_head, d_model)

    B, T, Dp = y.shape
    logits = linear(y.reshape(B * T, Dp), pp["out_w"], pp["out_b"],
                    out_dtype=jnp.float32)
    return logits[:, :tgt_vocab].reshape(B, T, tgt_vocab)


# -----------------------------------------------------------------------------
# One-time weight packing: bf16 cast + lane-pad + fused QKV / KV concat.
# -----------------------------------------------------------------------------
def pack_params(raw, d_model, n_head):
    Dp = _round_up(d_model, LANE)

    def pad_w(w):
        K, N = w.shape
        return jnp.pad(w, ((0, _round_up(K, LANE) - K),
                           (0, _round_up(N, LANE) - N))).astype(jnp.bfloat16)

    def pad_b(v):
        N = v.shape[0]
        return jnp.pad(v, (0, _round_up(N, LANE) - N)
                       ).astype(jnp.float32).reshape(1, -1)

    def pad_lane(v):
        N = v.shape[-1]
        return jnp.pad(v, ((0, 0), (0, Dp - N))).astype(jnp.float32)

    def pack_mha(p, fuse_qkv):
        out = {"wo": pad_w(p["wo"]), "bo": pad_b(p["bo"])}
        wq, wk, wv = pad_w(p["wq"]), pad_w(p["wk"]), pad_w(p["wv"])
        bq, bk, bv = pad_b(p["bq"]), pad_b(p["bk"]), pad_b(p["bv"])
        if fuse_qkv:
            out["w_qkv"] = jnp.concatenate([wq, wk, wv], axis=1)
            out["b_qkv"] = jnp.concatenate([bq, bk, bv], axis=1)
        else:
            out["w_q"], out["b_q"] = wq, bq
            out["w_kv"] = jnp.concatenate([wk, wv], axis=1)
            out["b_kv"] = jnp.concatenate([bk, bv], axis=1)
        return out

    def pack_ffn(p):
        return {"w1": pad_w(p["w1"]), "b1": pad_b(p["b1"]),
                "w2": pad_w(p["w2"]), "b2": pad_b(p["b2"])}

    pp = {
        "enc_tok_emb": pad_lane(raw["enc_tok_emb"]),
        "dec_tok_emb": pad_lane(raw["dec_tok_emb"]),
        "pos_enc": pad_lane(raw["pos_enc"]),
        "out_w": pad_w(raw["out_w"]),
        "out_b": pad_b(raw["out_b"]),
        "enc_layers": [],
        "dec_layers": [],
    }
    for lp in raw["enc_layers"]:
        pp["enc_layers"].append({
            "attn": pack_mha(lp["attn"], True),
            "ffn": pack_ffn(lp["ffn"]),
            "ln1_g": pad_b(lp["ln1_g"]), "ln1_b": pad_b(lp["ln1_b"]),
            "ln2_g": pad_b(lp["ln2_g"]), "ln2_b": pad_b(lp["ln2_b"]),
        })
    for lp in raw["dec_layers"]:
        pp["dec_layers"].append({
            "self_attn": pack_mha(lp["self_attn"], True),
            "cross_attn": pack_mha(lp["cross_attn"], False),
            "ffn": pack_ffn(lp["ffn"]),
            "ln1_g": pad_b(lp["ln1_g"]), "ln1_b": pad_b(lp["ln1_b"]),
            "ln2_g": pad_b(lp["ln2_g"]), "ln2_b": pad_b(lp["ln2_b"]),
            "ln3_g": pad_b(lp["ln3_g"]), "ln3_b": pad_b(lp["ln3_b"]),
        })
    return pp


# -----------------------------------------------------------------------------
# Deterministic raw (f32) parameter initialization
# -----------------------------------------------------------------------------
def _init_linear(key, d_in, d_out):
    k1, k2 = jax.random.split(key)
    w = jax.random.normal(k1, (d_in, d_out), jnp.float32) * 0.02
    b = jax.random.normal(k2, (d_out,), jnp.float32) * 0.02
    return w, b


def _init_mha(key, d_model):
    ks = jax.random.split(key, 4)
    wq, bq = _init_linear(ks[0], d_model, d_model)
    wk, bk = _init_linear(ks[1], d_model, d_model)
    wv, bv = _init_linear(ks[2], d_model, d_model)
    wo, bo = _init_linear(ks[3], d_model, d_model)
    return dict(wq=wq, bq=bq, wk=wk, bk=bk, wv=wv, bv=bv, wo=wo, bo=bo)


def _init_ffn(key, d_model, n_hidden):
    k1, k2 = jax.random.split(key)
    w1, b1 = _init_linear(k1, d_model, n_hidden)
    w2, b2 = _init_linear(k2, n_hidden, d_model)
    return dict(w1=w1, b1=b1, w2=w2, b2=b2)


def init_params(key, src_vocab, tgt_vocab, d_model, max_len, n_layers, n_hidden):
    keys = jax.random.split(key, 4 + 2 * n_layers)
    params = {
        "enc_tok_emb": jax.random.normal(keys[0], (src_vocab, d_model),
                                         jnp.float32) * 0.02,
        "dec_tok_emb": jax.random.normal(keys[1], (tgt_vocab, d_model),
                                         jnp.float32) * 0.02,
        "pos_enc": positional_encoding(max_len, d_model),
        "enc_layers": [],
        "dec_layers": [],
    }
    ones = jnp.ones((d_model,), jnp.float32)
    zeros = jnp.zeros((d_model,), jnp.float32)
    for i in range(n_layers):
        ka, kf = jax.random.split(keys[2 + i])
        params["enc_layers"].append(dict(
            attn=_init_mha(ka, d_model), ffn=_init_ffn(kf, d_model, n_hidden),
            ln1_g=ones, ln1_b=zeros, ln2_g=ones, ln2_b=zeros))
    for i in range(n_layers):
        ks_, kc, kf = jax.random.split(keys[2 + n_layers + i], 3)
        params["dec_layers"].append(dict(
            self_attn=_init_mha(ks_, d_model),
            cross_attn=_init_mha(kc, d_model),
            ffn=_init_ffn(kf, d_model, n_hidden),
            ln1_g=ones, ln1_b=zeros, ln2_g=ones, ln2_b=zeros,
            ln3_g=ones, ln3_b=zeros))
    w, b = _init_linear(keys[2 + 2 * n_layers], d_model, tgt_vocab)
    params["out_w"], params["out_b"] = w, b
    return params


# -----------------------------------------------------------------------------
if __name__ == "__main__":
    B, S, T = 2, 8, 8
    d_model, n_head, n_hidden, n_layers = 32, 4, 64, 2
    src_vocab, tgt_vocab, max_len = 50, 60, 16
    src_pad_idx = trg_pad_idx = 0

    key = jax.random.PRNGKey(0)
    k_param, k_src, k_trg = jax.random.split(key, 3)

    src = jax.random.randint(k_src, (B, S), 1, src_vocab).astype(jnp.int32)
    trg = jax.random.randint(k_trg, (B, T), 1, tgt_vocab).astype(jnp.int32)
    # introduce some padding so the masks are exercised
    src = src.at[:, -2:].set(src_pad_idx)
    trg = trg.at[:, -1:].set(trg_pad_idx)

    raw = init_params(k_param, src_vocab, tgt_vocab, d_model, max_len,
                      n_layers, n_hidden)
    packed = pack_params(raw, d_model, n_head)   # one-time bf16 pack / pad / concat

    fwd = jax.jit(functools.partial(transformer_forward,
                                    src_pad_idx=src_pad_idx,
                                    trg_pad_idx=trg_pad_idx,
                                    n_head=n_head, d_model=d_model,
                                    tgt_vocab=tgt_vocab))
    out = jax.block_until_ready(fwd(src, trg, packed))
    assert out.shape == (B, T, tgt_vocab), out.shape
    assert bool(jnp.all(jnp.isfinite(out)))
    print("KERNEL_OK")
</pallas_src>

<mosaic_0001>
module attributes {stable_mosaic.version = 11 : i64} {
  func.func @_matmul_kernel(%arg0: i32, %arg1: i32, %arg2: i32, %arg3: memref<16x128xbf16, #tpu.memory_space<vmem>>, %arg4: memref<128x384xbf16, #tpu.memory_space<vmem>>, %arg5: memref<1x384xf32, #tpu.memory_space<vmem>>, %arg6: memref<16x384xbf16, #tpu.memory_space<vmem>>, %arg7: memref<16x384xf32, #tpu.memory_space<vmem>>) attributes {dimension_semantics = [#tpu.dimension_semantics<parallel>, #tpu.dimension_semantics<parallel>, #tpu.dimension_semantics<arbitrary>], iteration_bounds = array<i64: 1, 1, 1>, scalar_prefetch = 0 : i64, scratch_operands = 1 : i64, tpu.core_type = #tpu.core_type<tc>, window_params = [{transform_indices = @transform_0, window_bounds = array<i64: 16, 128>}, {transform_indices = @transform_1, window_bounds = array<i64: 128, 384>}, {transform_indices = @transform_2, window_bounds = array<i64: 1, 384>}, {transform_indices = @transform_3, window_bounds = array<i64: 16, 384>}]} {
    %c0_i32 = arith.constant 0 : i32
    %0 = arith.cmpi eq, %arg2, %c0_i32 : i32
    %1 = arith.extui %0 : i1 to i32
    %c0_i32_0 = arith.constant 0 : i32
    %2 = arith.cmpi ne, %1, %c0_i32_0 : i32
    scf.if %2 {
      %cst_10 = arith.constant 0.000000e+00 : f32
      %12 = vector.broadcast %cst_10 : f32 to vector<16x384xf32>
      %c0_11 = arith.constant 0 : index
      %c0_12 = arith.constant 0 : index
      %13 = vector.load %arg7[%c0_11, %c0_12] : memref<16x384xf32, #tpu.memory_space<vmem>>, vector<16x384xf32>
      tpu.vector_store %arg7[%c0_11, %c0_12], %12 {strides = array<i32>} : memref<16x384xf32, #tpu.memory_space<vmem>>, vector<16x384xf32>,
    } else {
    }
    %c0 = arith.constant 0 : index
    %c0_1 = arith.constant 0 : index
    %3 = vector.load %arg7[%c0, %c0_1] : memref<16x384xf32, #tpu.memory_space<vmem>>, vector<16x384xf32>
    %c0_2 = arith.constant 0 : index
    %c0_3 = arith.constant 0 : index
    %4 = vector.load %arg3[%c0_2, %c0_3] : memref<16x128xbf16, #tpu.memory_space<vmem>>, vector<16x128xbf16>
    %c0_4 = arith.constant 0 : index
    %c0_5 = arith.constant 0 : index
    %5 = vector.load %arg4[%c0_4, %c0_5] : memref<128x384xbf16, #tpu.memory_space<vmem>>, vector<128x384xbf16>
    %cst = arith.constant dense<0.000000e+00> : vector<16x384xf32>
    %6 = tpu.matmul %4, %5, %cst {dimension_numbers = #tpu.dot_dimension_numbers<[1], [0], [0], [1], [0, 0, 1, 1], [], []>} : vector<16x128xbf16>, vector<128x384xbf16>, vector<16x384xf32> -> vector<16x384xf32>
    %7 = arith.addf %3, %6 : vector<16x384xf32>
    %c0_6 = arith.constant 0 : index
    %c0_7 = arith.constant 0 : index
    %8 = vector.load %arg7[%c0_6, %c0_7] : memref<16x384xf32, #tpu.memory_space<vmem>>, vector<16x384xf32>
    tpu.vector_store %arg7[%c0_6, %c0_7], %7 {strides = array<i32>} : memref<16x384xf32, #tpu.memory_space<vmem>>, vector<16x384xf32>,
    %c0_i32_8 = arith.constant 0 : i32
    %9 = arith.cmpi eq, %arg2, %c0_i32_8 : i32
    %10 = arith.extui %9 : i1 to i32
    %c0_i32_9 = arith.constant 0 : i32
    %11 = arith.cmpi ne, %10, %c0_i32_9 : i32
    scf.if %11 {
      %c0_10 = arith.constant 0 : index
      %c0_11 = arith.constant 0 : index
      %12 = vector.load %arg7[%c0_10, %c0_11] : memref<16x384xf32, #tpu.memory_space<vmem>>, vector<16x384xf32>
      %c0_12 = arith.constant 0 : index
      %c0_13 = arith.constant 0 : index
      %13 = vector.load %arg5[%c0_12, %c0_13] : memref<1x384xf32, #tpu.memory_space<vmem>>, vector<1x384xf32>
      %14 = vector.broadcast %13 : vector<1x384xf32> to vector<16x384xf32>
      %15 = arith.addf %12, %14 : vector<16x384xf32>
      %16 = arith.truncf %15 : vector<16x384xf32> to vector<16x384xbf16>
      %c0_14 = arith.constant 0 : index
      %c0_15 = arith.constant 0 : index
      %17 = vector.load %arg6[%c0_14, %c0_15] : memref<16x384xbf16, #tpu.memory_space<vmem>>, vector<16x384xbf16>
      tpu.vector_store %arg6[%c0_14, %c0_15], %16 {strides = array<i32>} : memref<16x384xbf16, #tpu.memory_space<vmem>>, vector<16x384xbf16>,
    } else {
    }
    return
  }
  func.func @transform_0(%arg0: i32, %arg1: i32, %arg2: i32) -> (i32, i32) {
    %c0_i32 = arith.constant 0 : i32
    return %arg0, %arg2 : i32, i32
  }
  func.func @transform_1(%arg0: i32, %arg1: i32, %arg2: i32) -> (i32, i32) {
    %c0_i32 = arith.constant 0 : i32
    return %arg2, %arg1 : i32, i32
  }
  func.func @transform_2(%arg0: i32, %arg1: i32, %arg2: i32) -> (i32, i32) {
    %c0_i32 = arith.constant 0 : i32
    %c0_i32_0 = arith.constant 0 : i32
    return %c0_i32, %arg1 : i32, i32
  }
  func.func @transform_3(%arg0: i32, %arg1: i32, %arg2: i32) -> (i32, i32) {
    %c0_i32 = arith.constant 0 : i32
    return %arg0, %arg1 : i32, i32
  }
}

module attributes {stable_mosaic.version = 11 : i64} {
  func.func @_self_attn_kernel(%arg0: i32, %arg1: memref<1x8x384xbf16, #tpu.memory_space<vmem>>, %arg2: memref<1x1x8xf32, #tpu.memory_space<vmem>>, %arg3: memref<1x8x128xbf16, #tpu.memory_space<vmem>>) attributes {dimension_semantics = [#tpu.dimension_semantics<parallel>], iteration_bounds = array<i64: 2>, scalar_prefetch = 0 : i64, scratch_operands = 0 : i64, tpu.core_type = #tpu.core_type<tc>, window_params = [{transform_indices = @transform_0, window_bounds = array<i64: 1, 8, 384>}, {transform_indices = @transform_1, window_bounds = array<i64: 1, 1, 8>}, {transform_indices = @transform_2, window_bounds = array<i64: 1, 8, 128>}]} {
    %c0 = arith.constant 0 : index
    %c0_0 = arith.constant 0 : index
    %c0_1 = arith.constant 0 : index
    %0 = vector.load %arg1[%c0, %c0_0, %c0_1] : memref<1x8x384xbf16, #tpu.memory_space<vmem>>, vector<1x8x384xbf16>
    %1 = vector.shape_cast %0 : vector<1x8x384xbf16> to vector<8x384xbf16>
    %2 = vector.extract_strided_slice %1 {offsets = [0, 0], sizes = [8, 128], strides = [1, 1]} : vector<8x384xbf16> to vector<8x128xbf16>
    %3 = vector.extract_strided_slice %1 {offsets = [0, 128], sizes = [8, 128], strides = [1, 1]} : vector<8x384xbf16> to vector<8x128xbf16>
    %4 = vector.extract_strided_slice %1 {offsets = [0, 256], sizes = [8, 128], strides = [1, 1]} : vector<8x384xbf16> to vector<8x128xbf16>
    %c0_2 = arith.constant 0 : index
    %c0_3 = arith.constant 0 : index
    %c0_4 = arith.constant 0 : index
    %5 = vector.load %arg2[%c0_2, %c0_3, %c0_4] : memref<1x1x8xf32, #tpu.memory_space<vmem>>, vector<1x1x8xf32>
    %6 = vector.shape_cast %5 : vector<1x1x8xf32> to vector<1x8xf32>
    %7 = vector.shape_cast %6 : vector<1x8xf32> to vector<1x8xf32>
    %8 = vector.broadcast %7 : vector<1x8xf32> to vector<8x8xf32>
    %9 = tpu.iota {dimensions = array<i32: 0>} : vector<8x8xi32>
    %10 = tpu.iota {dimensions = array<i32: 1>} : vector<8x8xi32>
    %11 = arith.cmpi sle, %10, %9 : vector<8x8xi32>
    %cst = arith.constant 0.000000e+00 : f32
    %cst_5 = arith.constant -1.000000e+04 : f32
    %12 = vector.broadcast %cst : f32 to vector<8x8xf32>
    %13 = vector.broadcast %cst_5 : f32 to vector<8x8xf32>
    %14 = arith.select %11, %12, %13 : vector<8x8xi1>, vector<8x8xf32>
    %15 = arith.addf %8, %14 : vector<8x8xf32>
    %cst_6 = arith.constant 0.000000e+00 : bf16
    %16 = vector.broadcast %cst_6 : bf16 to vector<1x8x128xbf16>
    %c0_7 = arith.constant 0 : index
    %c0_8 = arith.constant 0 : index
    %c0_9 = arith.constant 0 : index
    %17 = vector.load %arg3[%c0_7, %c0_8, %c0_9] : memref<1x8x128xbf16, #tpu.memory_space<vmem>>, vector<1x8x128xbf16>
    tpu.vector_store %arg3[%c0_7, %c0_8, %c0_9], %16 {strides = array<i32>} : memref<1x8x128xbf16, #tpu.memory_space<vmem>>, vector<1x8x128xbf16>,
    %18 = vector.extract_strided_slice %2 {offsets = [0, 0], sizes = [8, 8], strides = [1, 1]} : vector<8x128xbf16> to vector<8x8xbf16>
    %19 = vector.extract_strided_slice %3 {offsets = [0, 0], sizes = [8, 8], strides = [1, 1]} : vector<8x128xbf16> to vector<8x8xbf16>
    %cst_10 = arith.constant dense<0.000000e+00> : vector<8x8xf32>
    %20 = tpu.matmul %18, %19, %cst_10 {dimension_numbers = #tpu.dot_dimension_numbers<[1], [1], [0], [0], [0, 0, 1, 0], [], []>} : vector<8x8xbf16>, vector<8x8xbf16>, vector<8x8xf32> -> vector<8x8xf32>
    %cst_11 = arith.constant 0.353553385 : f32
    %21 = vector.broadcast %cst_11 : f32 to vector<8x8xf32>
    %22 = arith.mulf %20, %21 : vector<8x8xf32>
    %23 = arith.addf %22, %15 : vector<8x8xf32>
    %cst_12 = arith.constant dense<0xFF800000> : vector<8xf32>
    %24 = vector.multi_reduction <maximumf>, %23, %cst_12 [1] : vector<8x8xf32> to vector<8xf32>
    %25 = vector.shape_cast %24 : vector<8xf32> to vector<8x1xf32>
    %26 = vector.broadcast %25 : vector<8x1xf32> to vector<8x8xf32>
    %27 = arith.subf %23, %26 : vector<8x8xf32>
    %28 = math.exp %27 : vector<8x8xf32>
    %cst_13 = arith.constant dense<0.000000e+00> : vector<8xf32>
    %29 = vector.multi_reduction <add>, %28, %cst_13 [1] : vector<8x8xf32> to vector<8xf32>
    %30 = vector.shape_cast %29 : vector<8xf32> to vector<8x1xf32>
    %31 = tpu.reciprocal %30 {approx = true} : vector<8x1xf32> -> vector<8x1xf32>
    %32 = vector.broadcast %31 : vector<8x1xf32> to vector<8x8xf32>
    %33 = arith.mulf %28, %32 : vector<8x8xf32>
    %34 = arith.truncf %33 : vector<8x8xf32> to vector<8x8xbf16>
    %35 = vector.extract_strided_slice %4 {offsets = [0, 0], sizes = [8, 8], strides = [1, 1]} : vector<8x128xbf16> to vector<8x8xbf16>
    %cst_14 = arith.constant dense<0.000000e+00> : vector<8x8xf32>
    %36 = tpu.matmul %34, %35, %cst_14 {dimension_numbers = #tpu.dot_dimension_numbers<[1], [0], [0], [1], [0, 0, 1, 1], [], []>} : vector<8x8xbf16>, vector<8x8xbf16>, vector<8x8xf32> -> vector<8x8xf32>
    %37 = arith.truncf %36 : vector<8x8xf32> to vector<8x8xbf16>
    %c0_15 = arith.constant 0 : index
    %c0_16 = arith.constant 0 : index
    %c0_17 = arith.constant 0 : index
    %38 = vector.load %arg3[%c0_15, %c0_16, %c0_17] : memref<1x8x128xbf16, #tpu.memory_space<vmem>>, vector<1x8x8xbf16>
    %39 = vector.shape_cast %38 : vector<1x8x8xbf16> to vector<8x8xbf16>
    %40 = vector.shape_cast %37 : vector<8x8xbf16> to vector<1x8x8xbf16>
    tpu.vector_store %arg3[%c0_15, %c0_16, %c0_17], %40 {strides = array<i32>} : memref<1x8x128xbf16, #tpu.memory_space<vmem>>, vector<1x8x8xbf16>,
    %41 = vector.extract_strided_slice %2 {offsets = [0, 8], sizes = [8, 8], strides = [1, 1]} : vector<8x128xbf16> to vector<8x8xbf16>
    %42 = vector.extract_strided_slice %3 {offsets = [0, 8], sizes = [8, 8], strides = [1, 1]} : vector<8x128xbf16> to vector<8x8xbf16>
    %cst_18 = arith.constant dense<0.000000e+00> : vector<8x8xf32>
    %43 = tpu.matmul %41, %42, %cst_18 {dimension_numbers = #tpu.dot_dimension_numbers<[1], [1], [0], [0], [0, 0, 1, 0], [], []>} : vector<8x8xbf16>, vector<8x8xbf16>, vector<8x8xf32> -> vector<8x8xf32>
    %cst_19 = arith.constant 0.353553385 : f32
    %44 = vector.broadcast %cst_19 : f32 to vector<8x8xf32>
    %45 = arith.mulf %43, %44 : vector<8x8xf32>
    %46 = arith.addf %45, %15 : vector<8x8xf32>
    %cst_20 = arith.constant dense<0xFF800000> : vector<8xf32>
    %47 = vector.multi_reduction <maximumf>, %46, %cst_20 [1] : vector<8x8xf32> to vector<8xf32>
    %48 = vector.shape_cast %47 : vector<8xf32> to vector<8x1xf32>
    %49 = vector.broadcast %48 : vector<8x1xf32> to vector<8x8xf32>
    %50 = arith.subf %46, %49 : vector<8x8xf32>
    %51 = math.exp %50 : vector<8x8xf32>
    %cst_21 = arith.constant dense<0.000000e+00> : vector<8xf32>
    %52 = vector.multi_reduction <add>, %51, %cst_21 [1] : vector<8x8xf32> to vector<8xf32>
    %53 = vector.shape_cast %52 : vector<8xf32> to vector<8x1xf32>
    %54 = tpu.reciprocal %53 {approx = true} : vector<8x1xf32> -> vector<8x1xf32>
    %55 = vector.broadcast %54 : vector<8x1xf32> to vector<8x8xf32>
    %56 = arith.mulf %51, %55 : vector<8x8xf32>
    %57 = arith.truncf %56 : vector<8x8xf32> to vector<8x8xbf16>
    %58 = vector.extract_strided_slice %4 {offsets = [0, 8], sizes = [8, 8], strides = [1, 1]} : vector<8x128xbf16> to vector<8x8xbf16>
    %cst_22 = arith.constant dense<0.000000e+00> : vector<8x8xf32>
    %59 = tpu.matmul %57, %58, %cst_22 {dimension_numbers = #tpu.dot_dimension_numbers<[1], [0], [0], [1], [0, 0, 1, 1], [], []>} : vector<8x8xbf16>, vector<8x8xbf16>, vector<8x8xf32> -> vector<8x8xf32>
    %60 = arith.truncf %59 : vector<8x8xf32> to vector<8x8xbf16>
    %c0_23 = arith.constant 0 : index
    %c0_24 = arith.constant 0 : index
    %c8 = arith.constant 8 : index
    %61 = vector.load %arg3[%c0_23, %c0_24, %c8] : memref<1x8x128xbf16, #tpu.memory_space<vmem>>, vector<1x8x8xbf16>
    %62 = vector.shape_cast %61 : vector<1x8x8xbf16> to vector<8x8xbf16>
    %63 = vector.shape_cast %60 : vector<8x8xbf16> to vector<1x8x8xbf16>
    tpu.vector_store %arg3[%c0_23, %c0_24, %c8], %63 {strides = array<i32>} : memref<1x8x128xbf16, #tpu.memory_space<vmem>>, vector<1x8x8xbf16>,
    %64 = vector.extract_strided_slice %2 {offsets = [0, 16], sizes = [8, 8], strides = [1, 1]} : vector<8x128xbf16> to vector<8x8xbf16>
    %65 = vector.extract_strided_slice %3 {offsets = [0, 16], sizes = [8, 8], strides = [1, 1]} : vector<8x128xbf16> to vector<8x8xbf16>
    %cst_25 = arith.constant dense<0.000000e+00> : vector<8x8xf32>
    %66 = tpu.matmul %64, %65, %cst_25 {dimension_numbers = #tpu.dot_dimension_numbers<[1], [1], [0], [0], [0, 0, 1, 0], [], []>} : vector<8x8xbf16>, vector<8x8xbf16>, vector<8x8xf32> -> vector<8x8xf32>
    %cst_26 = arith.constant 0.353553385 : f32
    %67 = vector.broadcast %cst_26 : f32 to vector<8x8xf32>
    %68 = arith.mulf %66, %67 : vector<8x8xf32>
    %69 = arith.addf %68, %15 : vector<8x8xf32>
    %cst_27 = arith.constant dense<0xFF800000> : vector<8xf32>
    %70 = vector.multi_reduction <maximumf>, %69, %cst_27 [1] : vector<8x8xf32> to vector<8xf32>
    %71 = vector.shape_cast %70 : vector<8xf32> to vector<8x1xf32>
    %72 = vector.broadcast %71 : vector<8x1xf32> to vector<8x8xf32>
    %73 = arith.subf %69, %72 : vector<8x8xf32>
    %74 = math.exp %73 : vector<8x8xf32>
    %cst_28 = arith.constant dense<0.000000e+00> : vector<8xf32>
    %75 = vector.multi_reduction <add>, %74, %cst_28 [1] : vector<8x8xf32> to vector<8xf32>
    %76 = vector.shape_cast %75 : vector<8xf32> to vector<8x1xf32>
    %77 = tpu.reciprocal %76 {approx = true} : vector<8x1xf32> -> vector<8x1xf32>
    %78 = vector.broadcast %77 : vector<8x1xf32> to vector<8x8xf32>
    %79 = arith.mulf %74, %78 : vector<8x8xf32>
    %80 = arith.truncf %79 : vector<8x8xf32> to vector<8x8xbf16>
    %81 = vector.extract_strided_slice %4 {offsets = [0, 16], sizes = [8, 8], strides = [1, 1]} : vector<8x128xbf16> to vector<8x8xbf16>
    %cst_29 = arith.constant dense<0.000000e+00> : vector<8x8xf32>
    %82 = tpu.matmul %80, %81, %cst_29 {dimension_numbers = #tpu.dot_dimension_numbers<[1], [0], [0], [1], [0, 0, 1, 1], [], []>} : vector<8x8xbf16>, vector<8x8xbf16>, vector<8x8xf32> -> vector<8x8xf32>
    %83 = arith.truncf %82 : vector<8x8xf32> to vector<8x8xbf16>
    %c0_30 = arith.constant 0 : index
    %c0_31 = arith.constant 0 : index
    %c16 = arith.constant 16 : index
    %84 = vector.load %arg3[%c0_30, %c0_31, %c16] : memref<1x8x128xbf16, #tpu.memory_space<vmem>>, vector<1x8x8xbf16>
    %85 = vector.shape_cast %84 : vector<1x8x8xbf16> to vector<8x8xbf16>
    %86 = vector.shape_cast %83 : vector<8x8xbf16> to vector<1x8x8xbf16>
    tpu.vector_store %arg3[%c0_30, %c0_31, %c16], %86 {strides = array<i32>} : memref<1x8x128xbf16, #tpu.memory_space<vmem>>, vector<1x8x8xbf16>,
    %87 = vector.extract_strided_slice %2 {offsets = [0, 24], sizes = [8, 8], strides = [1, 1]} : vector<8x128xbf16> to vector<8x8xbf16>
    %88 = vector.extract_strided_slice %3 {offsets = [0, 24], sizes = [8, 8], strides = [1, 1]} : vector<8x128xbf16> to vector<8x8xbf16>
    %cst_32 = arith.constant dense<0.000000e+00> : vector<8x8xf32>
    %89 = tpu.matmul %87, %88, %cst_32 {dimension_numbers = #tpu.dot_dimension_numbers<[1], [1], [0], [0], [0, 0, 1, 0], [], []>} : vector<8x8xbf16>, vector<8x8xbf16>, vector<8x8xf32> -> vector<8x8xf32>
    %cst_33 = arith.constant 0.353553385 : f32
    %90 = vector.broadcast %cst_33 : f32 to vector<8x8xf32>
    %91 = arith.mulf %89, %90 : vector<8x8xf32>
    %92 = arith.addf %91, %15 : vector<8x8xf32>
    %cst_34 = arith.constant dense<0xFF800000> : vector<8xf32>
    %93 = vector.multi_reduction <maximumf>, %92, %cst_34 [1] : vector<8x8xf32> to vector<8xf32>
    %94 = vector.shape_cast %93 : vector<8xf32> to vector<8x1xf32>
    %95 = vector.broadcast %94 : vector<8x1xf32> to vector<8x8xf32>
    %96 = arith.subf %92, %95 : vector<8x8xf32>
    %97 = math.exp %96 : vector<8x8xf32>
    %cst_35 = arith.constant dense<0.000000e+00> : vector<8xf32>
    %98 = vector.multi_reduction <add>, %97, %cst_35 [1] : vector<8x8xf32> to vector<8xf32>
    %99 = vector.shape_cast %98 : vector<8xf32> to vector<8x1xf32>
    %100 = tpu.reciprocal %99 {approx = true} : vector<8x1xf32> -> vector<8x1xf32>
    %101 = vector.broadcast %100 : vector<8x1xf32> to vector<8x8xf32>
    %102 = arith.mulf %97, %101 : vector<8x8xf32>
    %103 = arith.truncf %102 : vector<8x8xf32> to vector<8x8xbf16>
    %104 = vector.extract_strided_slice %4 {offsets = [0, 24], sizes = [8, 8], strides = [1, 1]} : vector<8x128xbf16> to vector<8x8xbf16>
    %cst_36 = arith.constant dense<0.000000e+00> : vector<8x8xf32>
    %105 = tpu.matmul %103, %104, %cst_36 {dimension_numbers = #tpu.dot_dimension_numbers<[1], [0], [0], [1], [0, 0, 1, 1], [], []>} : vector<8x8xbf16>, vector<8x8xbf16>, vector<8x8xf32> -> vector<8x8xf32>
    %106 = arith.truncf %105 : vector<8x8xf32> to vector<8x8xbf16>
    %c0_37 = arith.constant 0 : index
    %c0_38 = arith.constant 0 : index
    %c24 = arith.constant 24 : index
    %107 = vector.load %arg3[%c0_37, %c0_38, %c24] : memref<1x8x128xbf16, #tpu.memory_space<vmem>>, vector<1x8x8xbf16>
    %108 = vector.shape_cast %107 : vector<1x8x8xbf16> to vector<8x8xbf16>
    %109 = vector.shape_cast %106 : vector<8x8xbf16> to vector<1x8x8xbf16>
    tpu.vector_store %arg3[%c0_37, %c0_38, %c24], %109 {strides = array<i32>} : memref<1x8x128xbf16, #tpu.memory_space<vmem>>, vector<1x8x8xbf16>,
    return
  }
  func.func @transform_0(%arg0: i32) -> (i32, i32, i32) {
    %c0_i32 = arith.constant 0 : i32
    %c0_i32_0 = arith.constant 0 : i32
    %c0_i32_1 = arith.constant 0 : i32
    return %arg0, %c0_i32, %c0_i32_0 : i32, i32, i32
  }
  func.func @transform_1(%arg0: i32) -> (i32, i32, i32) {
    %c0_i32 = arith.constant 0 : i32
    %c0_i32_0 = arith.constant 0 : i32
    %c0_i32_1 = arith.constant 0 : i32
    return %arg0, %c0_i32, %c0_i32_0 : i32, i32, i32
  }
  func.func @transform_2(%arg0: i32) -> (i32, i32, i32) {
    %c0_i32 = arith.constant 0 : i32
    %c0_i32_0 = arith.constant 0 : i32
    %c0_i32_1 = arith.constant 0 : i32
    return %arg0, %c0_i32, %c0_i32_0 : i32, i32, i32
  }
}

module attributes {stable_mosaic.version = 11 : i64} {
  func.func @_matmul_kernel(%arg0: i32, %arg1: i32, %arg2: i32, %arg3: memref<16x128xbf16, #tpu.memory_space<vmem>>, %arg4: memref<128x128xbf16, #tpu.memory_space<vmem>>, %arg5: memref<1x128xf32, #tpu.memory_space<vmem>>, %arg6: memref<16x128xbf16, #tpu.memory_space<vmem>>, %arg7: memref<16x128xf32, #tpu.memory_space<vmem>>) attributes {dimension_semantics = [#tpu.dimension_semantics<parallel>, #tpu.dimension_semantics<parallel>, #tpu.dimension_semantics<arbitrary>], iteration_bounds = array<i64: 1, 1, 1>, scalar_prefetch = 0 : i64, scratch_operands = 1 : i64, tpu.core_type = #tpu.core_type<tc>, window_params = [{transform_indices = @transform_0, window_bounds = array<i64: 16, 128>}, {transform_indices = @transform_1, window_bounds = array<i64: 128, 128>}, {transform_indices = @transform_2, window_bounds = array<i64: 1, 128>}, {transform_indices = @transform_3, window_bounds = array<i64: 16, 128>}]} {
    %c0_i32 = arith.constant 0 : i32
    %0 = arith.cmpi eq, %arg2, %c0_i32 : i32
    %1 = arith.extui %0 : i1 to i32
    %c0_i32_0 = arith.constant 0 : i32
    %2 = arith.cmpi ne, %1, %c0_i32_0 : i32
    scf.if %2 {
      %cst_10 = arith.constant 0.000000e+00 : f32
      %12 = vector.broadcast %cst_10 : f32 to vector<16x128xf32>
      %c0_11 = arith.constant 0 : index
      %c0_12 = arith.constant 0 : index
      %13 = vector.load %arg7[%c0_11, %c0_12] : memref<16x128xf32, #tpu.memory_space<vmem>>, vector<16x128xf32>
      tpu.vector_store %arg7[%c0_11, %c0_12], %12 {strides = array<i32>} : memref<16x128xf32, #tpu.memory_space<vmem>>, vector<16x128xf32>,
    } else {
    }
    %c0 = arith.constant 0 : index
    %c0_1 = arith.constant 0 : index
    %3 = vector.load %arg7[%c0, %c0_1] : memref<16x128xf32, #tpu.memory_space<vmem>>, vector<16x128xf32>
    %c0_2 = arith.constant 0 : index
    %c0_3 = arith.constant 0 : index
    %4 = vector.load %arg3[%c0_2, %c0_3] : memref<16x128xbf16, #tpu.memory_space<vmem>>, vector<16x128xbf16>
    %c0_4 = arith.constant 0 : index
    %c0_5 = arith.constant 0 : index
    %5 = vector.load %arg4[%c0_4, %c0_5] : memref<128x128xbf16, #tpu.memory_space<vmem>>, vector<128x128xbf16>
    %cst = arith.constant dense<0.000000e+00> : vector<16x128xf32>
    %6 = tpu.matmul %4, %5, %cst {dimension_numbers = #tpu.dot_dimension_numbers<[1], [0], [0], [1], [0, 0, 1, 1], [], []>} : vector<16x128xbf16>, vector<128x128xbf16>, vector<16x128xf32> -> vector<16x128xf32>
    %7 = arith.addf %3, %6 : vector<16x128xf32>
    %c0_6 = arith.constant 0 : index
    %c0_7 = arith.constant 0 : index
    %8 = vector.load %arg7[%c0_6, %c0_7] : memref<16x128xf32, #tpu.memory_space<vmem>>, vector<16x128xf32>
    tpu.vector_store %arg7[%c0_6, %c0_7], %7 {strides = array<i32>} : memref<16x128xf32, #tpu.memory_space<vmem>>, vector<16x128xf32>,
    %c0_i32_8 = arith.constant 0 : i32
    %9 = arith.cmpi eq, %arg2, %c0_i32_8 : i32
    %10 = arith.extui %9 : i1 to i32
    %c0_i32_9 = arith.constant 0 : i32
    %11 = arith.cmpi ne, %10, %c0_i32_9 : i32
    scf.if %11 {
      %c0_10 = arith.constant 0 : index
      %c0_11 = arith.constant 0 : index
      %12 = vector.load %arg7[%c0_10, %c0_11] : memref<16x128xf32, #tpu.memory_space<vmem>>, vector<16x128xf32>
      %c0_12 = arith.constant 0 : index
      %c0_13 = arith.constant 0 : index
      %13 = vector.load %arg5[%c0_12, %c0_13] : memref<1x128xf32, #tpu.memory_space<vmem>>, vector<1x128xf32>
      %14 = vector.broadcast %13 : vector<1x128xf32> to vector<16x128xf32>
      %15 = arith.addf %12, %14 : vector<16x128xf32>
      %16 = arith.truncf %15 : vector<16x128xf32> to vector<16x128xbf16>
      %c0_14 = arith.constant 0 : index
      %c0_15 = arith.constant 0 : index
      %17 = vector.load %arg6[%c0_14, %c0_15] : memref<16x128xbf16, #tpu.memory_space<vmem>>, vector<16x128xbf16>
      tpu.vector_store %arg6[%c0_14, %c0_15], %16 {strides = array<i32>} : memref<16x128xbf16, #tpu.memory_space<vmem>>, vector<16x128xbf16>,
    } else {
    }
    return
  }
  func.func @transform_0(%arg0: i32, %arg1: i32, %arg2: i32) -> (i32, i32) {
    %c0_i32 = arith.constant 0 : i32
    return %arg0, %arg2 : i32, i32
  }
  func.func @transform_1(%arg0: i32, %arg1: i32, %arg2: i32) -> (i32, i32) {
    %c0_i32 = arith.constant 0 : i32
    return %arg2, %arg1 : i32, i32
  }
  func.func @transform_2(%arg0: i32, %arg1: i32, %arg2: i32) -> (i32, i32) {
    %c0_i32 = arith.constant 0 : i32
    %c0_i32_0 = arith.constant 0 : i32
    return %c0_i32, %arg1 : i32, i32
  }
  func.func @transform_3(%arg0: i32, %arg1: i32, %arg2: i32) -> (i32, i32) {
    %c0_i32 = arith.constant 0 : i32
    return %arg0, %arg1 : i32, i32
  }
}

module attributes {stable_mosaic.version = 11 : i64} {
  func.func @_matmul_res_ln_kernel(%arg0: i32, %arg1: i32, %arg2: memref<16x128xbf16, #tpu.memory_space<vmem>>, %arg3: memref<128x128xbf16, #tpu.memory_space<vmem>>, %arg4: memref<1x128xf32, #tpu.memory_space<vmem>>, %arg5: memref<16x128xbf16, #tpu.memory_space<vmem>>, %arg6: memref<1x128xf32, #tpu.memory_space<vmem>>, %arg7: memref<1x128xf32, #tpu.memory_space<vmem>>, %arg8: memref<16x128xbf16, #tpu.memory_space<vmem>>, %arg9: memref<16x128xf32, #tpu.memory_space<vmem>>) attributes {dimension_semantics = [#tpu.dimension_semantics<parallel>, #tpu.dimension_semantics<arbitrary>], iteration_bounds = array<i64: 1, 1>, scalar_prefetch = 0 : i64, scratch_operands = 1 : i64, tpu.core_type = #tpu.core_type<tc>, window_params = [{transform_indices = @transform_0, window_bounds = array<i64: 16, 128>}, {transform_indices = @transform_1, window_bounds = array<i64: 128, 128>}, {pipeline_mode = #tpu.pipeline_mode<synchronous>, transform_indices = @transform_2, window_bounds = array<i64: 1, 128>}, {transform_indices = @transform_3, window_bounds = array<i64: 16, 128>}, {pipeline_mode = #tpu.pipeline_mode<synchronous>, transform_indices = @transform_4, window_bounds = array<i64: 1, 128>}, {pipeline_mode = #tpu.pipeline_mode<synchronous>, transform_indices = @transform_5, window_bounds = array<i64: 1, 128>}, {transform_indices = @transform_6, window_bounds = array<i64: 16, 128>}]} {
    %c0_i32 = arith.constant 0 : i32
    %0 = arith.cmpi eq, %arg1, %c0_i32 : i32
    %1 = arith.extui %0 : i1 to i32
    %c0_i32_0 = arith.constant 0 : i32
    %2 = arith.cmpi ne, %1, %c0_i32_0 : i32
    scf.if %2 {
      %cst_10 = arith.constant 0.000000e+00 : f32
      %12 = vector.broadcast %cst_10 : f32 to vector<16x128xf32>
      %c0_11 = arith.constant 0 : index
      %c0_12 = arith.constant 0 : index
      %13 = vector.load %arg9[%c0_11, %c0_12] : memref<16x128xf32, #tpu.memory_space<vmem>>, vector<16x128xf32>
      tpu.vector_store %arg9[%c0_11, %c0_12], %12 {strides = array<i32>} : memref<16x128xf32, #tpu.memory_space<vmem>>, vector<16x128xf32>,
    } else {
    }
    %c0 = arith.constant 0 : index
    %c0_1 = arith.constant 0 : index
    %3 = vector.load %arg9[%c0, %c0_1] : memref<16x128xf32, #tpu.memory_space<vmem>>, vector<16x128xf32>
    %c0_2 = arith.constant 0 : index
    %c0_3 = arith.constant 0 : index
    %4 = vector.load %arg2[%c0_2, %c0_3] : memref<16x128xbf16, #tpu.memory_space<vmem>>, vector<16x128xbf16>
    %c0_4 = arith.constant 0 : index
    %c0_5 = arith.constant 0 : index
    %5 = vector.load %arg3[%c0_4, %c0_5] : memref<128x128xbf16, #tpu.memory_space<vmem>>, vector<128x128xbf16>
    %cst = arith.constant dense<0.000000e+00> : vector<16x128xf32>
    %6 = tpu.matmul %4, %5, %cst {dimension_numbers = #tpu.dot_dimension_numbers<[1], [0], [0], [1], [0, 0, 1, 1], [], []>} : vector<16x128xbf16>, vector<128x128xbf16>, vector<16x128xf32> -> vector<16x128xf32>
    %7 = arith.addf %3, %6 : vector<16x128xf32>
    %c0_6 = arith.constant 0 : index
    %c0_7 = arith.constant 0 : index
    %8 = vector.load %arg9[%c0_6, %c0_7] : memref<16x128xf32, #tpu.memory_space<vmem>>, vector<16x128xf32>
    tpu.vector_store %arg9[%c0_6, %c0_7], %7 {strides = array<i32>} : memref<16x128xf32, #tpu.memory_space<vmem>>, vector<16x128xf32>,
    %c0_i32_8 = arith.constant 0 : i32
    %9 = arith.cmpi eq, %arg1, %c0_i32_8 : i32
    %10 = arith.extui %9 : i1 to i32
    %c0_i32_9 = arith.constant 0 : i32
    %11 = arith.cmpi ne, %10, %c0_i32_9 : i32
    scf.if %11 {
      %c0_10 = arith.constant 0 : index
      %c0_11 = arith.constant 0 : index
      %12 = vector.load %arg9[%c0_10, %c0_11] : memref<16x128xf32, #tpu.memory_space<vmem>>, vector<16x128xf32>
      %c0_12 = arith.constant 0 : index
      %c0_13 = arith.constant 0 : index
      %13 = vector.load %arg4[%c0_12, %c0_13] : memref<1x128xf32, #tpu.memory_space<vmem>>, vector<1x128xf32>
      %14 = vector.broadcast %13 : vector<1x128xf32> to vector<16x128xf32>
      %15 = arith.addf %12, %14 : vector<16x128xf32>
      %c0_14 = arith.constant 0 : index
      %c0_15 = arith.constant 0 : index
      %16 = vector.load %arg5[%c0_14, %c0_15] : memref<16x128xbf16, #tpu.memory_space<vmem>>, vector<16x128xbf16>
      %17 = arith.extf %16 : vector<16x128xbf16> to vector<16x128xf32>
      %18 = arith.addf %15, %17 : vector<16x128xf32>
      %c0_16 = arith.constant 0 : index
      %c0_17 = arith.constant 0 : index
      %19 = vector.load %arg6[%c0_16, %c0_17] : memref<1x128xf32, #tpu.memory_space<vmem>>, vector<1x128xf32>
      %c0_18 = arith.constant 0 : index
      %c0_19 = arith.constant 0 : index
      %20 = vector.load %arg7[%c0_18, %c0_19] : memref<1x128xf32, #tpu.memory_space<vmem>>, vector<1x128xf32>
      %21 = tpu.iota {dimensions = array<i32: 1>} : vector<16x128xi32>
      %c32_i32 = arith.constant 32 : i32
      %22 = vector.broadcast %c32_i32 : i32 to vector<16x128xi32>
      %23 = arith.cmpi slt, %21, %22 : vector<16x128xi32>
      %cst_20 = arith.constant 0.000000e+00 : f32
      %24 = vector.broadcast %cst_20 : f32 to vector<16x128xf32>
      %25 = arith.select %23, %18, %24 : vector<16x128xi1>, vector<16x128xf32>
      %cst_21 = arith.constant dense<0.000000e+00> : vector<16xf32>
      %26 = vector.multi_reduction <add>, %25, %cst_21 [1] : vector<16x128xf32> to vector<16xf32>
      %27 = vector.shape_cast %26 : vector<16xf32> to vector<16x1xf32>
      %cst_22 = arith.constant 3.125000e-02 : f32
      %28 = vector.broadcast %cst_22 : f32 to vector<16x1xf32>
      %29 = arith.mulf %27, %28 : vector<16x1xf32>
      %30 = vector.broadcast %29 : vector<16x1xf32> to vector<16x128xf32>
      %31 = arith.subf %18, %30 : vector<16x128xf32>
      %cst_23 = arith.constant 0.000000e+00 : f32
      %32 = vector.broadcast %cst_23 : f32 to vector<16x128xf32>
      %33 = arith.select %23, %31, %32 : vector<16x128xi1>, vector<16x128xf32>
      %34 = arith.mulf %33, %33 : vector<16x128xf32>
      %cst_24 = arith.constant dense<0.000000e+00> : vector<16xf32>
      %35 = vector.multi_reduction <add>, %34, %cst_24 [1] : vector<16x128xf32> to vector<16xf32>
      %36 = vector.shape_cast %35 : vector<16xf32> to vector<16x1xf32>
      %cst_25 = arith.constant 3.125000e-02 : f32
      %37 = vector.broadcast %cst_25 : f32 to vector<16x1xf32>
      %38 = arith.mulf %36, %37 : vector<16x1xf32>
      %39 = vector.broadcast %29 : vector<16x1xf32> to vector<16x128xf32>
      %40 = arith.subf %18, %39 : vector<16x128xf32>
      %cst_26 = arith.constant 9.99999974E-6 : f32
      %41 = vector.broadcast %cst_26 : f32 to vector<16x1xf32>
      %42 = arith.addf %38, %41 : vector<16x1xf32>
      %43 = math.rsqrt %42 : vector<16x1xf32>
      %44 = vector.broadcast %43 : vector<16x1xf32> to vector<16x128xf32>
      %45 = arith.mulf %40, %44 : vector<16x128xf32>
      %46 = vector.broadcast %19 : vector<1x128xf32> to vector<16x128xf32>
      %47 = arith.mulf %45, %46 : vector<16x128xf32>
      %48 = vector.broadcast %20 : vector<1x128xf32> to vector<16x128xf32>
      %49 = arith.addf %47, %48 : vector<16x128xf32>
      %50 = arith.truncf %49 : vector<16x128xf32> to vector<16x128xbf16>
      %c0_27 = arith.constant 0 : index
      %c0_28 = arith.constant 0 : index
      %51 = vector.load %arg8[%c0_27, %c0_28] : memref<16x128xbf16, #tpu.memory_space<vmem>>, vector<16x128xbf16>
      tpu.vector_store %arg8[%c0_27, %c0_28], %50 {strides = array<i32>} : memref<16x128xbf16, #tpu.memory_space<vmem>>, vector<16x128xbf16>,
    } else {
    }
    return
  }
  func.func @transform_0(%arg0: i32, %arg1: i32) -> (i32, i32) {
    %c0_i32 = arith.constant 0 : i32
    return %arg0, %arg1 : i32, i32
  }
  func.func @transform_1(%arg0: i32, %arg1: i32) -> (i32, i32) {
    %c0_i32 = arith.constant 0 : i32
    %c0_i32_0 = arith.constant 0 : i32
    return %arg1, %c0_i32 : i32, i32
  }
  func.func @transform_2(%arg0: i32, %arg1: i32) -> (i32, i32) {
    %c0_i32 = arith.constant 0 : i32
    %c0_i32_0 = arith.constant 0 : i32
    %c0_i32_1 = arith.constant 0 : i32
    return %c0_i32, %c0_i32_0 : i32, i32
  }
  func.func @transform_3(%arg0: i32, %arg1: i32) -> (i32, i32) {
    %c0_i32 = arith.constant 0 : i32
    %c0_i32_0 = arith.constant 0 : i32
    return %arg0, %c0_i32 : i32, i32
  }
  func.func @transform_4(%arg0: i32, %arg1: i32) -> (i32, i32) {
    %c0_i32 = arith.constant 0 : i32
    %c0_i32_0 = arith.constant 0 : i32
    %c0_i32_1 = arith.constant 0 : i32
    return %c0_i32, %c0_i32_0 : i32, i32
  }
  func.func @transform_5(%arg0: i32, %arg1: i32) -> (i32, i32) {
    %c0_i32 = arith.constant 0 : i32
    %c0_i32_0 = arith.constant 0 : i32
    %c0_i32_1 = arith.constant 0 : i32
    return %c0_i32, %c0_i32_0 : i32, i32
  }
  func.func @transform_6(%arg0: i32, %arg1: i32) -> (i32, i32) {
    %c0_i32 = arith.constant 0 : i32
    %c0_i32_0 = arith.constant 0 : i32
    return %arg0, %c0_i32 : i32, i32
  }
}

module attributes {stable_mosaic.version = 11 : i64} {
  func.func @_self_attn_kernel(%arg0: i32, %arg1: memref<1x8x384xbf16, #tpu.memory_space<vmem>>, %arg2: memref<1x1x8xf32, #tpu.memory_space<vmem>>, %arg3: memref<1x8x128xbf16, #tpu.memory_space<vmem>>) attributes {dimension_semantics = [#tpu.dimension_semantics<parallel>], iteration_bounds = array<i64: 2>, scalar_prefetch = 0 : i64, scratch_operands = 0 : i64, tpu.core_type = #tpu.core_type<tc>, window_params = [{transform_indices = @transform_0, window_bounds = array<i64: 1, 8, 384>}, {transform_indices = @transform_1, window_bounds = array<i64: 1, 1, 8>}, {transform_indices = @transform_2, window_bounds = array<i64: 1, 8, 128>}]} {
    %c0 = arith.constant 0 : index
    %c0_0 = arith.constant 0 : index
    %c0_1 = arith.constant 0 : index
    %0 = vector.load %arg1[%c0, %c0_0, %c0_1] : memref<1x8x384xbf16, #tpu.memory_space<vmem>>, vector<1x8x384xbf16>
    %1 = vector.shape_cast %0 : vector<1x8x384xbf16> to vector<8x384xbf16>
    %2 = vector.extract_strided_slice %1 {offsets = [0, 0], sizes = [8, 128], strides = [1, 1]} : vector<8x384xbf16> to vector<8x128xbf16>
    %3 = vector.extract_strided_slice %1 {offsets = [0, 128], sizes = [8, 128], strides = [1, 1]} : vector<8x384xbf16> to vector<8x128xbf16>
    %4 = vector.extract_strided_slice %1 {offsets = [0, 256], sizes = [8, 128], strides = [1, 1]} : vector<8x384xbf16> to vector<8x128xbf16>
    %c0_2 = arith.constant 0 : index
    %c0_3 = arith.constant 0 : index
    %c0_4 = arith.constant 0 : index
    %5 = vector.load %arg2[%c0_2, %c0_3, %c0_4] : memref<1x1x8xf32, #tpu.memory_space<vmem>>, vector<1x1x8xf32>
    %6 = vector.shape_cast %5 : vector<1x1x8xf32> to vector<1x8xf32>
    %7 = vector.shape_cast %6 : vector<1x8xf32> to vector<1x8xf32>
    %8 = vector.broadcast %7 : vector<1x8xf32> to vector<8x8xf32>
    %cst = arith.constant 0.000000e+00 : bf16
    %9 = vector.broadcast %cst : bf16 to vector<1x8x128xbf16>
    %c0_5 = arith.constant 0 : index
    %c0_6 = arith.constant 0 : index
    %c0_7 = arith.constant 0 : index
    %10 = vector.load %arg3[%c0_5, %c0_6, %c0_7] : memref<1x8x128xbf16, #tpu.memory_space<vmem>>, vector<1x8x128xbf16>
    tpu.vector_store %arg3[%c0_5, %c0_6, %c0_7], %9 {strides = array<i32>} : memref<1x8x128xbf16, #tpu.memory_space<vmem>>, vector<1x8x128xbf16>,
    %11 = vector.extract_strided_slice %2 {offsets = [0, 0], sizes = [8, 8], strides = [1, 1]} : vector<8x128xbf16> to vector<8x8xbf16>
    %12 = vector.extract_strided_slice %3 {offsets = [0, 0], sizes = [8, 8], strides = [1, 1]} : vector<8x128xbf16> to vector<8x8xbf16>
    %cst_8 = arith.constant dense<0.000000e+00> : vector<8x8xf32>
    %13 = tpu.matmul %11, %12, %cst_8 {dimension_numbers = #tpu.dot_dimension_numbers<[1], [1], [0], [0], [0, 0, 1, 0], [], []>} : vector<8x8xbf16>, vector<8x8xbf16>, vector<8x8xf32> -> vector<8x8xf32>
    %cst_9 = arith.constant 0.353553385 : f32
    %14 = vector.broadcast %cst_9 : f32 to vector<8x8xf32>
    %15 = arith.mulf %13, %14 : vector<8x8xf32>
    %16 = arith.addf %15, %8 : vector<8x8xf32>
    %cst_10 = arith.constant dense<0xFF800000> : vector<8xf32>
    %17 = vector.multi_reduction <maximumf>, %16, %cst_10 [1] : vector<8x8xf32> to vector<8xf32>
    %18 = vector.shape_cast %17 : vector<8xf32> to vector<8x1xf32>
    %19 = vector.broadcast %18 : vector<8x1xf32> to vector<8x8xf32>
    %20 = arith.subf %16, %19 : vector<8x8xf32>
    %21 = math.exp %20 : vector<8x8xf32>
    %cst_11 = arith.constant dense<0.000000e+00> : vector<8xf32>
    %22 = vector.multi_reduction <add>, %21, %cst_11 [1] : vector<8x8xf32> to vector<8xf32>
    %23 = vector.shape_cast %22 : vector<8xf32> to vector<8x1xf32>
    %24 = tpu.reciprocal %23 {approx = true} : vector<8x1xf32> -> vector<8x1xf32>
    %25 = vector.broadcast %24 : vector<8x1xf32> to vector<8x8xf32>
    %26 = arith.mulf %21, %25 : vector<8x8xf32>
    %27 = arith.truncf %26 : vector<8x8xf32> to vector<8x8xbf16>
    %28 = vector.extract_strided_slice %4 {offsets = [0, 0], sizes = [8, 8], strides = [1, 1]} : vector<8x128xbf16> to vector<8x8xbf16>
    %cst_12 = arith.constant dense<0.000000e+00> : vector<8x8xf32>
    %29 = tpu.matmul %27, %28, %cst_12 {dimension_numbers = #tpu.dot_dimension_numbers<[1], [0], [0], [1], [0, 0, 1, 1], [], []>} : vector<8x8xbf16>, vector<8x8xbf16>, vector<8x8xf32> -> vector<8x8xf32>
    %30 = arith.truncf %29 : vector<8x8xf32> to vector<8x8xbf16>
    %c0_13 = arith.constant 0 : index
    %c0_14 = arith.constant 0 : index
    %c0_15 = arith.constant 0 : index
    %31 = vector.load %arg3[%c0_13, %c0_14, %c0_15] : memref<1x8x128xbf16, #tpu.memory_space<vmem>>, vector<1x8x8xbf16>
    %32 = vector.shape_cast %31 : vector<1x8x8xbf16> to vector<8x8xbf16>
    %33 = vector.shape_cast %30 : vector<8x8xbf16> to vector<1x8x8xbf16>
    tpu.vector_store %arg3[%c0_13, %c0_14, %c0_15], %33 {strides = array<i32>} : memref<1x8x128xbf16, #tpu.memory_space<vmem>>, vector<1x8x8xbf16>,
    %34 = vector.extract_strided_slice %2 {offsets = [0, 8], sizes = [8, 8], strides = [1, 1]} : vector<8x128xbf16> to vector<8x8xbf16>
    %35 = vector.extract_strided_slice %3 {offsets = [0, 8], sizes = [8, 8], strides = [1, 1]} : vector<8x128xbf16> to vector<8x8xbf16>
    %cst_16 = arith.constant dense<0.000000e+00> : vector<8x8xf32>
    %36 = tpu.matmul %34, %35, %cst_16 {dimension_numbers = #tpu.dot_dimension_numbers<[1], [1], [0], [0], [0, 0, 1, 0], [], []>} : vector<8x8xbf16>, vector<8x8xbf16>, vector<8x8xf32> -> vector<8x8xf32>
    %cst_17 = arith.constant 0.353553385 : f32
    %37 = vector.broadcast %cst_17 : f32 to vector<8x8xf32>
    %38 = arith.mulf %36, %37 : vector<8x8xf32>
    %39 = arith.addf %38, %8 : vector<8x8xf32>
    %cst_18 = arith.constant dense<0xFF800000> : vector<8xf32>
    %40 = vector.multi_reduction <maximumf>, %39, %cst_18 [1] : vector<8x8xf32> to vector<8xf32>
    %41 = vector.shape_cast %40 : vector<8xf32> to vector<8x1xf32>
    %42 = vector.broadcast %41 : vector<8x1xf32> to vector<8x8xf32>
    %43 = arith.subf %39, %42 : vector<8x8xf32>
    %44 = math.exp %43 : vector<8x8xf32>
    %cst_19 = arith.constant dense<0.000000e+00> : vector<8xf32>
    %45 = vector.multi_reduction <add>, %44, %cst_19 [1] : vector<8x8xf32> to vector<8xf32>
    %46 = vector.shape_cast %45 : vector<8xf32> to vector<8x1xf32>
    %47 = tpu.reciprocal %46 {approx = true} : vector<8x1xf32> -> vector<8x1xf32>
    %48 = vector.broadcast %47 : vector<8x1xf32> to vector<8x8xf32>
    %49 = arith.mulf %44, %48 : vector<8x8xf32>
    %50 = arith.truncf %49 : vector<8x8xf32> to vector<8x8xbf16>
    %51 = vector.extract_strided_slice %4 {offsets = [0, 8], sizes = [8, 8], strides = [1, 1]} : vector<8x128xbf16> to vector<8x8xbf16>
    %cst_20 = arith.constant dense<0.000000e+00> : vector<8x8xf32>
    %52 = tpu.matmul %50, %51, %cst_20 {dimension_numbers = #tpu.dot_dimension_numbers<[1], [0], [0], [1], [0, 0, 1, 1], [], []>} : vector<8x8xbf16>, vector<8x8xbf16>, vector<8x8xf32> -> vector<8x8xf32>
    %53 = arith.truncf %52 : vector<8x8xf32> to vector<8x8xbf16>
    %c0_21 = arith.constant 0 : index
    %c0_22 = arith.constant 0 : index
    %c8 = arith.constant 8 : index
    %54 = vector.load %arg3[%c0_21, %c0_22, %c8] : memref<1x8x128xbf16, #tpu.memory_space<vmem>>, vector<1x8x8xbf16>
    %55 = vector.shape_cast %54 : vector<1x8x8xbf16> to vector<8x8xbf16>
    %56 = vector.shape_cast %53 : vector<8x8xbf16> to vector<1x8x8xbf16>
    tpu.vector_store %arg3[%c0_21, %c0_22, %c8], %56 {strides = array<i32>} : memref<1x8x128xbf16, #tpu.memory_space<vmem>>, vector<1x8x8xbf16>,
    %57 = vector.extract_strided_slice %2 {offsets = [0, 16], sizes = [8, 8], strides = [1, 1]} : vector<8x128xbf16> to vector<8x8xbf16>
    %58 = vector.extract_strided_slice %3 {offsets = [0, 16], sizes = [8, 8], strides = [1, 1]} : vector<8x128xbf16> to vector<8x8xbf16>
    %cst_23 = arith.constant dense<0.000000e+00> : vector<8x8xf32>
    %59 = tpu.matmul %57, %58, %cst_23 {dimension_numbers = #tpu.dot_dimension_numbers<[1], [1], [0], [0], [0, 0, 1, 0], [], []>} : vector<8x8xbf16>, vector<8x8xbf16>, vector<8x8xf32> -> vector<8x8xf32>
    %cst_24 = arith.constant 0.353553385 : f32
    %60 = vector.broadcast %cst_24 : f32 to vector<8x8xf32>
    %61 = arith.mulf %59, %60 : vector<8x8xf32>
    %62 = arith.addf %61, %8 : vector<8x8xf32>
    %cst_25 = arith.constant dense<0xFF800000> : vector<8xf32>
    %63 = vector.multi_reduction <maximumf>, %62, %cst_25 [1] : vector<8x8xf32> to vector<8xf32>
    %64 = vector.shape_cast %63 : vector<8xf32> to vector<8x1xf32>
    %65 = vector.broadcast %64 : vector<8x1xf32> to vector<8x8xf32>
    %66 = arith.subf %62, %65 : vector<8x8xf32>
    %67 = math.exp %66 : vector<8x8xf32>
    %cst_26 = arith.constant dense<0.000000e+00> : vector<8xf32>
    %68 = vector.multi_reduction <add>, %67, %cst_26 [1] : vector<8x8xf32> to vector<8xf32>
    %69 = vector.shape_cast %68 : vector<8xf32> to vector<8x1xf32>
    %70 = tpu.reciprocal %69 {approx = true} : vector<8x1xf32> -> vector<8x1xf32>
    %71 = vector.broadcast %70 : vector<8x1xf32> to vector<8x8xf32>
    %72 = arith.mulf %67, %71 : vector<8x8xf32>
    %73 = arith.truncf %72 : vector<8x8xf32> to vector<8x8xbf16>
    %74 = vector.extract_strided_slice %4 {offsets = [0, 16], sizes = [8, 8], strides = [1, 1]} : vector<8x128xbf16> to vector<8x8xbf16>
    %cst_27 = arith.constant dense<0.000000e+00> : vector<8x8xf32>
    %75 = tpu.matmul %73, %74, %cst_27 {dimension_numbers = #tpu.dot_dimension_numbers<[1], [0], [0], [1], [0, 0, 1, 1], [], []>} : vector<8x8xbf16>, vector<8x8xbf16>, vector<8x8xf32> -> vector<8x8xf32>
    %76 = arith.truncf %75 : vector<8x8xf32> to vector<8x8xbf16>
    %c0_28 = arith.constant 0 : index
    %c0_29 = arith.constant 0 : index
    %c16 = arith.constant 16 : index
    %77 = vector.load %arg3[%c0_28, %c0_29, %c16] : memref<1x8x128xbf16, #tpu.memory_space<vmem>>, vector<1x8x8xbf16>
    %78 = vector.shape_cast %77 : vector<1x8x8xbf16> to vector<8x8xbf16>
    %79 = vector.shape_cast %76 : vector<8x8xbf16> to vector<1x8x8xbf16>
    tpu.vector_store %arg3[%c0_28, %c0_29, %c16], %79 {strides = array<i32>} : memref<1x8x128xbf16, #tpu.memory_space<vmem>>, vector<1x8x8xbf16>,
    %80 = vector.extract_strided_slice %2 {offsets = [0, 24], sizes = [8, 8], strides = [1, 1]} : vector<8x128xbf16> to vector<8x8xbf16>
    %81 = vector.extract_strided_slice %3 {offsets = [0, 24], sizes = [8, 8], strides = [1, 1]} : vector<8x128xbf16> to vector<8x8xbf16>
    %cst_30 = arith.constant dense<0.000000e+00> : vector<8x8xf32>
    %82 = tpu.matmul %80, %81, %cst_30 {dimension_numbers = #tpu.dot_dimension_numbers<[1], [1], [0], [0], [0, 0, 1, 0], [], []>} : vector<8x8xbf16>, vector<8x8xbf16>, vector<8x8xf32> -> vector<8x8xf32>
    %cst_31 = arith.constant 0.353553385 : f32
    %83 = vector.broadcast %cst_31 : f32 to vector<8x8xf32>
    %84 = arith.mulf %82, %83 : vector<8x8xf32>
    %85 = arith.addf %84, %8 : vector<8x8xf32>
    %cst_32 = arith.constant dense<0xFF800000> : vector<8xf32>
    %86 = vector.multi_reduction <maximumf>, %85, %cst_32 [1] : vector<8x8xf32> to vector<8xf32>
    %87 = vector.shape_cast %86 : vector<8xf32> to vector<8x1xf32>
    %88 = vector.broadcast %87 : vector<8x1xf32> to vector<8x8xf32>
    %89 = arith.subf %85, %88 : vector<8x8xf32>
    %90 = math.exp %89 : vector<8x8xf32>
    %cst_33 = arith.constant dense<0.000000e+00> : vector<8xf32>
    %91 = vector.multi_reduction <add>, %90, %cst_33 [1] : vector<8x8xf32> to vector<8xf32>
    %92 = vector.shape_cast %91 : vector<8xf32> to vector<8x1xf32>
    %93 = tpu.reciprocal %92 {approx = true} : vector<8x1xf32> -> vector<8x1xf32>
    %94 = vector.broadcast %93 : vector<8x1xf32> to vector<8x8xf32>
    %95 = arith.mulf %90, %94 : vector<8x8xf32>
    %96 = arith.truncf %95 : vector<8x8xf32> to vector<8x8xbf16>
    %97 = vector.extract_strided_slice %4 {offsets = [0, 24], sizes = [8, 8], strides = [1, 1]} : vector<8x128xbf16> to vector<8x8xbf16>
    %cst_34 = arith.constant dense<0.000000e+00> : vector<8x8xf32>
    %98 = tpu.matmul %96, %97, %cst_34 {dimension_numbers = #tpu.dot_dimension_numbers<[1], [0], [0], [1], [0, 0, 1, 1], [], []>} : vector<8x8xbf16>, vector<8x8xbf16>, vector<8x8xf32> -> vector<8x8xf32>
    %99 = arith.truncf %98 : vector<8x8xf32> to vector<8x8xbf16>
    %c0_35 = arith.constant 0 : index
    %c0_36 = arith.constant 0 : index
    %c24 = arith.constant 24 : index
    %100 = vector.load %arg3[%c0_35, %c0_36, %c24] : memref<1x8x128xbf16, #tpu.memory_space<vmem>>, vector<1x8x8xbf16>
    %101 = vector.shape_cast %100 : vector<1x8x8xbf16> to vector<8x8xbf16>
    %102 = vector.shape_cast %99 : vector<8x8xbf16> to vector<1x8x8xbf16>
    tpu.vector_store %arg3[%c0_35, %c0_36, %c24], %102 {strides = array<i32>} : memref<1x8x128xbf16, #tpu.memory_space<vmem>>, vector<1x8x8xbf16>,
    return
  }
  func.func @transform_0(%arg0: i32) -> (i32, i32, i32) {
    %c0_i32 = arith.constant 0 : i32
    %c0_i32_0 = arith.constant 0 : i32
    %c0_i32_1 = arith.constant 0 : i32
    return %arg0, %c0_i32, %c0_i32_0 : i32, i32, i32
  }
  func.func @transform_1(%arg0: i32) -> (i32, i32, i32) {
    %c0_i32 = arith.constant 0 : i32
    %c0_i32_0 = arith.constant 0 : i32
    %c0_i32_1 = arith.constant 0 : i32
    return %arg0, %c0_i32, %c0_i32_0 : i32, i32, i32
  }
  func.func @transform_2(%arg0: i32) -> (i32, i32, i32) {
    %c0_i32 = arith.constant 0 : i32
    %c0_i32_0 = arith.constant 0 : i32
    %c0_i32_1 = arith.constant 0 : i32
    return %arg0, %c0_i32, %c0_i32_0 : i32, i32, i32
  }
}

module attributes {stable_mosaic.version = 11 : i64} {
  func.func @_ffn_res_ln_kernel(%arg0: i32, %arg1: memref<16x128xbf16, #tpu.memory_space<vmem>>, %arg2: memref<128x128xbf16, #tpu.memory_space<vmem>>, %arg3: memref<1x128xf32, #tpu.memory_space<vmem>>, %arg4: memref<128x128xbf16, #tpu.memory_space<vmem>>, %arg5: memref<1x128xf32, #tpu.memory_space<vmem>>, %arg6: memref<16x128xbf16, #tpu.memory_space<vmem>>, %arg7: memref<1x128xf32, #tpu.memory_space<vmem>>, %arg8: memref<1x128xf32, #tpu.memory_space<vmem>>, %arg9: memref<16x128xbf16, #tpu.memory_space<vmem>>) attributes {dimension_semantics = [#tpu.dimension_semantics<parallel>], iteration_bounds = array<i64: 1>, scalar_prefetch = 0 : i64, scratch_operands = 0 : i64, tpu.core_type = #tpu.core_type<tc>, window_params = [{transform_indices = @transform_0, window_bounds = array<i64: 16, 128>}, {pipeline_mode = #tpu.pipeline_mode<synchronous>, transform_indices = @transform_1, window_bounds = array<i64: 128, 128>}, {pipeline_mode = #tpu.pipeline_mode<synchronous>, transform_indices = @transform_2, window_bounds = array<i64: 1, 128>}, {pipeline_mode = #tpu.pipeline_mode<synchronous>, transform_indices = @transform_3, window_bounds = array<i64: 128, 128>}, {pipeline_mode = #tpu.pipeline_mode<synchronous>, transform_indices = @transform_4, window_bounds = array<i64: 1, 128>}, {transform_indices = @transform_5, window_bounds = array<i64: 16, 128>}, {pipeline_mode = #tpu.pipeline_mode<synchronous>, transform_indices = @transform_6, window_bounds = array<i64: 1, 128>}, {pipeline_mode = #tpu.pipeline_mode<synchronous>, transform_indices = @transform_7, window_bounds = array<i64: 1, 128>}, {transform_indices = @transform_8, window_bounds = array<i64: 16, 128>}]} {
    %c0 = arith.constant 0 : index
    %c0_0 = arith.constant 0 : index
    %0 = vector.load %arg1[%c0, %c0_0] : memref<16x128xbf16, #tpu.memory_space<vmem>>, vector<16x128xbf16>
    %c0_1 = arith.constant 0 : index
    %c0_2 = arith.constant 0 : index
    %1 = vector.load %arg2[%c0_1, %c0_2] : memref<128x128xbf16, #tpu.memory_space<vmem>>, vector<128x128xbf16>
    %cst = arith.constant dense<0.000000e+00> : vector<16x128xf32>
    %2 = tpu.matmul %0, %1, %cst {dimension_numbers = #tpu.dot_dimension_numbers<[1], [0], [0], [1], [0, 0, 1, 1], [], []>} : vector<16x128xbf16>, vector<128x128xbf16>, vector<16x128xf32> -> vector<16x128xf32>
    %c0_3 = arith.constant 0 : index
    %c0_4 = arith.constant 0 : index
    %3 = vector.load %arg3[%c0_3, %c0_4] : memref<1x128xf32, #tpu.memory_space<vmem>>, vector<1x128xf32>
    %4 = vector.broadcast %3 : vector<1x128xf32> to vector<16x128xf32>
    %5 = arith.addf %2, %4 : vector<16x128xf32>
    %cst_5 = arith.constant 0.000000e+00 : f32
    %6 = vector.broadcast %cst_5 : f32 to vector<16x128xf32>
    %7 = arith.maximumf %5, %6 : vector<16x128xf32>
    %8 = arith.truncf %7 : vector<16x128xf32> to vector<16x128xbf16>
    %c0_6 = arith.constant 0 : index
    %c0_7 = arith.constant 0 : index
    %9 = vector.load %arg4[%c0_6, %c0_7] : memref<128x128xbf16, #tpu.memory_space<vmem>>, vector<128x128xbf16>
    %cst_8 = arith.constant dense<0.000000e+00> : vector<16x128xf32>
    %10 = tpu.matmul %8, %9, %cst_8 {dimension_numbers = #tpu.dot_dimension_numbers<[1], [0], [0], [1], [0, 0, 1, 1], [], []>} : vector<16x128xbf16>, vector<128x128xbf16>, vector<16x128xf32> -> vector<16x128xf32>
    %c0_9 = arith.constant 0 : index
    %c0_10 = arith.constant 0 : index
    %11 = vector.load %arg5[%c0_9, %c0_10] : memref<1x128xf32, #tpu.memory_space<vmem>>, vector<1x128xf32>
    %12 = vector.broadcast %11 : vector<1x128xf32> to vector<16x128xf32>
    %13 = arith.addf %10, %12 : vector<16x128xf32>
    %c0_11 = arith.constant 0 : index
    %c0_12 = arith.constant 0 : index
    %14 = vector.load %arg6[%c0_11, %c0_12] : memref<16x128xbf16, #tpu.memory_space<vmem>>, vector<16x128xbf16>
    %15 = arith.extf %14 : vector<16x128xbf16> to vector<16x128xf32>
    %16 = arith.addf %13, %15 : vector<16x128xf32>
    %c0_13 = arith.constant 0 : index
    %c0_14 = arith.constant 0 : index
    %17 = vector.load %arg7[%c0_13, %c0_14] : memref<1x128xf32, #tpu.memory_space<vmem>>, vector<1x128xf32>
    %c0_15 = arith.constant 0 : index
    %c0_16 = arith.constant 0 : index
    %18 = vector.load %arg8[%c0_15, %c0_16] : memref<1x128xf32, #tpu.memory_space<vmem>>, vector<1x128xf32>
    %19 = tpu.iota {dimensions = array<i32: 1>} : vector<16x128xi32>
    %c32_i32 = arith.constant 32 : i32
    %20 = vector.broadcast %c32_i32 : i32 to vector<16x128xi32>
    %21 = arith.cmpi slt, %19, %20 : vector<16x128xi32>
    %cst_17 = arith.constant 0.000000e+00 : f32
    %22 = vector.broadcast %cst_17 : f32 to vector<16x128xf32>
    %23 = arith.select %21, %16, %22 : vector<16x128xi1>, vector<16x128xf32>
    %cst_18 = arith.constant dense<0.000000e+00> : vector<16xf32>
    %24 = vector.multi_reduction <add>, %23, %cst_18 [1] : vector<16x128xf32> to vector<16xf32>
    %25 = vector.shape_cast %24 : vector<16xf32> to vector<16x1xf32>
    %cst_19 = arith.constant 3.125000e-02 : f32
    %26 = vector.broadcast %cst_19 : f32 to vector<16x1xf32>
    %27 = arith.mulf %25, %26 : vector<16x1xf32>
    %28 = vector.broadcast %27 : vector<16x1xf32> to vector<16x128xf32>
    %29 = arith.subf %16, %28 : vector<16x128xf32>
    %cst_20 = arith.constant 0.000000e+00 : f32
    %30 = vector.broadcast %cst_20 : f32 to vector<16x128xf32>
    %31 = arith.select %21, %29, %30 : vector<16x128xi1>, vector<16x128xf32>
    %32 = arith.mulf %31, %31 : vector<16x128xf32>
    %cst_21 = arith.constant dense<0.000000e+00> : vector<16xf32>
    %33 = vector.multi_reduction <add>, %32, %cst_21 [1] : vector<16x128xf32> to vector<16xf32>
    %34 = vector.shape_cast %33 : vector<16xf32> to vector<16x1xf32>
    %cst_22 = arith.constant 3.125000e-02 : f32
    %35 = vector.broadcast %cst_22 : f32 to vector<16x1xf32>
    %36 = arith.mulf %34, %35 : vector<16x1xf32>
    %37 = vector.broadcast %27 : vector<16x1xf32> to vector<16x128xf32>
    %38 = arith.subf %16, %37 : vector<16x128xf32>
    %cst_23 = arith.constant 9.99999974E-6 : f32
    %39 = vector.broadcast %cst_23 : f32 to vector<16x1xf32>
    %40 = arith.addf %36, %39 : vector<16x1xf32>
    %41 = math.rsqrt %40 : vector<16x1xf32>
    %42 = vector.broadcast %41 : vector<16x1xf32> to vector<16x128xf32>
    %43 = arith.mulf %38, %42 : vector<16x128xf32>
    %44 = vector.broadcast %17 : vector<1x128xf32> to vector<16x128xf32>
    %45 = arith.mulf %43, %44 : vector<16x128xf32>
    %46 = vector.broadcast %18 : vector<1x128xf32> to vector<16x128xf32>
    %47 = arith.addf %45, %46 : vector<16x128xf32>
    %48 = arith.truncf %47 : vector<16x128xf32> to vector<16x128xbf16>
    %c0_24 = arith.constant 0 : index
    %c0_25 = arith.constant 0 : index
    %49 = vector.load %arg9[%c0_24, %c0_25] : memref<16x128xbf16, #tpu.memory_space<vmem>>, vector<16x128xbf16>
    tpu.vector_store %arg9[%c0_24, %c0_25], %48 {strides = array<i32>} : memref<16x128xbf16, #tpu.memory_space<vmem>>, vector<16x128xbf16>,
    return
  }
  func.func @transform_0(%arg0: i32) -> (i32, i32) {
    %c0_i32 = arith.constant 0 : i32
    %c0_i32_0 = arith.constant 0 : i32
    return %arg0, %c0_i32 : i32, i32
  }
  func.func @transform_1(%arg0: i32) -> (i32, i32) {
    %c0_i32 = arith.constant 0 : i32
    %c0_i32_0 = arith.constant 0 : i32
    %c0_i32_1 = arith.constant 0 : i32
    return %c0_i32, %c0_i32_0 : i32, i32
  }
  func.func @transform_2(%arg0: i32) -> (i32, i32) {
    %c0_i32 = arith.constant 0 : i32
    %c0_i32_0 = arith.constant 0 : i32
    %c0_i32_1 = arith.constant 0 : i32
    return %c0_i32, %c0_i32_0 : i32, i32
  }
  func.func @transform_3(%arg0: i32) -> (i32, i32) {
    %c0_i32 = arith.constant 0 : i32
    %c0_i32_0 = arith.constant 0 : i32
    %c0_i32_1 = arith.constant 0 : i32
    return %c0_i32, %c0_i32_0 : i32, i32
  }
  func.func @transform_4(%arg0: i32) -> (i32, i32) {
    %c0_i32 = arith.constant 0 : i32
    %c0_i32_0 = arith.constant 0 : i32
    %c0_i32_1 = arith.constant 0 : i32
    return %c0_i32, %c0_i32_0 : i32, i32
  }
  func.func @transform_5(%arg0: i32) -> (i32, i32) {
    %c0_i32 = arith.constant 0 : i32
    %c0_i32_0 = arith.constant 0 : i32
    return %arg0, %c0_i32 : i32, i32
  }
  func.func @transform_6(%arg0: i32) -> (i32, i32) {
    %c0_i32 = arith.constant 0 : i32
    %c0_i32_0 = arith.constant 0 : i32
    %c0_i32_1 = arith.constant 0 : i32
    return %c0_i32, %c0_i32_0 : i32, i32
  }
  func.func @transform_7(%arg0: i32) -> (i32, i32) {
    %c0_i32 = arith.constant 0 : i32
    %c0_i32_0 = arith.constant 0 : i32
    %c0_i32_1 = arith.constant 0 : i32
    return %c0_i32, %c0_i32_0 : i32, i32
  }
  func.func @transform_8(%arg0: i32) -> (i32, i32) {
    %c0_i32 = arith.constant 0 : i32
    %c0_i32_0 = arith.constant 0 : i32
    return %arg0, %c0_i32 : i32, i32
  }
}

module attributes {stable_mosaic.version = 11 : i64} {
  func.func @_matmul_kernel(%arg0: i32, %arg1: i32, %arg2: i32, %arg3: memref<16x128xbf16, #tpu.memory_space<vmem>>, %arg4: memref<128x256xbf16, #tpu.memory_space<vmem>>, %arg5: memref<1x256xf32, #tpu.memory_space<vmem>>, %arg6: memref<16x256xbf16, #tpu.memory_space<vmem>>, %arg7: memref<16x256xf32, #tpu.memory_space<vmem>>) attributes {dimension_semantics = [#tpu.dimension_semantics<parallel>, #tpu.dimension_semantics<parallel>, #tpu.dimension_semantics<arbitrary>], iteration_bounds = array<i64: 1, 1, 1>, scalar_prefetch = 0 : i64, scratch_operands = 1 : i64, tpu.core_type = #tpu.core_type<tc>, window_params = [{transform_indices = @transform_0, window_bounds = array<i64: 16, 128>}, {transform_indices = @transform_1, window_bounds = array<i64: 128, 256>}, {transform_indices = @transform_2, window_bounds = array<i64: 1, 256>}, {transform_indices = @transform_3, window_bounds = array<i64: 16, 256>}]} {
    %c0_i32 = arith.constant 0 : i32
    %0 = arith.cmpi eq, %arg2, %c0_i32 : i32
    %1 = arith.extui %0 : i1 to i32
    %c0_i32_0 = arith.constant 0 : i32
    %2 = arith.cmpi ne, %1, %c0_i32_0 : i32
    scf.if %2 {
      %cst_10 = arith.constant 0.000000e+00 : f32
      %12 = vector.broadcast %cst_10 : f32 to vector<16x256xf32>
      %c0_11 = arith.constant 0 : index
      %c0_12 = arith.constant 0 : index
      %13 = vector.load %arg7[%c0_11, %c0_12] : memref<16x256xf32, #tpu.memory_space<vmem>>, vector<16x256xf32>
      tpu.vector_store %arg7[%c0_11, %c0_12], %12 {strides = array<i32>} : memref<16x256xf32, #tpu.memory_space<vmem>>, vector<16x256xf32>,
    } else {
    }
    %c0 = arith.constant 0 : index
    %c0_1 = arith.constant 0 : index
    %3 = vector.load %arg7[%c0, %c0_1] : memref<16x256xf32, #tpu.memory_space<vmem>>, vector<16x256xf32>
    %c0_2 = arith.constant 0 : index
    %c0_3 = arith.constant 0 : index
    %4 = vector.load %arg3[%c0_2, %c0_3] : memref<16x128xbf16, #tpu.memory_space<vmem>>, vector<16x128xbf16>
    %c0_4 = arith.constant 0 : index
    %c0_5 = arith.constant 0 : index
    %5 = vector.load %arg4[%c0_4, %c0_5] : memref<128x256xbf16, #tpu.memory_space<vmem>>, vector<128x256xbf16>
    %cst = arith.constant dense<0.000000e+00> : vector<16x256xf32>
    %6 = tpu.matmul %4, %5, %cst {dimension_numbers = #tpu.dot_dimension_numbers<[1], [0], [0], [1], [0, 0, 1, 1], [], []>} : vector<16x128xbf16>, vector<128x256xbf16>, vector<16x256xf32> -> vector<16x256xf32>
    %7 = arith.addf %3, %6 : vector<16x256xf32>
    %c0_6 = arith.constant 0 : index
    %c0_7 = arith.constant 0 : index
    %8 = vector.load %arg7[%c0_6, %c0_7] : memref<16x256xf32, #tpu.memory_space<vmem>>, vector<16x256xf32>
    tpu.vector_store %arg7[%c0_6, %c0_7], %7 {strides = array<i32>} : memref<16x256xf32, #tpu.memory_space<vmem>>, vector<16x256xf32>,
    %c0_i32_8 = arith.constant 0 : i32
    %9 = arith.cmpi eq, %arg2, %c0_i32_8 : i32
    %10 = arith.extui %9 : i1 to i32
    %c0_i32_9 = arith.constant 0 : i32
    %11 = arith.cmpi ne, %10, %c0_i32_9 : i32
    scf.if %11 {
      %c0_10 = arith.constant 0 : index
      %c0_11 = arith.constant 0 : index
      %12 = vector.load %arg7[%c0_10, %c0_11] : memref<16x256xf32, #tpu.memory_space<vmem>>, vector<16x256xf32>
      %c0_12 = arith.constant 0 : index
      %c0_13 = arith.constant 0 : index
      %13 = vector.load %arg5[%c0_12, %c0_13] : memref<1x256xf32, #tpu.memory_space<vmem>>, vector<1x256xf32>
      %14 = vector.broadcast %13 : vector<1x256xf32> to vector<16x256xf32>
      %15 = arith.addf %12, %14 : vector<16x256xf32>
      %16 = arith.truncf %15 : vector<16x256xf32> to vector<16x256xbf16>
      %c0_14 = arith.constant 0 : index
      %c0_15 = arith.constant 0 : index
      %17 = vector.load %arg6[%c0_14, %c0_15] : memref<16x256xbf16, #tpu.memory_space<vmem>>, vector<16x256xbf16>
      tpu.vector_store %arg6[%c0_14, %c0_15], %16 {strides = array<i32>} : memref<16x256xbf16, #tpu.memory_space<vmem>>, vector<16x256xbf16>,
    } else {
    }
    return
  }
  func.func @transform_0(%arg0: i32, %arg1: i32, %arg2: i32) -> (i32, i32) {
    %c0_i32 = arith.constant 0 : i32
    return %arg0, %arg2 : i32, i32
  }
  func.func @transform_1(%arg0: i32, %arg1: i32, %arg2: i32) -> (i32, i32) {
    %c0_i32 = arith.constant 0 : i32
    return %arg2, %arg1 : i32, i32
  }
  func.func @transform_2(%arg0: i32, %arg1: i32, %arg2: i32) -> (i32, i32) {
    %c0_i32 = arith.constant 0 : i32
    %c0_i32_0 = arith.constant 0 : i32
    return %c0_i32, %arg1 : i32, i32
  }
  func.func @transform_3(%arg0: i32, %arg1: i32, %arg2: i32) -> (i32, i32) {
    %c0_i32 = arith.constant 0 : i32
    return %arg0, %arg1 : i32, i32
  }
}

module attributes {stable_mosaic.version = 11 : i64} {
  func.func @_cross_attn_kernel(%arg0: i32, %arg1: memref<1x8x128xbf16, #tpu.memory_space<vmem>>, %arg2: memref<1x8x256xbf16, #tpu.memory_space<vmem>>, %arg3: memref<1x1x8xf32, #tpu.memory_space<vmem>>, %arg4: memref<1x8x128xbf16, #tpu.memory_space<vmem>>) attributes {dimension_semantics = [#tpu.dimension_semantics<parallel>], iteration_bounds = array<i64: 2>, scalar_prefetch = 0 : i64, scratch_operands = 0 : i64, tpu.core_type = #tpu.core_type<tc>, window_params = [{transform_indices = @transform_0, window_bounds = array<i64: 1, 8, 128>}, {transform_indices = @transform_1, window_bounds = array<i64: 1, 8, 256>}, {transform_indices = @transform_2, window_bounds = array<i64: 1, 1, 8>}, {transform_indices = @transform_3, window_bounds = array<i64: 1, 8, 128>}]} {
    %c0 = arith.constant 0 : index
    %c0_0 = arith.constant 0 : index
    %c0_1 = arith.constant 0 : index
    %0 = vector.load %arg1[%c0, %c0_0, %c0_1] : memref<1x8x128xbf16, #tpu.memory_space<vmem>>, vector<1x8x128xbf16>
    %1 = vector.shape_cast %0 : vector<1x8x128xbf16> to vector<8x128xbf16>
    %c0_2 = arith.constant 0 : index
    %c0_3 = arith.constant 0 : index
    %c0_4 = arith.constant 0 : index
    %2 = vector.load %arg2[%c0_2, %c0_3, %c0_4] : memref<1x8x256xbf16, #tpu.memory_space<vmem>>, vector<1x8x256xbf16>
    %3 = vector.shape_cast %2 : vector<1x8x256xbf16> to vector<8x256xbf16>
    %4 = vector.extract_strided_slice %3 {offsets = [0, 0], sizes = [8, 128], strides = [1, 1]} : vector<8x256xbf16> to vector<8x128xbf16>
    %5 = vector.extract_strided_slice %3 {offsets = [0, 128], sizes = [8, 128], strides = [1, 1]} : vector<8x256xbf16> to vector<8x128xbf16>
    %c0_5 = arith.constant 0 : index
    %c0_6 = arith.constant 0 : index
    %c0_7 = arith.constant 0 : index
    %6 = vector.load %arg3[%c0_5, %c0_6, %c0_7] : memref<1x1x8xf32, #tpu.memory_space<vmem>>, vector<1x1x8xf32>
    %7 = vector.shape_cast %6 : vector<1x1x8xf32> to vector<1x8xf32>
    %8 = vector.shape_cast %7 : vector<1x8xf32> to vector<1x8xf32>
    %9 = vector.broadcast %8 : vector<1x8xf32> to vector<8x8xf32>
    %cst = arith.constant 0.000000e+00 : bf16
    %10 = vector.broadcast %cst : bf16 to vector<1x8x128xbf16>
    %c0_8 = arith.constant 0 : index
    %c0_9 = arith.constant 0 : index
    %c0_10 = arith.constant 0 : index
    %11 = vector.load %arg4[%c0_8, %c0_9, %c0_10] : memref<1x8x128xbf16, #tpu.memory_space<vmem>>, vector<1x8x128xbf16>
    tpu.vector_store %arg4[%c0_8, %c0_9, %c0_10], %10 {strides = array<i32>} : memref<1x8x128xbf16, #tpu.memory_space<vmem>>, vector<1x8x128xbf16>,
    %12 = vector.extract_strided_slice %1 {offsets = [0, 0], sizes = [8, 8], strides = [1, 1]} : vector<8x128xbf16> to vector<8x8xbf16>
    %13 = vector.extract_strided_slice %4 {offsets = [0, 0], sizes = [8, 8], strides = [1, 1]} : vector<8x128xbf16> to vector<8x8xbf16>
    %cst_11 = arith.constant dense<0.000000e+00> : vector<8x8xf32>
    %14 = tpu.matmul %12, %13, %cst_11 {dimension_numbers = #tpu.dot_dimension_numbers<[1], [1], [0], [0], [0, 0, 1, 0], [], []>} : vector<8x8xbf16>, vector<8x8xbf16>, vector<8x8xf32> -> vector<8x8xf32>
    %cst_12 = arith.constant 0.353553385 : f32
    %15 = vector.broadcast %cst_12 : f32 to vector<8x8xf32>
    %16 = arith.mulf %14, %15 : vector<8x8xf32>
    %17 = arith.addf %16, %9 : vector<8x8xf32>
    %cst_13 = arith.constant dense<0xFF800000> : vector<8xf32>
    %18 = vector.multi_reduction <maximumf>, %17, %cst_13 [1] : vector<8x8xf32> to vector<8xf32>
    %19 = vector.shape_cast %18 : vector<8xf32> to vector<8x1xf32>
    %20 = vector.broadcast %19 : vector<8x1xf32> to vector<8x8xf32>
    %21 = arith.subf %17, %20 : vector<8x8xf32>
    %22 = math.exp %21 : vector<8x8xf32>
    %cst_14 = arith.constant dense<0.000000e+00> : vector<8xf32>
    %23 = vector.multi_reduction <add>, %22, %cst_14 [1] : vector<8x8xf32> to vector<8xf32>
    %24 = vector.shape_cast %23 : vector<8xf32> to vector<8x1xf32>
    %25 = tpu.reciprocal %24 {approx = true} : vector<8x1xf32> -> vector<8x1xf32>
    %26 = vector.broadcast %25 : vector<8x1xf32> to vector<8x8xf32>
    %27 = arith.mulf %22, %26 : vector<8x8xf32>
    %28 = arith.truncf %27 : vector<8x8xf32> to vector<8x8xbf16>
    %29 = vector.extract_strided_slice %5 {offsets = [0, 0], sizes = [8, 8], strides = [1, 1]} : vector<8x128xbf16> to vector<8x8xbf16>
    %cst_15 = arith.constant dense<0.000000e+00> : vector<8x8xf32>
    %30 = tpu.matmul %28, %29, %cst_15 {dimension_numbers = #tpu.dot_dimension_numbers<[1], [0], [0], [1], [0, 0, 1, 1], [], []>} : vector<8x8xbf16>, vector<8x8xbf16>, vector<8x8xf32> -> vector<8x8xf32>
    %31 = arith.truncf %30 : vector<8x8xf32> to vector<8x8xbf16>
    %c0_16 = arith.constant 0 : index
    %c0_17 = arith.constant 0 : index
    %c0_18 = arith.constant 0 : index
    %32 = vector.load %arg4[%c0_16, %c0_17, %c0_18] : memref<1x8x128xbf16, #tpu.memory_space<vmem>>, vector<1x8x8xbf16>
    %33 = vector.shape_cast %32 : vector<1x8x8xbf16> to vector<8x8xbf16>
    %34 = vector.shape_cast %31 : vector<8x8xbf16> to vector<1x8x8xbf16>
    tpu.vector_store %arg4[%c0_16, %c0_17, %c0_18], %34 {strides = array<i32>} : memref<1x8x128xbf16, #tpu.memory_space<vmem>>, vector<1x8x8xbf16>,
    %35 = vector.extract_strided_slice %1 {offsets = [0, 8], sizes = [8, 8], strides = [1, 1]} : vector<8x128xbf16> to vector<8x8xbf16>
    %36 = vector.extract_strided_slice %4 {offsets = [0, 8], sizes = [8, 8], strides = [1, 1]} : vector<8x128xbf16> to vector<8x8xbf16>
    %cst_19 = arith.constant dense<0.000000e+00> : vector<8x8xf32>
    %37 = tpu.matmul %35, %36, %cst_19 {dimension_numbers = #tpu.dot_dimension_numbers<[1], [1], [0], [0], [0, 0, 1, 0], [], []>} : vector<8x8xbf16>, vector<8x8xbf16>, vector<8x8xf32> -> vector<8x8xf32>
    %cst_20 = arith.constant 0.353553385 : f32
    %38 = vector.broadcast %cst_20 : f32 to vector<8x8xf32>
    %39 = arith.mulf %37, %38 : vector<8x8xf32>
    %40 = arith.addf %39, %9 : vector<8x8xf32>
    %cst_21 = arith.constant dense<0xFF800000> : vector<8xf32>
    %41 = vector.multi_reduction <maximumf>, %40, %cst_21 [1] : vector<8x8xf32> to vector<8xf32>
    %42 = vector.shape_cast %41 : vector<8xf32> to vector<8x1xf32>
    %43 = vector.broadcast %42 : vector<8x1xf32> to vector<8x8xf32>
    %44 = arith.subf %40, %43 : vector<8x8xf32>
    %45 = math.exp %44 : vector<8x8xf32>
    %cst_22 = arith.constant dense<0.000000e+00> : vector<8xf32>
    %46 = vector.multi_reduction <add>, %45, %cst_22 [1] : vector<8x8xf32> to vector<8xf32>
    %47 = vector.shape_cast %46 : vector<8xf32> to vector<8x1xf32>
    %48 = tpu.reciprocal %47 {approx = true} : vector<8x1xf32> -> vector<8x1xf32>
    %49 = vector.broadcast %48 : vector<8x1xf32> to vector<8x8xf32>
    %50 = arith.mulf %45, %49 : vector<8x8xf32>
    %51 = arith.truncf %50 : vector<8x8xf32> to vector<8x8xbf16>
    %52 = vector.extract_strided_slice %5 {offsets = [0, 8], sizes = [8, 8], strides = [1, 1]} : vector<8x128xbf16> to vector<8x8xbf16>
    %cst_23 = arith.constant dense<0.000000e+00> : vector<8x8xf32>
    %53 = tpu.matmul %51, %52, %cst_23 {dimension_numbers = #tpu.dot_dimension_numbers<[1], [0], [0], [1], [0, 0, 1, 1], [], []>} : vector<8x8xbf16>, vector<8x8xbf16>, vector<8x8xf32> -> vector<8x8xf32>
    %54 = arith.truncf %53 : vector<8x8xf32> to vector<8x8xbf16>
    %c0_24 = arith.constant 0 : index
    %c0_25 = arith.constant 0 : index
    %c8 = arith.constant 8 : index
    %55 = vector.load %arg4[%c0_24, %c0_25, %c8] : memref<1x8x128xbf16, #tpu.memory_space<vmem>>, vector<1x8x8xbf16>
    %56 = vector.shape_cast %55 : vector<1x8x8xbf16> to vector<8x8xbf16>
    %57 = vector.shape_cast %54 : vector<8x8xbf16> to vector<1x8x8xbf16>
    tpu.vector_store %arg4[%c0_24, %c0_25, %c8], %57 {strides = array<i32>} : memref<1x8x128xbf16, #tpu.memory_space<vmem>>, vector<1x8x8xbf16>,
    %58 = vector.extract_strided_slice %1 {offsets = [0, 16], sizes = [8, 8], strides = [1, 1]} : vector<8x128xbf16> to vector<8x8xbf16>
    %59 = vector.extract_strided_slice %4 {offsets = [0, 16], sizes = [8, 8], strides = [1, 1]} : vector<8x128xbf16> to vector<8x8xbf16>
    %cst_26 = arith.constant dense<0.000000e+00> : vector<8x8xf32>
    %60 = tpu.matmul %58, %59, %cst_26 {dimension_numbers = #tpu.dot_dimension_numbers<[1], [1], [0], [0], [0, 0, 1, 0], [], []>} : vector<8x8xbf16>, vector<8x8xbf16>, vector<8x8xf32> -> vector<8x8xf32>
    %cst_27 = arith.constant 0.353553385 : f32
    %61 = vector.broadcast %cst_27 : f32 to vector<8x8xf32>
    %62 = arith.mulf %60, %61 : vector<8x8xf32>
    %63 = arith.addf %62, %9 : vector<8x8xf32>
    %cst_28 = arith.constant dense<0xFF800000> : vector<8xf32>
    %64 = vector.multi_reduction <maximumf>, %63, %cst_28 [1] : vector<8x8xf32> to vector<8xf32>
    %65 = vector.shape_cast %64 : vector<8xf32> to vector<8x1xf32>
    %66 = vector.broadcast %65 : vector<8x1xf32> to vector<8x8xf32>
    %67 = arith.subf %63, %66 : vector<8x8xf32>
    %68 = math.exp %67 : vector<8x8xf32>
    %cst_29 = arith.constant dense<0.000000e+00> : vector<8xf32>
    %69 = vector.multi_reduction <add>, %68, %cst_29 [1] : vector<8x8xf32> to vector<8xf32>
    %70 = vector.shape_cast %69 : vector<8xf32> to vector<8x1xf32>
    %71 = tpu.reciprocal %70 {approx = true} : vector<8x1xf32> -> vector<8x1xf32>
    %72 = vector.broadcast %71 : vector<8x1xf32> to vector<8x8xf32>
    %73 = arith.mulf %68, %72 : vector<8x8xf32>
    %74 = arith.truncf %73 : vector<8x8xf32> to vector<8x8xbf16>
    %75 = vector.extract_strided_slice %5 {offsets = [0, 16], sizes = [8, 8], strides = [1, 1]} : vector<8x128xbf16> to vector<8x8xbf16>
    %cst_30 = arith.constant dense<0.000000e+00> : vector<8x8xf32>
    %76 = tpu.matmul %74, %75, %cst_30 {dimension_numbers = #tpu.dot_dimension_numbers<[1], [0], [0], [1], [0, 0, 1, 1], [], []>} : vector<8x8xbf16>, vector<8x8xbf16>, vector<8x8xf32> -> vector<8x8xf32>
    %77 = arith.truncf %76 : vector<8x8xf32> to vector<8x8xbf16>
    %c0_31 = arith.constant 0 : index
    %c0_32 = arith.constant 0 : index
    %c16 = arith.constant 16 : index
    %78 = vector.load %arg4[%c0_31, %c0_32, %c16] : memref<1x8x128xbf16, #tpu.memory_space<vmem>>, vector<1x8x8xbf16>
    %79 = vector.shape_cast %78 : vector<1x8x8xbf16> to vector<8x8xbf16>
    %80 = vector.shape_cast %77 : vector<8x8xbf16> to vector<1x8x8xbf16>
    tpu.vector_store %arg4[%c0_31, %c0_32, %c16], %80 {strides = array<i32>} : memref<1x8x128xbf16, #tpu.memory_space<vmem>>, vector<1x8x8xbf16>,
    %81 = vector.extract_strided_slice %1 {offsets = [0, 24], sizes = [8, 8], strides = [1, 1]} : vector<8x128xbf16> to vector<8x8xbf16>
    %82 = vector.extract_strided_slice %4 {offsets = [0, 24], sizes = [8, 8], strides = [1, 1]} : vector<8x128xbf16> to vector<8x8xbf16>
    %cst_33 = arith.constant dense<0.000000e+00> : vector<8x8xf32>
    %83 = tpu.matmul %81, %82, %cst_33 {dimension_numbers = #tpu.dot_dimension_numbers<[1], [1], [0], [0], [0, 0, 1, 0], [], []>} : vector<8x8xbf16>, vector<8x8xbf16>, vector<8x8xf32> -> vector<8x8xf32>
    %cst_34 = arith.constant 0.353553385 : f32
    %84 = vector.broadcast %cst_34 : f32 to vector<8x8xf32>
    %85 = arith.mulf %83, %84 : vector<8x8xf32>
    %86 = arith.addf %85, %9 : vector<8x8xf32>
    %cst_35 = arith.constant dense<0xFF800000> : vector<8xf32>
    %87 = vector.multi_reduction <maximumf>, %86, %cst_35 [1] : vector<8x8xf32> to vector<8xf32>
    %88 = vector.shape_cast %87 : vector<8xf32> to vector<8x1xf32>
    %89 = vector.broadcast %88 : vector<8x1xf32> to vector<8x8xf32>
    %90 = arith.subf %86, %89 : vector<8x8xf32>
    %91 = math.exp %90 : vector<8x8xf32>
    %cst_36 = arith.constant dense<0.000000e+00> : vector<8xf32>
    %92 = vector.multi_reduction <add>, %91, %cst_36 [1] : vector<8x8xf32> to vector<8xf32>
    %93 = vector.shape_cast %92 : vector<8xf32> to vector<8x1xf32>
    %94 = tpu.reciprocal %93 {approx = true} : vector<8x1xf32> -> vector<8x1xf32>
    %95 = vector.broadcast %94 : vector<8x1xf32> to vector<8x8xf32>
    %96 = arith.mulf %91, %95 : vector<8x8xf32>
    %97 = arith.truncf %96 : vector<8x8xf32> to vector<8x8xbf16>
    %98 = vector.extract_strided_slice %5 {offsets = [0, 24], sizes = [8, 8], strides = [1, 1]} : vector<8x128xbf16> to vector<8x8xbf16>
    %cst_37 = arith.constant dense<0.000000e+00> : vector<8x8xf32>
    %99 = tpu.matmul %97, %98, %cst_37 {dimension_numbers = #tpu.dot_dimension_numbers<[1], [0], [0], [1], [0, 0, 1, 1], [], []>} : vector<8x8xbf16>, vector<8x8xbf16>, vector<8x8xf32> -> vector<8x8xf32>
    %100 = arith.truncf %99 : vector<8x8xf32> to vector<8x8xbf16>
    %c0_38 = arith.constant 0 : index
    %c0_39 = arith.constant 0 : index
    %c24 = arith.constant 24 : index
    %101 = vector.load %arg4[%c0_38, %c0_39, %c24] : memref<1x8x128xbf16, #tpu.memory_space<vmem>>, vector<1x8x8xbf16>
    %102 = vector.shape_cast %101 : vector<1x8x8xbf16> to vector<8x8xbf16>
    %103 = vector.shape_cast %100 : vector<8x8xbf16> to vector<1x8x8xbf16>
    tpu.vector_store %arg4[%c0_38, %c0_39, %c24], %103 {strides = array<i32>} : memref<1x8x128xbf16, #tpu.memory_space<vmem>>, vector<1x8x8xbf16>,
    return
  }
  func.func @transform_0(%arg0: i32) -> (i32, i32, i32) {
    %c0_i32 = arith.constant 0 : i32
    %c0_i32_0 = arith.constant 0 : i32
    %c0_i32_1 = arith.constant 0 : i32
    return %arg0, %c0_i32, %c0_i32_0 : i32, i32, i32
  }
  func.func @transform_1(%arg0: i32) -> (i32, i32, i32) {
    %c0_i32 = arith.constant 0 : i32
    %c0_i32_0 = arith.constant 0 : i32
    %c0_i32_1 = arith.constant 0 : i32
    return %arg0, %c0_i32, %c0_i32_0 : i32, i32, i32
  }
  func.func @transform_2(%arg0: i32) -> (i32, i32, i32) {
    %c0_i32 = arith.constant 0 : i32
    %c0_i32_0 = arith.constant 0 : i32
    %c0_i32_1 = arith.constant 0 : i32
    return %arg0, %c0_i32, %c0_i32_0 : i32, i32, i32
  }
  func.func @transform_3(%arg0: i32) -> (i32, i32, i32) {
    %c0_i32 = arith.constant 0 : i32
    %c0_i32_0 = arith.constant 0 : i32
    %c0_i32_1 = arith.constant 0 : i32
    return %arg0, %c0_i32, %c0_i32_0 : i32, i32, i32
  }
}

module attributes {stable_mosaic.version = 11 : i64} {
  func.func @_matmul_kernel(%arg0: i32, %arg1: i32, %arg2: i32, %arg3: memref<16x128xbf16, #tpu.memory_space<vmem>>, %arg4: memref<128x128xbf16, #tpu.memory_space<vmem>>, %arg5: memref<1x128xf32, #tpu.memory_space<vmem>>, %arg6: memref<16x128xf32, #tpu.memory_space<vmem>>, %arg7: memref<16x128xf32, #tpu.memory_space<vmem>>) attributes {dimension_semantics = [#tpu.dimension_semantics<parallel>, #tpu.dimension_semantics<parallel>, #tpu.dimension_semantics<arbitrary>], iteration_bounds = array<i64: 1, 1, 1>, scalar_prefetch = 0 : i64, scratch_operands = 1 : i64, tpu.core_type = #tpu.core_type<tc>, window_params = [{transform_indices = @transform_0, window_bounds = array<i64: 16, 128>}, {transform_indices = @transform_1, window_bounds = array<i64: 128, 128>}, {transform_indices = @transform_2, window_bounds = array<i64: 1, 128>}, {transform_indices = @transform_3, window_bounds = array<i64: 16, 128>}]} {
    %c0_i32 = arith.constant 0 : i32
    %0 = arith.cmpi eq, %arg2, %c0_i32 : i32
    %1 = arith.extui %0 : i1 to i32
    %c0_i32_0 = arith.constant 0 : i32
    %2 = arith.cmpi ne, %1, %c0_i32_0 : i32
    scf.if %2 {
      %cst_10 = arith.constant 0.000000e+00 : f32
      %12 = vector.broadcast %cst_10 : f32 to vector<16x128xf32>
      %c0_11 = arith.constant 0 : index
      %c0_12 = arith.constant 0 : index
      %13 = vector.load %arg7[%c0_11, %c0_12] : memref<16x128xf32, #tpu.memory_space<vmem>>, vector<16x128xf32>
      tpu.vector_store %arg7[%c0_11, %c0_12], %12 {strides = array<i32>} : memref<16x128xf32, #tpu.memory_space<vmem>>, vector<16x128xf32>,
    } else {
    }
    %c0 = arith.constant 0 : index
    %c0_1 = arith.constant 0 : index
    %3 = vector.load %arg7[%c0, %c0_1] : memref<16x128xf32, #tpu.memory_space<vmem>>, vector<16x128xf32>
    %c0_2 = arith.constant 0 : index
    %c0_3 = arith.constant 0 : index
    %4 = vector.load %arg3[%c0_2, %c0_3] : memref<16x128xbf16, #tpu.memory_space<vmem>>, vector<16x128xbf16>
    %c0_4 = arith.constant 0 : index
    %c0_5 = arith.constant 0 : index
    %5 = vector.load %arg4[%c0_4, %c0_5] : memref<128x128xbf16, #tpu.memory_space<vmem>>, vector<128x128xbf16>
    %cst = arith.constant dense<0.000000e+00> : vector<16x128xf32>
    %6 = tpu.matmul %4, %5, %cst {dimension_numbers = #tpu.dot_dimension_numbers<[1], [0], [0], [1], [0, 0, 1, 1], [], []>} : vector<16x128xbf16>, vector<128x128xbf16>, vector<16x128xf32> -> vector<16x128xf32>
    %7 = arith.addf %3, %6 : vector<16x128xf32>
    %c0_6 = arith.constant 0 : index
    %c0_7 = arith.constant 0 : index
    %8 = vector.load %arg7[%c0_6, %c0_7] : memref<16x128xf32, #tpu.memory_space<vmem>>, vector<16x128xf32>
    tpu.vector_store %arg7[%c0_6, %c0_7], %7 {strides = array<i32>} : memref<16x128xf32, #tpu.memory_space<vmem>>, vector<16x128xf32>,
    %c0_i32_8 = arith.constant 0 : i32
    %9 = arith.cmpi eq, %arg2, %c0_i32_8 : i32
    %10 = arith.extui %9 : i1 to i32
    %c0_i32_9 = arith.constant 0 : i32
    %11 = arith.cmpi ne, %10, %c0_i32_9 : i32
    scf.if %11 {
      %c0_10 = arith.constant 0 : index
      %c0_11 = arith.constant 0 : index
      %12 = vector.load %arg7[%c0_10, %c0_11] : memref<16x128xf32, #tpu.memory_space<vmem>>, vector<16x128xf32>
      %c0_12 = arith.constant 0 : index
      %c0_13 = arith.constant 0 : index
      %13 = vector.load %arg5[%c0_12, %c0_13] : memref<1x128xf32, #tpu.memory_space<vmem>>, vector<1x128xf32>
      %14 = vector.broadcast %13 : vector<1x128xf32> to vector<16x128xf32>
      %15 = arith.addf %12, %14 : vector<16x128xf32>
      %c0_14 = arith.constant 0 : index
      %c0_15 = arith.constant 0 : index
      %16 = vector.load %arg6[%c0_14, %c0_15] : memref<16x128xf32, #tpu.memory_space<vmem>>, vector<16x128xf32>
      tpu.vector_store %arg6[%c0_14, %c0_15], %15 {strides = array<i32>} : memref<16x128xf32, #tpu.memory_space<vmem>>, vector<16x128xf32>,
    } else {
    }
    return
  }
  func.func @transform_0(%arg0: i32, %arg1: i32, %arg2: i32) -> (i32, i32) {
    %c0_i32 = arith.constant 0 : i32
    return %arg0, %arg2 : i32, i32
  }
  func.func @transform_1(%arg0: i32, %arg1: i32, %arg2: i32) -> (i32, i32) {
    %c0_i32 = arith.constant 0 : i32
    return %arg2, %arg1 : i32, i32
  }
  func.func @transform_2(%arg0: i32, %arg1: i32, %arg2: i32) -> (i32, i32) {
    %c0_i32 = arith.constant 0 : i32
    %c0_i32_0 = arith.constant 0 : i32
    return %c0_i32, %arg1 : i32, i32
  }
  func.func @transform_3(%arg0: i32, %arg1: i32, %arg2: i32) -> (i32, i32) {
    %c0_i32 = arith.constant 0 : i32
    return %arg0, %arg1 : i32, i32
  }
}

</mosaic_0001>

<bundles_post_ra>
// kernel: transformer_forward.36
= control target key start
LH: loop header
LB: loop body
LE: loop exit
PB: predicated region body
PF: predicated region fallthrough
CT: control target
= control target key end

     0   :  { %s235_s1 = inlined_call_operand.vmem [shape: bf16[128,128], index: 1, kind: input, shape index: {}]   ;;  %s236_s2 = inlined_call_operand.vmem [shape: f32[1,128], index: 2, kind: input, shape index: {}]   ;;  %s237_s0 = inlined_call_operand.vmem [shape: bf16[16,128], index: 0, kind: input, shape index: {}]   ;;  %s238_s3 = inlined_call_operand.vmem [shape: bf16[16,128], index: 3, kind: output, shape index: {}]  }
   0x1   :  { %v175_v0 = vld [vmem:[%s235_s1 + $0x38] sm:$0xff]  ;;  %v174_v1 = vld [vmem:[%s235_s1 + $0x30] sm:$0xff]  ;;  %v173_v2 = vld [vmem:[%s235_s1 + $0x28] sm:$0xff] }
   0x2   :  { %94 = vmatpush.bf16.msra.mxu0 %v175_v0  ;;  %v172_v3 = vld [vmem:[%s235_s1 + $0x20] sm:$0xff]  ;;  %v171_v4 = vld [vmem:[%s235_s1 + $0x18] sm:$0xff]  ;;  %v170_v5 = vld [vmem:[%s235_s1 + $0x10] sm:$0xff] }
   0x3   :  { %v169_v6 = vld [vmem:[%s235_s1 + $0x8] sm:$0xff]  ;;  %v168_v7 = vld [vmem:[%s235_s1] sm:$0xff] }
   0x4   :  { %v167_v8 = vld [vmem:[%s237_s0] sm:$0xff] }
   0x5   :  { %v181_v10 = vld [vmem:[%s236_s2] ss:$0 sm:$0xff] }
   0x6   :  { %95 = vmatpush.bf16.msra.mxu0 %v174_v1 }
   0xa   :  { %96 = vmatpush.bf16.msra.mxu0 %v173_v2 }
   0xe   :  { %97 = vmatpush.bf16.msra.mxu0 %v172_v3 }
  0x12   :  { %98 = vmatpush.bf16.msra.mxu0 %v171_v4 }
  0x16   :  { %99 = vmatpush.bf16.msra.mxu0 %v170_v5 }
  0x1a   :  { %100 = vmatpush.bf16.msra.mxu0 %v169_v6 }
  0x1e   :  { %101 = vmatpush.bf16.msra.mxu0 %v168_v7 }
  0x21   :  { %102 = vmatmul.bf16.vlgmr.msra.gmra.mxu0 %v167_v8 }
  0x9e   :  { %v103_v9 = vpop.f32.mrf.mxu0 }
  0x9f   :  { %v121_v12 = vadd.f32 %v181_v10, %v103_v9 }
  0xa6   :  { %v105_v11 = vpop.f32.mrf.mxu0 }
  0xa7   :  { %v122_v13 = vadd.f32 %v181_v10, %v105_v11 }
  0xa9   :  { %v179_v14 = vpack.c.bf16 %v122_v13, %v121_v12 }
  0xab   :  { %180 = vst [vmem:[%s238_s3] sm:$0xff] %v179_v14  }

// kernel: transformer_forward.34
= control target key start
LH: loop header
LB: loop body
LE: loop exit
PB: predicated region body
PF: predicated region fallthrough
CT: control target
= control target key end

     0   :  { %s575_s9 = smov 0   ;;  %s650_s0 = inlined_call_operand.vmem [shape: bf16[2,8,384], index: 0, kind: input, shape index: {}]   ;;  %s651_s1 = inlined_call_operand.vmem [shape: f32[2,1,8], index: 1, kind: input, shape index: {}]   ;;  %s652_s2 = inlined_call_operand.vmem [shape: bf16[2,8,128], index: 2, kind: output, shape index: {}]  }
   0x1 LB: > { %s493_s10 = sadd.s32 4294967295, %s550_s9   ;;  %p497_p0 = scmp.ge.s32.totalorder %s550_s9, 1  ;;  %s550_s9 = sphi %s575_s9, %s12_s9  }
   0x2   : > { %p120_p1 = scmp.lt.s32.totalorder %s550_s9, 3 }
   0x4   : > { %p121_p2 = pnand %p497_p0, %p120_p1 }
   0x5   : > { %p144_p3 = scmp.lt.s32.totalorder (!%p121_p2), %s493_s10, 1  ;;  %s552_s18 = smov (!%p121_p2), 112  }
   0x6   : > { %124 = sbr.rel (%p121_p2) target bundleno = 1089 (0x441), region = 28  ;;  %s553_s19 = smov (!%p121_p2), 104  }
   0x7   : > { %s555_s20 = smov (!%p121_p2), 120   ;;  %s557_s25 = smov (!%p121_p2), 8  }
   0x8   : > { %s558_s26 = smov (!%p121_p2), 16   ;;  %s559_s27 = smov (!%p121_p2), 24  }
   0xb   : > { %s654_s10 = smov (!%p144_p3, %s493_s10), 1  ;;  %vm174_vm0 = vcmask 64512   ;;  %v163_v6 = vlaneseq  ;;  %v554_v10 = vmov -10000.0   ;;  %vm211_vm2 = vcmask 1043456  }
   0xc   : > { %s510_s11 = smul.u32 12, %s654_s10  ;;  %s151_s17 = scalar_lea.vmem %s651_s1, %s654_s10  ;;  %v556_v43 = vmov 0   ;;  %vm229_vm3 = vcmask 60416   ;;  %vm299_vm4 = vcmask 126016   ;;  %vm364_vm5 = vcmask 191616  }
   0xd   : > { %v164_v7 = vshrl.u32 %v163_v6, 7  ;;  %v166_v8 = vand.u32 127, %v163_v6  ;;  %v527_v9 = vld [vmem:[%s151_s17] ss:$0 sm:$0xff]  ;;  %s499_s21 = sshll.u32 %s654_s10, 2  ;;  %vm429_vm6 = vcmask 257216  }
   0xe   : > { %s589_s14 = scalar_lea.vmem %s650_s0, %s510_s11  ;;  %s624_s24 = scalar_lea.vmem %s652_s2, %s499_s21 }
   0xf   : > { %v157_v0 = vld [vmem:[%s589_s14] sm:$0xff]  ;;  %vm167_vm1 = vcmp.le.s32.totalorder %v166_v8, %v164_v7  ;;  %v158_v28 = vld [vmem:[%s589_s14 + $0x8] sm:$0xf]  ;;  %170 = vst [vmem:[%s624_s24] sm:$0xf] %v556_v43 }
  0x10   : > { %v172_v1 = vunpack.c.h.b16 %v157_v0  ;;  %v231_v4 = vunpack.c.l.b16 %v157_v0  ;;  %v168_v11 = vsel %vm167_vm1, 0.0, %v554_v10  ;;  %v213_v29 = vsel %vm211_vm2, %v158_v28, 0 }
  0x11   : > { %v602_v12 = vadd.f32 %v527_v9, %v168_v11  ;;  %222 = vmatpush.bf16.msra.mxu1 %v213_v29  ;;  %v271_v57 = vunpack.c.l.b16 %v158_v28 }
  0x12   : > { %v173_v2 = vpack.c.b16 %v172_v1, %v172_v1  ;;  %v232_v5 = vpack.c.b16 %v231_v4, %v231_v4 }
  0x13   : > { %v272_v58 = vpack.c.b16 %v271_v57, %v271_v57 }
  0x14   : > { %v179_v3 = vsel %vm174_vm0, %v173_v2, 0  ;;  %303 = vrot.lane.b32.xlu2 %v173_v2, %s552_s18 }
  0x15   : > { %188 = vmatpush.bf16.xpose.msra.mxu0 %v179_v3 }
  0x1c   : > { %500 = vmatmul.msk.bf16.vlgmr.msra.gmra.mxu0 %vm174_vm0, %v157_v0  ;;  %368 = vrot.lane.b32.xlu2 %v173_v2, %s553_s19 }
  0x24   : > { %301 = vrot.lane.b32.xlu2 %v232_v5, %s552_s18 }
  0x2c   : > { %366 = vrot.lane.b32.xlu2 %v232_v5, %s553_s19 }
  0x6e   : > { %v304_v18 = vpop.permute.xlu2 %303 }
  0x6f   : > { %v309_v30 = vsel %vm174_vm0, %v304_v18, 0 }
  0x70   : > { %318 = vmatpush.bf16.xpose.msrb.mxu1 %v309_v30 }
  0x76   : > { %v369_v19 = vpop.permute.xlu2 %368 }
  0x77   : > { %v374_v24 = vsel %vm174_vm0, %v369_v19, 0 }
  0x78   : > { %383 = vmatpush.bf16.xpose.msrb.mxu0 %v374_v24 }
  0x7e   : > { %v302_v23 = vpop.permute.xlu2 %301 }
  0x86   : > { %v367_v27 = vpop.permute.xlu2 %366 }
  0x87   : > { %506 = vmatmul.msk.bf16.vlgmr.msrb.gmra.mxu0 %vm174_vm0, %v367_v27 }
  0x99   : > { %v190_v13 = vpop.f32.mrf.mxu0 }
  0x9a   : > { %v194_v14 = vmul.f32 0.35355338, %v190_v13 }
  0x9c   : > { %v195_v15 = vadd.f32 %v194_v14, %v602_v12 }
  0x9e   : > { %v196_v16 = vsel %vm174_vm0, %v195_v15, -inf }
  0x9f   : > { %197 = vmax.xlane.f32.xlu0 %v196_v16 }
  0xa1   : > { %v192_v17 = vpop.f32.mrf.mxu0 }
  0xb3   : > { %235 = vrot.lane.b32.xlu0 %v173_v2, %s555_s20 }
 0x104   : > { %v385_v37 = vpop.f32.mrf.mxu0 }
 0x105   : > { %v389_v38 = vmul.f32 0.35355338, %v385_v37 }
 0x107   : > { %v390_v39 = vadd.f32 %v389_v38, %v602_v12 }
 0x109   : > { %v391_v40 = vsel %vm174_vm0, %v390_v39, -inf }
 0x10c   : > { %v387_v41 = vpop.f32.mrf.mxu0 }
 0x112   : > { %v198_v20 = vpop.xlane.xlu0 %197 }
 0x113   : > { %v199_v21 = vsub.f32 %v195_v15, %v198_v20 }
 0x115   : > { %v200_v22 = vmul.f32 1.442695, %v199_v21 }
 0x117   : > { %528 = vpow2.f32 %v200_v22 }
 0x11d   : > { %v529_v25 = vpop.eup %528 }
 0x11e   : > { %v202_v26 = vsel %vm174_vm0, %v529_v25, 0.0 }
 0x11f   : > { %203 = vadd.xlane.f32.xlu1 %v202_v26 }
 0x125   : > { %v236_v31 = vpop.permute.xlu0 %235 }
 0x126   : > { %v241_v32 = vsel %vm174_vm0, %v236_v31, 0 }
 0x127   : > { %250 = vmatpush.bf16.xpose.msra.mxu2 %v241_v32 }
 0x138   : > { %233 = vrot.lane.b32.xlu1 %v232_v5, %s555_s20 }
 0x162   : > { %392 = vmax.xlane.f32.xlu1 %v391_v40 }
 0x192   : > { %v204_v33 = vpop.xlane.xlu1 %203 }
 0x193   : > { %530 = vrcp.f32 %v204_v33 }
 0x199   : > { %v531_v34 = vpop.eup %530 }
 0x19a   : > { %v206_v35 = vmul.f32 %v531_v34, %v529_v25 }
 0x19c   : > { %v207_v36 = vpack.c.bf16 %v206_v35, %v206_v35 }
 0x19e   : > { %501 = vmatmul.msk.bf16.vlgmr.msra.gmra.mxu1 %vm174_vm0, %v207_v36 }
 0x1aa   : > { %v234_v42 = vpop.permute.xlu1 %233 }
 0x1ab   : > { %502 = vmatmul.msk.bf16.vlgmr.msra.gmra.mxu2 %vm174_vm0, %v234_v42 }
 0x1ae   : > { %504 = vmatmul.msk.bf16.vlgmr.msrb.gmra.mxu1 %vm174_vm0, %v302_v23 }
 0x1d5   : > { %v393_v61 = vpop.xlane.xlu1 %392 }
 0x1d6   : > { %v394_v1 = vsub.f32 %v390_v39, %v393_v61 }
 0x1d8   : > { %v395_v3 = vmul.f32 1.442695, %v394_v1 }
 0x21b   : > { %v224_v44 = vpop.f32.mrf.mxu1 }
 0x21c   : > { %v228_v45 = vpack.c.bf16 %v224_v44, %v224_v44 }
 0x21e   : > { %230 = vst.msk [vmem:[%s624_s24] sm:$0xf] %vm229_vm3, %v228_v45 }
 0x223   : > { %v226_v46 = vpop.f32.mrf.mxu1 }
 0x22b   : > { %v320_v47 = vpop.f32.mrf.mxu1 }
 0x22c   : > { %v324_v48 = vmul.f32 0.35355338, %v320_v47 }
 0x22e   : > { %v252_v49 = vpop.f32.mrf.mxu2  ;;  %v325_v50 = vadd.f32 %v324_v48, %v602_v12 }
 0x22f   : > { %v256_v51 = vmul.f32 0.35355338, %v252_v49 }
 0x230   : > { %v326_v52 = vsel %vm174_vm0, %v325_v50, -inf }
 0x231   : > { %327 = vmax.xlane.f32.xlu2 %v326_v52  ;;  %v257_v53 = vadd.f32 %v256_v51, %v602_v12 }
 0x233   : > { %v322_v54 = vpop.f32.mrf.mxu1  ;;  %v258_v55 = vsel %vm174_vm0, %v257_v53, -inf }
 0x234   : > { %259 = vmax.xlane.f32.xlu0 %v258_v55 }
 0x236   : > { %v254_v56 = vpop.f32.mrf.mxu2 }
 0x249   : > { %273 = vrot.lane.b32.xlu2 %v272_v58, %s555_s20 }
 0x2a4   : > { %v328_v59 = vpop.xlane.xlu2 %327 }
 0x2a5   : > { %v329_v60 = vsub.f32 %v325_v50, %v328_v59 }
 0x2a7   : > { %v330_v62 = vmul.f32 1.442695, %v329_v60  ;;  %v260_v63 = vpop.xlane.xlu0 %259 }
 0x2a8   : > { %v261_v0 = vsub.f32 %v257_v53, %v260_v63 }
 0x2a9   : > { %532 = vpow2.f32 %v330_v62 }
 0x2aa   : > { %v262_v2 = vmul.f32 1.442695, %v261_v0 }
 0x2ac   : > { %534 = vpow2.f32 %v262_v2  ;;  %v274_v10 = vpop.permute.xlu2 %273 }
 0x2ad   : > { %536 = vpow2.f32 %v395_v3  ;;  %v279_v11 = vsel %vm211_vm2, %v274_v10, 0 }
 0x2ae   : > { %288 = vmatpush.bf16.msra.mxu3 %v279_v11 }
 0x2af   : > { %v533_v4 = vpop.eup %532 }
 0x2b0   : > { %v332_v5 = vsel %vm174_vm0, %v533_v4, 0.0 }
 0x2b1   : > { %333 = vadd.xlane.f32.xlu1 %v332_v5 }
 0x2b2   : > { %v535_v6 = vpop.eup %534 }
 0x2b3   : > { %v264_v7 = vsel %vm174_vm0, %v535_v6, 0.0  ;;  %v537_v8 = vpop.eup %536 }
 0x2b4   : > { %265 = vadd.xlane.f32.xlu0 %v264_v7  ;;  %v397_v9 = vsel %vm174_vm0, %v537_v8, 0.0 }
 0x2bc   : > { %398 = vadd.xlane.f32.xlu0 %v397_v9 }
 0x2ca   : > { %338 = vrot.lane.b32.xlu1 %v272_v58, %s552_s18 }
 0x2d0   : > { %403 = vrot.lane.b32.xlu0 %v272_v58, %s553_s19 }
 0x324   : > { %v334_v15 = vpop.xlane.xlu1 %333 }
 0x327   : > { %v266_v12 = vpop.xlane.xlu0 %265 }
 0x328   : > { %538 = vrcp.f32 %v266_v12 }
 0x329   : > { %540 = vrcp.f32 %v334_v15 }
 0x32e   : > { %v539_v13 = vpop.eup %538 }
 0x32f   : > { %v268_v14 = vmul.f32 %v539_v13, %v535_v6  ;;  %v399_v17 = vpop.xlane.xlu0 %398  ;;  %v541_v18 = vpop.eup %540 }
 0x330   : > { %542 = vrcp.f32 %v399_v17  ;;  %v336_v20 = vmul.f32 %v541_v18, %v533_v4 }
 0x331   : > { %v269_v16 = vpack.c.bf16 %v268_v14, %v268_v14 }
 0x332   : > { %v337_v24 = vpack.c.bf16 %v336_v20, %v336_v20 }
 0x333   : > { %503 = vmatmul.msk.bf16.vlgmr.msra.gmra.mxu3 %vm174_vm0, %v269_v16 }
 0x336   : > { %v543_v22 = vpop.eup %542 }
 0x337   : > { %v401_v23 = vmul.f32 %v543_v22, %v537_v8 }
 0x339   : > { %v402_v27 = vpack.c.bf16 %v401_v23, %v401_v23 }
 0x33c   : > { %v339_v19 = vpop.permute.xlu1 %338 }
 0x33d   : > { %v344_v21 = vsel %vm211_vm2, %v339_v19, 0 }
 0x33e   : > { %353 = vmatpush.bf16.msrb.mxu3 %v344_v21 }
 0x342   : > { %v404_v25 = vpop.permute.xlu0 %403 }
 0x343   : > { %505 = vmatmul.msk.bf16.vlgmr.msrb.gmra.mxu3 %vm174_vm0, %v337_v24  ;;  %v409_v26 = vsel %vm211_vm2, %v404_v25, 0 }
 0x344   : > { %418 = vmatpush.bf16.msrb.mxu2 %v409_v26 }
 0x347   : > { %507 = vmatmul.msk.bf16.vlgmr.msrb.gmra.mxu2 %vm174_vm0, %v402_v27 }
 0x3b6   : > { %v290_v28 = vpop.f32.mrf.mxu3 }
 0x3b7   : > { %v294_v29 = vpack.c.bf16 %v290_v28, %v290_v28 }
 0x3b9   : > { %296 = vrot.lane.b32.xlu2 %v294_v29, %s557_s25 }
 0x3be   : > { %v292_v30 = vpop.f32.mrf.mxu3 }
 0x3c6   : > { %v355_v31 = vpop.f32.mrf.mxu3 }
 0x3c7   : > { %v359_v32 = vpack.c.bf16 %v355_v31, %v355_v31 }
 0x3c9   : > { %361 = vrot.lane.b32.xlu2 %v359_v32, %s558_s26 }
 0x3ca   : > { %v420_v33 = vpop.f32.mrf.mxu2 }
 0x3cb   : > { %v424_v34 = vpack.c.bf16 %v420_v33, %v420_v33 }
 0x3cd   : > { %426 = vrot.lane.b32.xlu0 %v424_v34, %s559_s27 }
 0x3ce   : > { %v357_v35 = vpop.f32.mrf.mxu3 }
 0x3d2   : > { %v422_v36 = vpop.f32.mrf.mxu2 }
 0x413   : > { %v297_v37 = vpop.permute.xlu2 %296 }
 0x414   : > { %300 = vst.msk [vmem:[%s624_s24] sm:$0xf] %vm299_vm4, %v297_v37 }
 0x423   : > { %v362_v38 = vpop.permute.xlu2 %361 }
 0x424   : > { %365 = vst.msk [vmem:[%s624_s24] sm:$0xf] %vm364_vm5, %v362_v38 }
 0x43f   : > { %v427_v39 = vpop.permute.xlu0 %426 }
 0x440   : > { %430 = vst.msk [vmem:[%s624_s24] sm:$0xf] %vm429_vm6, %v427_v39 }
 0x441 PF: > { %s12_s9 = sadd.s32 1, %s550_s9  }
 0x442   : > { %p9_p4 = scmp.ge.s32.totalorder %s12_s9, 4  }
 0x444   :  { %11 = sbr.rel (!%p9_p4) target bundleno = 1 (0x1), region = 61 }

// kernel: transformer_forward.33
= control target key start
LH: loop header
LB: loop body
LE: loop exit
PB: predicated region body
PF: predicated region fallthrough
CT: control target
= control target key end

     0   :  { %s594_s1 = inlined_call_operand.vmem [shape: bf16[128,384], index: 1, kind: input, shape index: {}]   ;;  %s595_s0 = inlined_call_operand.vmem [shape: bf16[16,128], index: 0, kind: input, shape index: {}]   ;;  %s596_s2 = inlined_call_operand.vmem [shape: f32[1,384], index: 2, kind: input, shape index: {}]   ;;  %s597_s3 = inlined_call_operand.vmem [shape: bf16[16,384], index: 3, kind: output, shape index: {}]  }
   0x1   :  { %v377_v0 = vld [vmem:[%s594_s1 + $0xa8] sm:$0xf]  ;;  %v410_v1 = vld [vmem:[%s594_s1 + $0xb0] sm:$0xf0]  ;;  %v409_v2 = vld [vmem:[%s594_s1 + $0xac] sm:$0xf] }
   0x2   :  { %v378_v3 = vor.u32 %v410_v1, %v377_v0  ;;  %v379_v4 = vld [vmem:[%s594_s1 + $0xb4] sm:$0xf0]  ;;  %v385_v5 = vld [vmem:[%s594_s1 + $0xb0] sm:$0xf]  ;;  %v411_v6 = vld [vmem:[%s594_s1 + $0xb8] sm:$0xf0] }
   0x3   :  { %v382_v7 = vor.u32 %v409_v2, %v379_v4  ;;  %v386_v8 = vor.u32 %v411_v6, %v385_v5  ;;  %v365_v9 = vld [vmem:[%s594_s1 + $0x90] sm:$0xf]  ;;  %v407_v10 = vld [vmem:[%s594_s1 + $0x98] sm:$0xf0]  ;;  %v406_v11 = vld [vmem:[%s594_s1 + $0x94] sm:$0xf] }
   0x4   :  { %198 = vmatpush.bf16.msra.mxu0 %v378_v3  ;;  %v366_v12 = vor.u32 %v407_v10, %v365_v9  ;;  %v367_v13 = vld [vmem:[%s594_s1 + $0x9c] sm:$0xf0]  ;;  %v373_v14 = vld [vmem:[%s594_s1 + $0x98] sm:$0xf]  ;;  %v408_v15 = vld [vmem:[%s594_s1 + $0xa0] sm:$0xf0] }
   0x5   :  { %212 = vmatpush.bf16.msra.mxu1 %v382_v7  ;;  %226 = vmatpush.bf16.msra.mxu2 %v386_v8  ;;  %v370_v16 = vor.u32 %v406_v11, %v367_v13  ;;  %v374_v17 = vor.u32 %v408_v15, %v373_v14  ;;  %v353_v18 = vld [vmem:[%s594_s1 + $0x78] sm:$0xf]  ;;  %v404_v19 = vld [vmem:[%s594_s1 + $0x80] sm:$0xf0]  ;;  %v403_v20 = vld [vmem:[%s594_s1 + $0x7c] sm:$0xf] }
   0x6   :  { %v355_v21 = vld [vmem:[%s594_s1 + $0x84] sm:$0xf0]  ;;  %v361_v22 = vld [vmem:[%s594_s1 + $0x80] sm:$0xf]  ;;  %v405_v23 = vld [vmem:[%s594_s1 + $0x88] sm:$0xf0]  ;;  %v354_v24 = vor.u32 %v404_v19, %v353_v18 }
   0x7   :  { %v358_v25 = vor.u32 %v403_v20, %v355_v21  ;;  %v362_v26 = vor.u32 %v405_v23, %v361_v22  ;;  %v341_v27 = vld [vmem:[%s594_s1 + $0x60] sm:$0xf]  ;;  %v401_v28 = vld [vmem:[%s594_s1 + $0x68] sm:$0xf0]  ;;  %v400_v29 = vld [vmem:[%s594_s1 + $0x64] sm:$0xf] }
   0x8   :  { %199 = vmatpush.bf16.msra.mxu0 %v366_v12  ;;  %v343_v30 = vld [vmem:[%s594_s1 + $0x6c] sm:$0xf0]  ;;  %v349_v31 = vld [vmem:[%s594_s1 + $0x68] sm:$0xf]  ;;  %v402_v32 = vld [vmem:[%s594_s1 + $0x70] sm:$0xf0]  ;;  %v342_v33 = vor.u32 %v401_v28, %v341_v27 }
   0x9   :  { %213 = vmatpush.bf16.msra.mxu1 %v370_v16  ;;  %227 = vmatpush.bf16.msra.mxu2 %v374_v17  ;;  %v346_v34 = vor.u32 %v400_v29, %v343_v30  ;;  %v350_v35 = vor.u32 %v402_v32, %v349_v31  ;;  %v329_v36 = vld [vmem:[%s594_s1 + $0x48] sm:$0xf]  ;;  %v398_v37 = vld [vmem:[%s594_s1 + $0x50] sm:$0xf0]  ;;  %v397_v38 = vld [vmem:[%s594_s1 + $0x4c] sm:$0xf] }
   0xa   :  { %v331_v39 = vld [vmem:[%s594_s1 + $0x54] sm:$0xf0]  ;;  %v337_v40 = vld [vmem:[%s594_s1 + $0x50] sm:$0xf]  ;;  %v399_v41 = vld [vmem:[%s594_s1 + $0x58] sm:$0xf0]  ;;  %v330_v42 = vor.u32 %v398_v37, %v329_v36 }
   0xb   :  { %v334_v43 = vor.u32 %v397_v38, %v331_v39  ;;  %v338_v44 = vor.u32 %v399_v41, %v337_v40  ;;  %v317_v45 = vld [vmem:[%s594_s1 + $0x30] sm:$0xf]  ;;  %v395_v46 = vld [vmem:[%s594_s1 + $0x38] sm:$0xf0]  ;;  %v394_v47 = vld [vmem:[%s594_s1 + $0x34] sm:$0xf] }
   0xc   :  { %200 = vmatpush.bf16.msra.mxu0 %v354_v24  ;;  %v319_v48 = vld [vmem:[%s594_s1 + $0x3c] sm:$0xf0]  ;;  %v325_v49 = vld [vmem:[%s594_s1 + $0x38] sm:$0xf]  ;;  %v396_v50 = vld [vmem:[%s594_s1 + $0x40] sm:$0xf0]  ;;  %v318_v51 = vor.u32 %v395_v46, %v317_v45 }
   0xd   :  { %214 = vmatpush.bf16.msra.mxu1 %v358_v25  ;;  %228 = vmatpush.bf16.msra.mxu2 %v362_v26  ;;  %v322_v52 = vor.u32 %v394_v47, %v319_v48  ;;  %v326_v53 = vor.u32 %v396_v50, %v325_v49  ;;  %v305_v54 = vld [vmem:[%s594_s1 + $0x18] sm:$0xf]  ;;  %v392_v55 = vld [vmem:[%s594_s1 + $0x20] sm:$0xf0]  ;;  %v391_v56 = vld [vmem:[%s594_s1 + $0x1c] sm:$0xf] }
   0xe   :  { %v307_v57 = vld [vmem:[%s594_s1 + $0x24] sm:$0xf0]  ;;  %v313_v58 = vld [vmem:[%s594_s1 + $0x20] sm:$0xf]  ;;  %v393_v59 = vld [vmem:[%s594_s1 + $0x28] sm:$0xf0]  ;;  %v306_v60 = vor.u32 %v392_v55, %v305_v54 }
   0xf   :  { %v310_v61 = vor.u32 %v391_v56, %v307_v57  ;;  %v314_v62 = vor.u32 %v393_v59, %v313_v58  ;;  %v293_v63 = vld [vmem:[%s594_s1] sm:$0xf]  ;;  %v389_v0 = vld [vmem:[%s594_s1 + $0x8] sm:$0xf0]  ;;  %v388_v1 = vld [vmem:[%s594_s1 + $0x4] sm:$0xf] }
  0x10   :  { %201 = vmatpush.bf16.msra.mxu0 %v342_v33  ;;  %v295_v2 = vld [vmem:[%s594_s1 + $0xc] sm:$0xf0]  ;;  %v301_v3 = vld [vmem:[%s594_s1 + $0x8] sm:$0xf]  ;;  %v390_v4 = vld [vmem:[%s594_s1 + $0x10] sm:$0xf0]  ;;  %v294_v5 = vor.u32 %v389_v0, %v293_v63 }
  0x11   :  { %215 = vmatpush.bf16.msra.mxu1 %v346_v34  ;;  %229 = vmatpush.bf16.msra.mxu2 %v350_v35  ;;  %v298_v6 = vor.u32 %v388_v1, %v295_v2  ;;  %v302_v7 = vor.u32 %v390_v4, %v301_v3  ;;  %v387_v8 = vld [vmem:[%s595_s0] sm:$0xff] }
  0x12   :  { %v261_v9 = vld [vmem:[%s596_s2] sm:$0x7] }
  0x13   :  { %v263_v10 = vperm.slane %v261_v9, 0  ;;  %v264_v11 = vperm.slane %v261_v9, 1  ;;  %v265_v17 = vperm.slane %v261_v9, 2 }
  0x14   :  { %202 = vmatpush.bf16.msra.mxu0 %v330_v42 }
  0x15   :  { %216 = vmatpush.bf16.msra.mxu1 %v334_v43  ;;  %230 = vmatpush.bf16.msra.mxu2 %v338_v44 }
  0x18   :  { %203 = vmatpush.bf16.msra.mxu0 %v318_v51 }
  0x19   :  { %217 = vmatpush.bf16.msra.mxu1 %v322_v52  ;;  %231 = vmatpush.bf16.msra.mxu2 %v326_v53 }
  0x1c   :  { %204 = vmatpush.bf16.msra.mxu0 %v306_v60 }
  0x1d   :  { %218 = vmatpush.bf16.msra.mxu1 %v310_v61  ;;  %232 = vmatpush.bf16.msra.mxu2 %v314_v62 }
  0x20   :  { %205 = vmatpush.bf16.msra.mxu0 %v294_v5 }
  0x21   :  { %219 = vmatpush.bf16.msra.mxu1 %v298_v6  ;;  %233 = vmatpush.bf16.msra.mxu2 %v302_v7 }
  0x23   :  { %206 = vmatmul.bf16.vlgmr.msra.gmra.mxu0 %v387_v8 }
  0x24   :  { %220 = vmatmul.bf16.vlgmr.msra.gmra.mxu1 %v387_v8  ;;  %234 = vmatmul.bf16.vlgmr.msra.gmra.mxu2 %v387_v8 }
  0xa0   :  { %v207_v12 = vpop.f32.mrf.mxu0 }
  0xa1   :  { %v269_v13 = vadd.f32 %v263_v10, %v207_v12  ;;  %v221_v14 = vpop.f32.mrf.mxu1 }
  0xa2   :  { %v270_v15 = vadd.f32 %v264_v11, %v221_v14 }
  0xa4   :  { %v275_v16 = vpack.c.bf16 %v270_v15, %v269_v13 }
  0xa6   :  { %279 = vst [vmem:[%s597_s3] sm:$0xff] %v275_v16 }
  0xa7   :  { %v235_v18 = vpop.f32.mrf.mxu2 }
  0xa8   :  { %v271_v19 = vadd.f32 %v265_v17, %v235_v18  ;;  %v209_v20 = vpop.f32.mrf.mxu0 }
  0xa9   :  { %v272_v21 = vadd.f32 %v263_v10, %v209_v20  ;;  %v223_v22 = vpop.f32.mrf.mxu1 }
  0xaa   :  { %v276_v23 = vpack.c.bf16 %v271_v19, %v271_v19  ;;  %v273_v24 = vadd.f32 %v264_v11, %v223_v22 }
  0xac   :  { %280 = vst [vmem:[%s597_s3 + $0x8] sm:$0xf] %v276_v23  ;;  %v277_v25 = vpack.c.bf16 %v273_v24, %v272_v21 }
  0xae   :  { %281 = vst [vmem:[%s597_s3 + $0xc] sm:$0xff] %v277_v25 }
  0xaf   :  { %v237_v26 = vpop.f32.mrf.mxu2 }
  0xb0   :  { %v274_v27 = vadd.f32 %v265_v17, %v237_v26 }
  0xb2   :  { %v278_v28 = vpack.c.bf16 %v274_v27, %v274_v27 }
  0xb4   :  { %282 = vst [vmem:[%s597_s3 + $0x14] sm:$0xf] %v278_v28 }

// kernel: transformer_forward.35
= control target key start
LH: loop header
LB: loop body
LE: loop exit
PB: predicated region body
PF: predicated region fallthrough
CT: control target
= control target key end

     0   :  { %v140_v9 = vlaneseq  ;;  %s347_s1 = inlined_call_operand.vmem [shape: bf16[128,128], index: 1, kind: input, shape index: {}]   ;;  %s348_s2 = inlined_call_operand.vmem [shape: f32[1,128], index: 2, kind: input, shape index: {}]   ;;  %s349_s0 = inlined_call_operand.vmem [shape: bf16[16,128], index: 0, kind: input, shape index: {}]   ;;  %s350_s3 = inlined_call_operand.vmem [shape: bf16[16,128], index: 3, kind: input, shape index: {}]   ;;  %s351_s4 = inlined_call_operand.vmem [shape: f32[1,128], index: 4, kind: input, shape index: {}]   ;;  %s352_s5 = inlined_call_operand.vmem [shape: f32[1,128], index: 5, kind: input, shape index: {}]   ;;  %s353_s6 = inlined_call_operand.vmem [shape: bf16[16,128], index: 6, kind: output, shape index: {}]  }
   0x1   :  { %v249_v0 = vld [vmem:[%s347_s1 + $0x38] sm:$0xff]  ;;  %v248_v1 = vld [vmem:[%s347_s1 + $0x30] sm:$0xff]  ;;  %v247_v2 = vld [vmem:[%s347_s1 + $0x28] sm:$0xff] }
   0x2   :  { %103 = vmatpush.bf16.msra.mxu0 %v249_v0  ;;  %v246_v3 = vld [vmem:[%s347_s1 + $0x20] sm:$0xff]  ;;  %v245_v4 = vld [vmem:[%s347_s1 + $0x18] sm:$0xff]  ;;  %v244_v5 = vld [vmem:[%s347_s1 + $0x10] sm:$0xff]  ;;  %v141_v12 = vand.u32 127, %v140_v9 }
   0x3   :  { %v243_v6 = vld [vmem:[%s347_s1 + $0x8] sm:$0xff]  ;;  %v242_v7 = vld [vmem:[%s347_s1] sm:$0xff] }
   0x4   :  { %v241_v8 = vld [vmem:[%s349_s0] sm:$0xff]  ;;  %vm142_vm0 = vcmp.lt.s32.totalorder %v141_v12, 32 }
   0x5   :  { %v251_v10 = vld [vmem:[%s350_s3] sm:$0xff]  }
   0x6   :  { %104 = vmatpush.bf16.msra.mxu0 %v248_v1  ;;  %v259_v11 = vld [vmem:[%s348_s2] ss:$0 sm:$0xff]  ;;  %v252_v13 = vunpack.c.l.bf16 %v251_v10  ;;  %v253_v18 = vunpack.c.h.bf16 %v251_v10 }
   0x7   :  { %v260_v51 = vld [vmem:[%s351_s4] ss:$0 sm:$0xff] }
   0x8   :  { %v261_v55 = vld [vmem:[%s352_s5] ss:$0 sm:$0xff] }
   0xa   :  { %105 = vmatpush.bf16.msra.mxu0 %v247_v2 }
   0xe   :  { %106 = vmatpush.bf16.msra.mxu0 %v246_v3 }
  0x12   :  { %107 = vmatpush.bf16.msra.mxu0 %v245_v4 }
  0x16   :  { %108 = vmatpush.bf16.msra.mxu0 %v244_v5 }
  0x1a   :  { %109 = vmatpush.bf16.msra.mxu0 %v243_v6 }
  0x1e   :  { %110 = vmatpush.bf16.msra.mxu0 %v242_v7 }
  0x21   :  { %111 = vmatmul.bf16.vlgmr.msra.gmra.mxu0 %v241_v8 }
  0x9e   :  { %v112_v14 = vpop.f32.mrf.mxu0 }
  0x9f   :  { %v130_v15 = vadd.f32 %v259_v11, %v112_v14 }
  0xa1   :  { %v136_v16 = vadd.f32 %v252_v13, %v130_v15 }
  0xa3   :  { %v143_v17 = vsel %vm142_vm0, %v136_v16, 0.0 }
  0xa4   :  { %145 = vadd.xlane.f32.xlu0 %v143_v17 }
  0xa6   :  { %v114_v19 = vpop.f32.mrf.mxu0 }
  0xa7   :  { %v131_v20 = vadd.f32 %v259_v11, %v114_v19 }
  0xa9   :  { %v137_v21 = vadd.f32 %v253_v18, %v131_v20 }
  0xab   :  { %v144_v22 = vsel %vm142_vm0, %v137_v21, 0.0 }
  0xac   :  { %147 = vadd.xlane.f32.xlu0 %v144_v22 }
 0x117   :  { %v146_v23 = vpop.xlane.xlu0 %145 }
 0x118   :  { %v149_v24 = vmul.f32 0.03125, %v146_v23 }
 0x11a   :  { %v151_v25 = vsub.f32 %v136_v16, %v149_v24 }
 0x11c   :  { %v153_v26 = vsel %vm142_vm0, %v151_v25, 0.0 }
 0x11d   :  { %v155_v27 = vmul.f32 %v153_v26, %v153_v26 }
 0x11f   :  { %157 = vadd.xlane.f32.xlu1 %v155_v27  ;;  %v148_v28 = vpop.xlane.xlu0 %147 }
 0x120   :  { %v150_v29 = vmul.f32 0.03125, %v148_v28 }
 0x122   :  { %v152_v30 = vsub.f32 %v137_v21, %v150_v29 }
 0x124   :  { %v154_v31 = vsel %vm142_vm0, %v152_v30, 0.0 }
 0x125   :  { %v156_v32 = vmul.f32 %v154_v31, %v154_v31 }
 0x127   :  { %159 = vadd.xlane.f32.xlu1 %v156_v32 }
 0x192   :  { %v158_v33 = vpop.xlane.xlu1 %157 }
 0x193   :  { %v161_v34 = vmul.f32 0.03125, %v158_v33 }
 0x195   :  { %v163_v35 = vadd.f32 1e-05, %v161_v34 }
 0x197   :  { %262 = vrsqrt.f32 %v163_v35  ;;  %vm171_vm2 = vweird.f32 %v163_v35 }
 0x19a   :  { %v160_v36 = vpop.xlane.xlu1 %159 }
 0x19b   :  { %v162_v37 = vmul.f32 0.03125, %v160_v36 }
 0x19d   :  { %v263_v38 = vpop.eup %262  ;;  %v164_v39 = vadd.f32 1e-05, %v162_v37 }
 0x19e   :  { %v166_v40 = vmul.f32 %v263_v38, %v163_v35  ;;  %vm172_vm1 = vweird.f32 %v263_v38 }
 0x19f   :  { %264 = vrsqrt.f32 %v164_v39  ;;  %vm173_vm3 = vmor %vm171_vm2, %vm172_vm1  ;;  %vm181_vm5 = vweird.f32 %v164_v39 }
 0x1a0   :  { %v167_v41 = vmul.f32 %v263_v38, %v166_v40 }
 0x1a2   :  { %v168_v42 = vmul.f32 0.5, %v167_v41 }
 0x1a4   :  { %v169_v43 = vsub.f32 1.5, %v168_v42 }
 0x1a5   :  { %v265_v44 = vpop.eup %264 }
 0x1a6   :  { %v170_v45 = vmul.f32 %v263_v38, %v169_v43  ;;  %v176_v46 = vmul.f32 %v265_v44, %v164_v39  ;;  %vm182_vm4 = vweird.f32 %v265_v44 }
 0x1a7   :  { %vm183_vm6 = vmor %vm181_vm5, %vm182_vm4 }
 0x1a8   :  { %v177_v47 = vmul.f32 %v265_v44, %v176_v46  ;;  %v174_v48 = vsel %vm173_vm3, %v263_v38, %v170_v45 }
 0x1a9   :  { %v185_v52 = vmul.f32 %v174_v48, %v151_v25 }
 0x1aa   :  { %v178_v49 = vmul.f32 0.5, %v177_v47 }
 0x1ab   :  { %v190_v56 = vmul.f32 %v260_v51, %v185_v52 }
 0x1ac   :  { %v179_v50 = vsub.f32 1.5, %v178_v49 }
 0x1ad   :  { %v195_v59 = vadd.f32 %v261_v55, %v190_v56 }
 0x1ae   :  { %v180_v53 = vmul.f32 %v265_v44, %v179_v50 }
 0x1b0   :  { %v184_v54 = vsel %vm183_vm6, %v265_v44, %v180_v53 }
 0x1b1   :  { %v186_v57 = vmul.f32 %v184_v54, %v152_v30 }
 0x1b3   :  { %v191_v58 = vmul.f32 %v260_v51, %v186_v57 }
 0x1b5   :  { %v196_v60 = vadd.f32 %v261_v55, %v191_v58 }
 0x1b7   :  { %v257_v61 = vpack.c.bf16 %v196_v60, %v195_v59 }
 0x1b9   :  { %258 = vst [vmem:[%s353_s6] sm:$0xff] %v257_v61  }

// kernel: transformer_forward.26
= control target key start
LH: loop header
LB: loop body
LE: loop exit
PB: predicated region body
PF: predicated region fallthrough
CT: control target
= control target key end

     0   :  { %s566_s9 = smov 0   ;;  %s641_s0 = inlined_call_operand.vmem [shape: bf16[2,8,384], index: 0, kind: input, shape index: {}]   ;;  %s642_s1 = inlined_call_operand.vmem [shape: f32[2,1,8], index: 1, kind: input, shape index: {}]   ;;  %s643_s2 = inlined_call_operand.vmem [shape: bf16[2,8,128], index: 2, kind: output, shape index: {}]  }
   0x1 LB: > { %s486_s10 = sadd.s32 4294967295, %s542_s9   ;;  %p490_p0 = scmp.ge.s32.totalorder %s542_s9, 1  ;;  %s542_s9 = sphi %s566_s9, %s12_s9  }
   0x2   : > { %p120_p1 = scmp.lt.s32.totalorder %s542_s9, 3 }
   0x4   : > { %p121_p2 = pnand %p490_p0, %p120_p1 }
   0x5   : > { %p144_p3 = scmp.lt.s32.totalorder (!%p121_p2), %s486_s10, 1  ;;  %s544_s18 = smov (!%p121_p2), 112  }
   0x6   : > { %124 = sbr.rel (%p121_p2) target bundleno = 1089 (0x441), region = 28  ;;  %s545_s19 = smov (!%p121_p2), 104  }
   0x7   : > { %s546_s20 = smov (!%p121_p2), 120   ;;  %s548_s25 = smov (!%p121_p2), 8  }
   0x8   : > { %s549_s26 = smov (!%p121_p2), 16   ;;  %s550_s27 = smov (!%p121_p2), 24  }
   0xb   : > { %s645_s10 = smov (!%p144_p3, %s486_s10), 1  ;;  %vm167_vm0 = vcmask 64512   ;;  %vm204_vm1 = vcmask 1043456   ;;  %v547_v37 = vmov 0   ;;  %vm222_vm2 = vcmask 60416  }
   0xc   : > { %s503_s11 = smul.u32 12, %s645_s10  ;;  %s151_s17 = scalar_lea.vmem %s642_s1, %s645_s10  ;;  %vm292_vm3 = vcmask 126016   ;;  %vm357_vm4 = vcmask 191616   ;;  %vm422_vm5 = vcmask 257216  }
   0xd   : > { %v593_v6 = vld [vmem:[%s151_s17] ss:$0 sm:$0xff]  ;;  %s492_s21 = sshll.u32 %s645_s10, 2 }
   0xe   : > { %s580_s14 = scalar_lea.vmem %s641_s0, %s503_s11  ;;  %s615_s24 = scalar_lea.vmem %s643_s2, %s492_s21 }
   0xf   : > { %v157_v0 = vld [vmem:[%s580_s14] sm:$0xff]  ;;  %v158_v22 = vld [vmem:[%s580_s14 + $0x8] sm:$0xf]  ;;  %163 = vst [vmem:[%s615_s24] sm:$0xf] %v547_v37 }
  0x10   : > { %v165_v1 = vunpack.c.h.b16 %v157_v0  ;;  %v224_v4 = vunpack.c.l.b16 %v157_v0  ;;  %v206_v23 = vsel %vm204_vm1, %v158_v22, 0  ;;  %v264_v51 = vunpack.c.l.b16 %v158_v22 }
  0x11   : > { %215 = vmatpush.bf16.msra.mxu1 %v206_v23 }
  0x12   : > { %v166_v2 = vpack.c.b16 %v165_v1, %v165_v1  ;;  %v225_v5 = vpack.c.b16 %v224_v4, %v224_v4  ;;  %v265_v52 = vpack.c.b16 %v264_v51, %v264_v51 }
  0x14   : > { %v172_v3 = vsel %vm167_vm0, %v166_v2, 0  ;;  %296 = vrot.lane.b32.xlu2 %v166_v2, %s544_s18 }
  0x15   : > { %181 = vmatpush.bf16.xpose.msra.mxu0 %v172_v3 }
  0x1c   : > { %493 = vmatmul.msk.bf16.vlgmr.msra.gmra.mxu0 %vm167_vm0, %v157_v0  ;;  %361 = vrot.lane.b32.xlu2 %v166_v2, %s545_s19 }
  0x24   : > { %294 = vrot.lane.b32.xlu2 %v225_v5, %s544_s18 }
  0x2c   : > { %359 = vrot.lane.b32.xlu2 %v225_v5, %s545_s19 }
  0x6e   : > { %v297_v12 = vpop.permute.xlu2 %296 }
  0x6f   : > { %v302_v24 = vsel %vm167_vm0, %v297_v12, 0 }
  0x70   : > { %311 = vmatpush.bf16.xpose.msrb.mxu1 %v302_v24 }
  0x76   : > { %v362_v13 = vpop.permute.xlu2 %361 }
  0x77   : > { %v367_v18 = vsel %vm167_vm0, %v362_v13, 0 }
  0x78   : > { %376 = vmatpush.bf16.xpose.msrb.mxu0 %v367_v18 }
  0x7e   : > { %v295_v17 = vpop.permute.xlu2 %294 }
  0x86   : > { %v360_v21 = vpop.permute.xlu2 %359 }
  0x87   : > { %499 = vmatmul.msk.bf16.vlgmr.msrb.gmra.mxu0 %vm167_vm0, %v360_v21 }
  0x99   : > { %v183_v7 = vpop.f32.mrf.mxu0 }
  0x9a   : > { %v187_v8 = vmul.f32 0.35355338, %v183_v7 }
  0x9c   : > { %v188_v9 = vadd.f32 %v593_v6, %v187_v8 }
  0x9e   : > { %v189_v10 = vsel %vm167_vm0, %v188_v9, -inf }
  0x9f   : > { %190 = vmax.xlane.f32.xlu0 %v189_v10 }
  0xa1   : > { %v185_v11 = vpop.f32.mrf.mxu0 }
  0xb3   : > { %228 = vrot.lane.b32.xlu0 %v166_v2, %s546_s20 }
 0x104   : > { %v378_v31 = vpop.f32.mrf.mxu0 }
 0x105   : > { %v382_v32 = vmul.f32 0.35355338, %v378_v31 }
 0x107   : > { %v383_v33 = vadd.f32 %v593_v6, %v382_v32 }
 0x109   : > { %v384_v34 = vsel %vm167_vm0, %v383_v33, -inf }
 0x10c   : > { %v380_v35 = vpop.f32.mrf.mxu0 }
 0x112   : > { %v191_v14 = vpop.xlane.xlu0 %190 }
 0x113   : > { %v192_v15 = vsub.f32 %v188_v9, %v191_v14 }
 0x115   : > { %v193_v16 = vmul.f32 1.442695, %v192_v15 }
 0x117   : > { %520 = vpow2.f32 %v193_v16 }
 0x11d   : > { %v521_v19 = vpop.eup %520 }
 0x11e   : > { %v195_v20 = vsel %vm167_vm0, %v521_v19, 0.0 }
 0x11f   : > { %196 = vadd.xlane.f32.xlu1 %v195_v20 }
 0x125   : > { %v229_v25 = vpop.permute.xlu0 %228 }
 0x126   : > { %v234_v26 = vsel %vm167_vm0, %v229_v25, 0 }
 0x127   : > { %243 = vmatpush.bf16.xpose.msra.mxu2 %v234_v26 }
 0x138   : > { %226 = vrot.lane.b32.xlu1 %v225_v5, %s546_s20 }
 0x162   : > { %385 = vmax.xlane.f32.xlu1 %v384_v34 }
 0x192   : > { %v197_v27 = vpop.xlane.xlu1 %196 }
 0x193   : > { %522 = vrcp.f32 %v197_v27 }
 0x199   : > { %v523_v28 = vpop.eup %522 }
 0x19a   : > { %v199_v29 = vmul.f32 %v523_v28, %v521_v19 }
 0x19c   : > { %v200_v30 = vpack.c.bf16 %v199_v29, %v199_v29 }
 0x19e   : > { %494 = vmatmul.msk.bf16.vlgmr.msra.gmra.mxu1 %vm167_vm0, %v200_v30 }
 0x1aa   : > { %v227_v36 = vpop.permute.xlu1 %226 }
 0x1ab   : > { %495 = vmatmul.msk.bf16.vlgmr.msra.gmra.mxu2 %vm167_vm0, %v227_v36 }
 0x1ae   : > { %497 = vmatmul.msk.bf16.vlgmr.msrb.gmra.mxu1 %vm167_vm0, %v295_v17 }
 0x1d5   : > { %v386_v55 = vpop.xlane.xlu1 %385 }
 0x1d6   : > { %v387_v59 = vsub.f32 %v383_v33, %v386_v55 }
 0x1d8   : > { %v388_v61 = vmul.f32 1.442695, %v387_v59 }
 0x21b   : > { %v217_v38 = vpop.f32.mrf.mxu1 }
 0x21c   : > { %v221_v39 = vpack.c.bf16 %v217_v38, %v217_v38 }
 0x21e   : > { %223 = vst.msk [vmem:[%s615_s24] sm:$0xf] %vm222_vm2, %v221_v39 }
 0x223   : > { %v219_v40 = vpop.f32.mrf.mxu1 }
 0x22b   : > { %v313_v41 = vpop.f32.mrf.mxu1 }
 0x22c   : > { %v317_v42 = vmul.f32 0.35355338, %v313_v41 }
 0x22e   : > { %v245_v43 = vpop.f32.mrf.mxu2  ;;  %v318_v44 = vadd.f32 %v593_v6, %v317_v42 }
 0x22f   : > { %v249_v45 = vmul.f32 0.35355338, %v245_v43 }
 0x230   : > { %v319_v46 = vsel %vm167_vm0, %v318_v44, -inf }
 0x231   : > { %320 = vmax.xlane.f32.xlu2 %v319_v46  ;;  %v250_v47 = vadd.f32 %v593_v6, %v249_v45 }
 0x233   : > { %v315_v48 = vpop.f32.mrf.mxu1  ;;  %v251_v49 = vsel %vm167_vm0, %v250_v47, -inf }
 0x234   : > { %252 = vmax.xlane.f32.xlu0 %v251_v49 }
 0x236   : > { %v247_v50 = vpop.f32.mrf.mxu2 }
 0x249   : > { %266 = vrot.lane.b32.xlu2 %v265_v52, %s546_s20 }
 0x2a4   : > { %v321_v53 = vpop.xlane.xlu2 %320 }
 0x2a5   : > { %v322_v54 = vsub.f32 %v318_v44, %v321_v53 }
 0x2a7   : > { %v323_v56 = vmul.f32 1.442695, %v322_v54  ;;  %v253_v57 = vpop.xlane.xlu0 %252 }
 0x2a8   : > { %v254_v58 = vsub.f32 %v250_v47, %v253_v57 }
 0x2a9   : > { %524 = vpow2.f32 %v323_v56 }
 0x2aa   : > { %v255_v60 = vmul.f32 1.442695, %v254_v58 }
 0x2ac   : > { %526 = vpow2.f32 %v255_v60  ;;  %v267_v4 = vpop.permute.xlu2 %266 }
 0x2ad   : > { %528 = vpow2.f32 %v388_v61  ;;  %v272_v5 = vsel %vm204_vm1, %v267_v4, 0 }
 0x2ae   : > { %281 = vmatpush.bf16.msra.mxu3 %v272_v5 }
 0x2af   : > { %v525_v62 = vpop.eup %524 }
 0x2b0   : > { %v325_v63 = vsel %vm167_vm0, %v525_v62, 0.0 }
 0x2b1   : > { %326 = vadd.xlane.f32.xlu1 %v325_v63 }
 0x2b2   : > { %v527_v0 = vpop.eup %526 }
 0x2b3   : > { %v257_v1 = vsel %vm167_vm0, %v527_v0, 0.0  ;;  %v529_v2 = vpop.eup %528 }
 0x2b4   : > { %258 = vadd.xlane.f32.xlu0 %v257_v1  ;;  %v390_v3 = vsel %vm167_vm0, %v529_v2, 0.0 }
 0x2bc   : > { %391 = vadd.xlane.f32.xlu0 %v390_v3 }
 0x2ca   : > { %331 = vrot.lane.b32.xlu1 %v265_v52, %s544_s18 }
 0x2d0   : > { %396 = vrot.lane.b32.xlu0 %v265_v52, %s545_s19 }
 0x324   : > { %v327_v9 = vpop.xlane.xlu1 %326 }
 0x327   : > { %v259_v6 = vpop.xlane.xlu0 %258 }
 0x328   : > { %530 = vrcp.f32 %v259_v6 }
 0x329   : > { %532 = vrcp.f32 %v327_v9 }
 0x32e   : > { %v531_v7 = vpop.eup %530 }
 0x32f   : > { %v261_v8 = vmul.f32 %v531_v7, %v527_v0  ;;  %v392_v11 = vpop.xlane.xlu0 %391  ;;  %v533_v12 = vpop.eup %532 }
 0x330   : > { %534 = vrcp.f32 %v392_v11  ;;  %v329_v14 = vmul.f32 %v533_v12, %v525_v62 }
 0x331   : > { %v262_v10 = vpack.c.bf16 %v261_v8, %v261_v8 }
 0x332   : > { %v330_v18 = vpack.c.bf16 %v329_v14, %v329_v14 }
 0x333   : > { %496 = vmatmul.msk.bf16.vlgmr.msra.gmra.mxu3 %vm167_vm0, %v262_v10 }
 0x336   : > { %v535_v16 = vpop.eup %534 }
 0x337   : > { %v394_v17 = vmul.f32 %v535_v16, %v529_v2 }
 0x339   : > { %v395_v21 = vpack.c.bf16 %v394_v17, %v394_v17 }
 0x33c   : > { %v332_v13 = vpop.permute.xlu1 %331 }
 0x33d   : > { %v337_v15 = vsel %vm204_vm1, %v332_v13, 0 }
 0x33e   : > { %346 = vmatpush.bf16.msrb.mxu3 %v337_v15 }
 0x342   : > { %v397_v19 = vpop.permute.xlu0 %396 }
 0x343   : > { %498 = vmatmul.msk.bf16.vlgmr.msrb.gmra.mxu3 %vm167_vm0, %v330_v18  ;;  %v402_v20 = vsel %vm204_vm1, %v397_v19, 0 }
 0x344   : > { %411 = vmatpush.bf16.msrb.mxu2 %v402_v20 }
 0x347   : > { %500 = vmatmul.msk.bf16.vlgmr.msrb.gmra.mxu2 %vm167_vm0, %v395_v21 }
 0x3b6   : > { %v283_v22 = vpop.f32.mrf.mxu3 }
 0x3b7   : > { %v287_v23 = vpack.c.bf16 %v283_v22, %v283_v22 }
 0x3b9   : > { %289 = vrot.lane.b32.xlu2 %v287_v23, %s548_s25 }
 0x3be   : > { %v285_v24 = vpop.f32.mrf.mxu3 }
 0x3c6   : > { %v348_v25 = vpop.f32.mrf.mxu3 }
 0x3c7   : > { %v352_v26 = vpack.c.bf16 %v348_v25, %v348_v25 }
 0x3c9   : > { %354 = vrot.lane.b32.xlu2 %v352_v26, %s549_s26 }
 0x3ca   : > { %v413_v27 = vpop.f32.mrf.mxu2 }
 0x3cb   : > { %v417_v28 = vpack.c.bf16 %v413_v27, %v413_v27 }
 0x3cd   : > { %419 = vrot.lane.b32.xlu0 %v417_v28, %s550_s27 }
 0x3ce   : > { %v350_v29 = vpop.f32.mrf.mxu3 }
 0x3d2   : > { %v415_v30 = vpop.f32.mrf.mxu2 }
 0x413   : > { %v290_v31 = vpop.permute.xlu2 %289 }
 0x414   : > { %293 = vst.msk [vmem:[%s615_s24] sm:$0xf] %vm292_vm3, %v290_v31 }
 0x423   : > { %v355_v32 = vpop.permute.xlu2 %354 }
 0x424   : > { %358 = vst.msk [vmem:[%s615_s24] sm:$0xf] %vm357_vm4, %v355_v32 }
 0x43f   : > { %v420_v33 = vpop.permute.xlu0 %419 }
 0x440   : > { %423 = vst.msk [vmem:[%s615_s24] sm:$0xf] %vm422_vm5, %v420_v33 }
 0x441 PF: > { %s12_s9 = sadd.s32 1, %s542_s9  }
 0x442   : > { %p9_p4 = scmp.ge.s32.totalorder %s12_s9, 4  }
 0x444   :  { %11 = sbr.rel (!%p9_p4) target bundleno = 1 (0x1), region = 61 }

// kernel: transformer_forward.37
= control target key start
LH: loop header
LB: loop body
LE: loop exit
PB: predicated region body
PF: predicated region fallthrough
CT: control target
= control target key end

     0   :  { %s404_s1 = inlined_call_operand.vmem [shape: bf16[128,256], index: 1, kind: input, shape index: {}]   ;;  %s405_s0 = inlined_call_operand.vmem [shape: bf16[16,128], index: 0, kind: input, shape index: {}]   ;;  %s406_s2 = inlined_call_operand.vmem [shape: f32[1,256], index: 2, kind: input, shape index: {}]   ;;  %s407_s3 = inlined_call_operand.vmem [shape: bf16[16,256], index: 3, kind: output, shape index: {}]  }
   0x1   :  { %v253_v0 = vld [vmem:[%s404_s1 + $0x70] sm:$0xf]  ;;  %v275_v1 = vld [vmem:[%s404_s1 + $0x74] sm:$0xf0]  ;;  %v274_v2 = vld [vmem:[%s404_s1 + $0x74] sm:$0xf] }
   0x2   :  { %v254_v3 = vor.u32 %v275_v1, %v253_v0  ;;  %v255_v4 = vld [vmem:[%s404_s1 + $0x78] sm:$0xf0]  ;;  %v245_v5 = vld [vmem:[%s404_s1 + $0x60] sm:$0xf]  ;;  %v273_v6 = vld [vmem:[%s404_s1 + $0x64] sm:$0xf0] }
   0x3   :  { %v258_v7 = vor.u32 %v274_v2, %v255_v4  ;;  %v272_v8 = vld [vmem:[%s404_s1 + $0x64] sm:$0xf]  ;;  %v247_v9 = vld [vmem:[%s404_s1 + $0x68] sm:$0xf0]  ;;  %v246_v10 = vor.u32 %v273_v6, %v245_v5  ;;  %v237_v12 = vld [vmem:[%s404_s1 + $0x50] sm:$0xf] }
   0x4   :  { %130 = vmatpush.bf16.msra.mxu0 %v254_v3  ;;  %v250_v11 = vor.u32 %v272_v8, %v247_v9  ;;  %v271_v13 = vld [vmem:[%s404_s1 + $0x54] sm:$0xf0]  ;;  %v270_v14 = vld [vmem:[%s404_s1 + $0x54] sm:$0xf]  ;;  %v239_v15 = vld [vmem:[%s404_s1 + $0x58] sm:$0xf0] }
   0x5   :  { %144 = vmatpush.bf16.msra.mxu1 %v258_v7  ;;  %v238_v16 = vor.u32 %v271_v13, %v237_v12  ;;  %v242_v17 = vor.u32 %v270_v14, %v239_v15  ;;  %v229_v18 = vld [vmem:[%s404_s1 + $0x40] sm:$0xf]  ;;  %v269_v19 = vld [vmem:[%s404_s1 + $0x44] sm:$0xf0]  ;;  %v268_v20 = vld [vmem:[%s404_s1 + $0x44] sm:$0xf] }
   0x6   :  { %v231_v21 = vld [vmem:[%s404_s1 + $0x48] sm:$0xf0]  ;;  %v230_v22 = vor.u32 %v269_v19, %v229_v18  ;;  %v221_v24 = vld [vmem:[%s404_s1 + $0x30] sm:$0xf]  ;;  %v267_v25 = vld [vmem:[%s404_s1 + $0x34] sm:$0xf0] }
   0x7   :  { %v234_v23 = vor.u32 %v268_v20, %v231_v21  ;;  %v266_v26 = vld [vmem:[%s404_s1 + $0x34] sm:$0xf]  ;;  %v223_v27 = vld [vmem:[%s404_s1 + $0x38] sm:$0xf0]  ;;  %v222_v28 = vor.u32 %v267_v25, %v221_v24  ;;  %v213_v30 = vld [vmem:[%s404_s1 + $0x20] sm:$0xf] }
   0x8   :  { %131 = vmatpush.bf16.msra.mxu0 %v246_v10  ;;  %v226_v29 = vor.u32 %v266_v26, %v223_v27  ;;  %v265_v31 = vld [vmem:[%s404_s1 + $0x24] sm:$0xf0]  ;;  %v264_v32 = vld [vmem:[%s404_s1 + $0x24] sm:$0xf]  ;;  %v215_v33 = vld [vmem:[%s404_s1 + $0x28] sm:$0xf0] }
   0x9   :  { %145 = vmatpush.bf16.msra.mxu1 %v250_v11  ;;  %v214_v34 = vor.u32 %v265_v31, %v213_v30  ;;  %v218_v35 = vor.u32 %v264_v32, %v215_v33  ;;  %v205_v36 = vld [vmem:[%s404_s1 + $0x10] sm:$0xf]  ;;  %v263_v37 = vld [vmem:[%s404_s1 + $0x14] sm:$0xf0]  ;;  %v262_v38 = vld [vmem:[%s404_s1 + $0x14] sm:$0xf] }
   0xa   :  { %v207_v39 = vld [vmem:[%s404_s1 + $0x18] sm:$0xf0]  ;;  %v206_v40 = vor.u32 %v263_v37, %v205_v36  ;;  %v197_v42 = vld [vmem:[%s404_s1] sm:$0xf]  ;;  %v261_v43 = vld [vmem:[%s404_s1 + $0x4] sm:$0xf0] }
   0xb   :  { %v210_v41 = vor.u32 %v262_v38, %v207_v39  ;;  %v260_v44 = vld [vmem:[%s404_s1 + $0x4] sm:$0xf]  ;;  %v199_v45 = vld [vmem:[%s404_s1 + $0x8] sm:$0xf0]  ;;  %v198_v46 = vor.u32 %v261_v43, %v197_v42  ;;  %v173_v49 = vld [vmem:[%s406_s2] sm:$0x3] }
   0xc   :  { %132 = vmatpush.bf16.msra.mxu0 %v238_v16  ;;  %v202_v47 = vor.u32 %v260_v44, %v199_v45  ;;  %v259_v48 = vld [vmem:[%s405_s0] sm:$0xff]  ;;  %v175_v50 = vperm.slane %v173_v49, 0  ;;  %v176_v51 = vperm.slane %v173_v49, 1 }
   0xd   :  { %146 = vmatpush.bf16.msra.mxu1 %v242_v17 }
  0x10   :  { %133 = vmatpush.bf16.msra.mxu0 %v230_v22 }
  0x11   :  { %147 = vmatpush.bf16.msra.mxu1 %v234_v23 }
  0x14   :  { %134 = vmatpush.bf16.msra.mxu0 %v222_v28 }
  0x15   :  { %148 = vmatpush.bf16.msra.mxu1 %v226_v29 }
  0x18   :  { %135 = vmatpush.bf16.msra.mxu0 %v214_v34 }
  0x19   :  { %149 = vmatpush.bf16.msra.mxu1 %v218_v35 }
  0x1c   :  { %136 = vmatpush.bf16.msra.mxu0 %v206_v40 }
  0x1d   :  { %150 = vmatpush.bf16.msra.mxu1 %v210_v41 }
  0x20   :  { %137 = vmatpush.bf16.msra.mxu0 %v198_v46 }
  0x21   :  { %151 = vmatpush.bf16.msra.mxu1 %v202_v47 }
  0x23   :  { %138 = vmatmul.bf16.vlgmr.msra.gmra.mxu0 %v259_v48 }
  0x24   :  { %152 = vmatmul.bf16.vlgmr.msra.gmra.mxu1 %v259_v48 }
  0xa0   :  { %v139_v52 = vpop.f32.mrf.mxu0 }
  0xa1   :  { %v179_v53 = vadd.f32 %v175_v50, %v139_v52  ;;  %v153_v54 = vpop.f32.mrf.mxu1 }
  0xa2   :  { %v180_v55 = vadd.f32 %v176_v51, %v153_v54 }
  0xa4   :  { %v183_v56 = vpack.c.bf16 %v180_v55, %v179_v53 }
  0xa6   :  { %185 = vst [vmem:[%s407_s3] sm:$0xff] %v183_v56 }
  0xa8   :  { %v141_v57 = vpop.f32.mrf.mxu0 }
  0xa9   :  { %v181_v58 = vadd.f32 %v175_v50, %v141_v57  ;;  %v155_v59 = vpop.f32.mrf.mxu1 }
  0xaa   :  { %v182_v60 = vadd.f32 %v176_v51, %v155_v59 }
  0xac   :  { %v184_v61 = vpack.c.bf16 %v182_v60, %v181_v58 }
  0xae   :  { %186 = vst [vmem:[%s407_s3 + $0x8] sm:$0xff] %v184_v61 }

// kernel: transformer_forward.28
= control target key start
LH: loop header
LB: loop body
LE: loop exit
PB: predicated region body
PF: predicated region fallthrough
CT: control target
= control target key end

     0   :  { %v212_v25 = vlaneseq  ;;  %s497_s1 = inlined_call_operand.vmem [shape: bf16[128,128], index: 1, kind: input, shape index: {}]   ;;  %s498_s3 = inlined_call_operand.vmem [shape: bf16[128,128], index: 3, kind: input, shape index: {}]   ;;  %s499_s2 = inlined_call_operand.vmem [shape: f32[1,128], index: 2, kind: input, shape index: {}]   ;;  %s500_s0 = inlined_call_operand.vmem [shape: bf16[16,128], index: 0, kind: input, shape index: {}, may-alias: {0,5}]   ;;  %s501_s4 = inlined_call_operand.vmem [shape: f32[1,128], index: 4, kind: input, shape index: {}]   ;;  %s502_s5 = inlined_call_operand.vmem [shape: bf16[16,128], index: 5, kind: input, shape index: {}, may-alias: {0,5}]   ;;  %s503_s6 = inlined_call_operand.vmem [shape: f32[1,128], index: 6, kind: input, shape index: {}]   ;;  %s504_s7 = inlined_call_operand.vmem [shape: f32[1,128], index: 7, kind: input, shape index: {}]   ;;  %s505_s8 = inlined_call_operand.vmem [shape: bf16[16,128], index: 8, kind: output, shape index: {}]  }
   0x1   :  { %v353_v0 = vld [vmem:[%s497_s1 + $0x38] sm:$0xff]  ;;  %v352_v1 = vld [vmem:[%s497_s1 + $0x30] sm:$0xff]  ;;  %v351_v4 = vld [vmem:[%s497_s1 + $0x28] sm:$0xff] }
   0x2   :  { %105 = vmatpush.bf16.msra.mxu0 %v353_v0  ;;  %v361_v2 = vld [vmem:[%s498_s3 + $0x38] sm:$0xff]  ;;  %v360_v3 = vld [vmem:[%s498_s3 + $0x30] sm:$0xff]  ;;  %v359_v5 = vld [vmem:[%s498_s3 + $0x28] sm:$0xff]  ;;  %v213_v28 = vand.u32 127, %v212_v25 }
   0x3   :  { %190 = vmatpush.bf16.msra.mxu1 %v361_v2  ;;  %v350_v6 = vld [vmem:[%s497_s1 + $0x20] sm:$0xff]  ;;  %v349_v8 = vld [vmem:[%s497_s1 + $0x18] sm:$0xff]  ;;  %v348_v9 = vld [vmem:[%s497_s1 + $0x10] sm:$0xff] }
   0x4   :  { %v358_v7 = vld [vmem:[%s498_s3 + $0x20] sm:$0xff]  ;;  %v347_v10 = vld [vmem:[%s497_s1 + $0x8] sm:$0xff]  ;;  %v357_v13 = vld [vmem:[%s498_s3 + $0x18] sm:$0xff]  ;;  %vm214_vm0 = vcmp.lt.s32.totalorder %v213_v28, 32 }
   0x5   :  { %v346_v11 = vld [vmem:[%s497_s1] sm:$0xff]  ;;  %v356_v14 = vld [vmem:[%s498_s3 + $0x10] sm:$0xff]  ;;  %v355_v15 = vld [vmem:[%s498_s3 + $0x8] sm:$0xff] }
   0x6   :  { %106 = vmatpush.bf16.msra.mxu0 %v352_v1  ;;  %v345_v12 = vld [vmem:[%s500_s0] sm:$0xff] }
   0x7   :  { %191 = vmatpush.bf16.msra.mxu1 %v360_v3  ;;  %v354_v16 = vld [vmem:[%s498_s3] sm:$0xff] }
   0x8   :  { %v371_v18 = vld [vmem:[%s499_s2] ss:$0 sm:$0xff] }
   0x9   :  { %v363_v26 = vld [vmem:[%s502_s5] sm:$0xff]  }
   0xa   :  { %107 = vmatpush.bf16.msra.mxu0 %v351_v4  ;;  %v372_v27 = vld [vmem:[%s501_s4] ss:$0 sm:$0xff]  ;;  %v364_v29 = vunpack.c.l.bf16 %v363_v26  ;;  %v365_v34 = vunpack.c.h.bf16 %v363_v26 }
   0xb   :  { %192 = vmatpush.bf16.msra.mxu1 %v359_v5  ;;  %v373_v3 = vld [vmem:[%s503_s6] ss:$0 sm:$0xff] }
   0xe   :  { %108 = vmatpush.bf16.msra.mxu0 %v350_v6 }
   0xf   :  { %193 = vmatpush.bf16.msra.mxu1 %v358_v7  ;;  %v374_v7 = vld [vmem:[%s504_s7] ss:$0 sm:$0xff] }
  0x12   :  { %109 = vmatpush.bf16.msra.mxu0 %v349_v8 }
  0x13   :  { %194 = vmatpush.bf16.msra.mxu1 %v357_v13 }
  0x16   :  { %110 = vmatpush.bf16.msra.mxu0 %v348_v9 }
  0x17   :  { %195 = vmatpush.bf16.msra.mxu1 %v356_v14 }
  0x1a   :  { %111 = vmatpush.bf16.msra.mxu0 %v347_v10 }
  0x1b   :  { %196 = vmatpush.bf16.msra.mxu1 %v355_v15 }
  0x1e   :  { %112 = vmatpush.bf16.msra.mxu0 %v346_v11 }
  0x1f   :  { %197 = vmatpush.bf16.msra.mxu1 %v354_v16 }
  0x21   :  { %113 = vmatmul.bf16.vlgmr.msra.gmra.mxu0 %v345_v12 }
  0x9e   :  { %v114_v17 = vpop.f32.mrf.mxu0 }
  0x9f   :  { %v115_v19 = vadd.f32 %v371_v18, %v114_v17 }
  0xa1   :  { %v119_v22 = vmax.f32 %v115_v19, 0.0 }
  0xa6   :  { %v116_v20 = vpop.f32.mrf.mxu0 }
  0xa7   :  { %v117_v21 = vadd.f32 %v371_v18, %v116_v20 }
  0xa9   :  { %v120_v23 = vmax.f32 %v117_v21, 0.0 }
  0xab   :  { %v121_v24 = vpack.c.bf16 %v120_v23, %v119_v22 }
  0xad   :  { %198 = vmatmul.bf16.vlgmr.msra.gmra.mxu1 %v121_v24 }
 0x12a   :  { %v199_v30 = vpop.f32.mrf.mxu1 }
 0x12b   :  { %v200_v31 = vadd.f32 %v372_v27, %v199_v30 }
 0x12d   :  { %v208_v32 = vadd.f32 %v364_v29, %v200_v31 }
 0x12f   :  { %v215_v33 = vsel %vm214_vm0, %v208_v32, 0.0 }
 0x130   :  { %217 = vadd.xlane.f32.xlu0 %v215_v33 }
 0x132   :  { %v201_v35 = vpop.f32.mrf.mxu1 }
 0x133   :  { %v202_v36 = vadd.f32 %v372_v27, %v201_v35 }
 0x135   :  { %v209_v37 = vadd.f32 %v365_v34, %v202_v36 }
 0x137   :  { %v216_v38 = vsel %vm214_vm0, %v209_v37, 0.0 }
 0x138   :  { %219 = vadd.xlane.f32.xlu0 %v216_v38 }
 0x1a3   :  { %v218_v39 = vpop.xlane.xlu0 %217 }
 0x1a4   :  { %v221_v40 = vmul.f32 0.03125, %v218_v39 }
 0x1a6   :  { %v223_v41 = vsub.f32 %v208_v32, %v221_v40 }
 0x1a8   :  { %v225_v42 = vsel %vm214_vm0, %v223_v41, 0.0 }
 0x1a9   :  { %v227_v43 = vmul.f32 %v225_v42, %v225_v42 }
 0x1ab   :  { %229 = vadd.xlane.f32.xlu1 %v227_v43  ;;  %v220_v44 = vpop.xlane.xlu0 %219 }
 0x1ac   :  { %v222_v45 = vmul.f32 0.03125, %v220_v44 }
 0x1ae   :  { %v224_v46 = vsub.f32 %v209_v37, %v222_v45 }
 0x1b0   :  { %v226_v47 = vsel %vm214_vm0, %v224_v46, 0.0 }
 0x1b1   :  { %v228_v48 = vmul.f32 %v226_v47, %v226_v47 }
 0x1b3   :  { %231 = vadd.xlane.f32.xlu1 %v228_v48 }
 0x21e   :  { %v230_v49 = vpop.xlane.xlu1 %229 }
 0x21f   :  { %v233_v50 = vmul.f32 0.03125, %v230_v49 }
 0x221   :  { %v235_v51 = vadd.f32 1e-05, %v233_v50 }
 0x223   :  { %375 = vrsqrt.f32 %v235_v51  ;;  %vm243_vm2 = vweird.f32 %v235_v51 }
 0x226   :  { %v232_v52 = vpop.xlane.xlu1 %231 }
 0x227   :  { %v234_v53 = vmul.f32 0.03125, %v232_v52 }
 0x229   :  { %v376_v54 = vpop.eup %375  ;;  %v236_v55 = vadd.f32 1e-05, %v234_v53 }
 0x22a   :  { %v238_v56 = vmul.f32 %v376_v54, %v235_v51  ;;  %vm244_vm1 = vweird.f32 %v376_v54 }
 0x22b   :  { %377 = vrsqrt.f32 %v236_v55  ;;  %vm245_vm3 = vmor %vm243_vm2, %vm244_vm1  ;;  %vm253_vm5 = vweird.f32 %v236_v55 }
 0x22c   :  { %v239_v57 = vmul.f32 %v376_v54, %v238_v56 }
 0x22e   :  { %v240_v58 = vmul.f32 0.5, %v239_v57 }
 0x230   :  { %v241_v59 = vsub.f32 1.5, %v240_v58 }
 0x231   :  { %v378_v60 = vpop.eup %377 }
 0x232   :  { %v242_v61 = vmul.f32 %v376_v54, %v241_v59  ;;  %v248_v62 = vmul.f32 %v378_v60, %v236_v55  ;;  %vm254_vm4 = vweird.f32 %v378_v60 }
 0x233   :  { %vm255_vm6 = vmor %vm253_vm5, %vm254_vm4 }
 0x234   :  { %v249_v63 = vmul.f32 %v378_v60, %v248_v62  ;;  %v246_v0 = vsel %vm245_vm3, %v376_v54, %v242_v61 }
 0x235   :  { %v257_v4 = vmul.f32 %v246_v0, %v223_v41 }
 0x236   :  { %v250_v1 = vmul.f32 0.5, %v249_v63 }
 0x237   :  { %v262_v8 = vmul.f32 %v373_v3, %v257_v4 }
 0x238   :  { %v251_v2 = vsub.f32 1.5, %v250_v1 }
 0x239   :  { %v267_v11 = vadd.f32 %v374_v7, %v262_v8 }
 0x23a   :  { %v252_v5 = vmul.f32 %v378_v60, %v251_v2 }
 0x23c   :  { %v256_v6 = vsel %vm255_vm6, %v378_v60, %v252_v5 }
 0x23d   :  { %v258_v9 = vmul.f32 %v256_v6, %v224_v46 }
 0x23f   :  { %v263_v10 = vmul.f32 %v373_v3, %v258_v9 }
 0x241   :  { %v268_v12 = vadd.f32 %v374_v7, %v263_v10 }
 0x243   :  { %v369_v13 = vpack.c.bf16 %v268_v12, %v267_v11 }
 0x245   :  { %370 = vst [vmem:[%s505_s8] sm:$0xff] %v369_v13  }

// kernel: transformer_forward.38
= control target key start
LH: loop header
LB: loop body
LE: loop exit
PB: predicated region body
PF: predicated region fallthrough
CT: control target
= control target key end

     0   :  { %s629_s12 = smov 0   ;;  %s698_s0 = inlined_call_operand.vmem [shape: bf16[2,8,128], index: 0, kind: input, shape index: {}]   ;;  %s699_s1 = inlined_call_operand.vmem [shape: bf16[2,8,256], index: 1, kind: input, shape index: {}]   ;;  %s700_s2 = inlined_call_operand.vmem [shape: f32[2,1,8], index: 2, kind: input, shape index: {}]   ;;  %s701_s3 = inlined_call_operand.vmem [shape: bf16[2,8,128], index: 3, kind: output, shape index: {}]  }
   0x1 LB: > { %s542_s13 = sadd.s32 4294967295, %s600_s12   ;;  %p546_p0 = scmp.ge.s32.totalorder %s600_s12, 1  ;;  %s600_s12 = sphi %s629_s12, %s13_s12  }
   0x2   : > { %p154_p1 = scmp.lt.s32.totalorder %s600_s12, 3 }
   0x4   : > { %p155_p2 = pnand %p546_p0, %p154_p1 }
   0x5   : > { %p184_p3 = scmp.lt.s32.totalorder (!%p155_p2), %s542_s13, 1  ;;  %s603_s28 = smov (!%p155_p2), 112  }
   0x6   : > { %158 = sbr.rel (%p155_p2) target bundleno = 1084 (0x43c), region = 32  ;;  %s604_s29 = smov (!%p155_p2), 104  }
   0x7   : > { %s605_s30 = smov (!%p155_p2), 120   ;;  %s606_s4 = smov (!%p155_p2), 8  }
   0x8   : > { %s607_s5 = smov (!%p155_p2), 16   ;;  %s608_s6 = smov (!%p155_p2), 24  }
   0xb   : > { %s703_s13 = smov (!%p184_p3, %s542_s13), 1  ;;  %vm208_vm0 = vcmask 64512   ;;  %v602_v2 = vmov 0   ;;  %vm248_vm1 = vcmask 1043456   ;;  %vm266_vm2 = vcmask 60416  }
   0xc   : > { %s561_s14 = sshll.u32 %s703_s13, 3  ;;  %s547_s18 = sshll.u32 %s703_s13, 2  ;;  %vm336_vm3 = vcmask 126016   ;;  %vm401_vm4 = vcmask 191616   ;;  %vm466_vm5 = vcmask 257216  }
   0xd   : > { %s192_s17 = scalar_lea.vmem %s699_s1, %s561_s14  ;;  %s643_s21 = scalar_lea.vmem %s701_s3, %s547_s18 }
   0xe   : > { %v202_v0 = vld [vmem:[%s192_s17] sm:$0xff]  ;;  %207 = vst [vmem:[%s643_s21] sm:$0xf] %v602_v2  ;;  %s187_s24 = scalar_lea.vmem %s698_s0, %s547_s18  ;;  %s195_s27 = scalar_lea.vmem %s700_s2, %s703_s13 }
   0xf   : > { %v213_v1 = vsel %vm208_vm0, %v202_v0, 0  ;;  %v201_v3 = vld [vmem:[%s187_s24] sm:$0xf]  ;;  %v273_v4 = vunpack.c.l.b16 %v202_v0  ;;  %v243_v24 = vunpack.c.h.b16 %v202_v0 }
  0x10   : > { %222 = vmatpush.bf16.xpose.msra.mxu0 %v213_v1  ;;  %v269_v6 = vunpack.c.l.b16 %v201_v3  ;;  %v577_v8 = vld [vmem:[%s195_s27] ss:$0 sm:$0xff] }
  0x11   : > { %v274_v5 = vpack.c.b16 %v273_v4, %v273_v4  ;;  %v664_v25 = vpack.c.b16 %v243_v24, %v243_v24 }
  0x12   : > { %v270_v7 = vpack.c.b16 %v269_v6, %v269_v6 }
  0x13   : > { %340 = vrot.lane.b32.xlu2 %v274_v5, %s603_s28  ;;  %v250_v26 = vsel %vm248_vm1, %v664_v25, 0 }
  0x14   : > { %259 = vmatpush.bf16.msra.mxu1 %v250_v26 }
  0x17   : > { %551 = vmatmul.msk.bf16.vlgmr.msra.gmra.mxu0 %vm208_vm0, %v201_v3 }
  0x1b   : > { %405 = vrot.lane.b32.xlu2 %v274_v5, %s604_s29 }
  0x23   : > { %338 = vrot.lane.b32.xlu2 %v270_v7, %s603_s28 }
  0x2b   : > { %403 = vrot.lane.b32.xlu2 %v270_v7, %s604_s29 }
  0x6d   : > { %v341_v14 = vpop.permute.xlu2 %340 }
  0x6e   : > { %v346_v27 = vsel %vm208_vm0, %v341_v14, 0 }
  0x6f   : > { %355 = vmatpush.bf16.xpose.msrb.mxu1 %v346_v27 }
  0x75   : > { %v406_v15 = vpop.permute.xlu2 %405 }
  0x76   : > { %v411_v20 = vsel %vm208_vm0, %v406_v15, 0 }
  0x77   : > { %420 = vmatpush.bf16.xpose.msrb.mxu0 %v411_v20 }
  0x7d   : > { %v339_v19 = vpop.permute.xlu2 %338 }
  0x85   : > { %v404_v23 = vpop.permute.xlu2 %403 }
  0x86   : > { %557 = vmatmul.msk.bf16.vlgmr.msrb.gmra.mxu0 %vm208_vm0, %v404_v23 }
  0x94   : > { %v224_v9 = vpop.f32.mrf.mxu0 }
  0x95   : > { %v228_v10 = vmul.f32 0.35355338, %v224_v9 }
  0x97   : > { %v229_v11 = vadd.f32 %v577_v8, %v228_v10 }
  0x99   : > { %v230_v12 = vsel %vm208_vm0, %v229_v11, -inf }
  0x9a   : > { %231 = vmax.xlane.f32.xlu0 %v230_v12 }
  0x9c   : > { %v226_v13 = vpop.f32.mrf.mxu0 }
  0xae   : > { %275 = vrot.lane.b32.xlu0 %v274_v5, %s605_s30 }
 0x103   : > { %v422_v34 = vpop.f32.mrf.mxu0 }
 0x104   : > { %v426_v35 = vmul.f32 0.35355338, %v422_v34 }
 0x106   : > { %v427_v36 = vadd.f32 %v577_v8, %v426_v35 }
 0x108   : > { %v428_v37 = vsel %vm208_vm0, %v427_v36, -inf }
 0x10b   : > { %v424_v38 = vpop.f32.mrf.mxu0 }
 0x10d   : > { %v232_v16 = vpop.xlane.xlu0 %231 }
 0x10e   : > { %v233_v17 = vsub.f32 %v229_v11, %v232_v16 }
 0x110   : > { %v234_v18 = vmul.f32 1.442695, %v233_v17 }
 0x112   : > { %578 = vpow2.f32 %v234_v18 }
 0x118   : > { %v579_v21 = vpop.eup %578 }
 0x119   : > { %v236_v22 = vsel %vm208_vm0, %v579_v21, 0.0 }
 0x11a   : > { %237 = vadd.xlane.f32.xlu1 %v236_v22 }
 0x120   : > { %v276_v28 = vpop.permute.xlu0 %275 }
 0x121   : > { %v281_v29 = vsel %vm208_vm0, %v276_v28, 0 }
 0x122   : > { %290 = vmatpush.bf16.xpose.msra.mxu2 %v281_v29 }
 0x133   : > { %271 = vrot.lane.b32.xlu1 %v270_v7, %s605_s30 }
 0x15d   : > { %429 = vmax.xlane.f32.xlu1 %v428_v37 }
 0x18d   : > { %v238_v30 = vpop.xlane.xlu1 %237 }
 0x18e   : > { %580 = vrcp.f32 %v238_v30 }
 0x194   : > { %v581_v31 = vpop.eup %580 }
 0x195   : > { %v240_v32 = vmul.f32 %v581_v31, %v579_v21 }
 0x197   : > { %v241_v33 = vpack.c.bf16 %v240_v32, %v240_v32 }
 0x199   : > { %552 = vmatmul.msk.bf16.vlgmr.msra.gmra.mxu1 %vm208_vm0, %v241_v33 }
 0x1a5   : > { %v272_v39 = vpop.permute.xlu1 %271 }
 0x1a6   : > { %553 = vmatmul.msk.bf16.vlgmr.msra.gmra.mxu2 %vm208_vm0, %v272_v39 }
 0x1a9   : > { %555 = vmatmul.msk.bf16.vlgmr.msrb.gmra.mxu1 %vm208_vm0, %v339_v19 }
 0x1d0   : > { %v430_v55 = vpop.xlane.xlu1 %429 }
 0x1d1   : > { %v431_v59 = vsub.f32 %v427_v36, %v430_v55 }
 0x1d3   : > { %v432_v61 = vmul.f32 1.442695, %v431_v59 }
 0x216   : > { %v261_v40 = vpop.f32.mrf.mxu1 }
 0x217   : > { %v265_v41 = vpack.c.bf16 %v261_v40, %v261_v40 }
 0x219   : > { %267 = vst.msk [vmem:[%s643_s21] sm:$0xf] %vm266_vm2, %v265_v41 }
 0x21e   : > { %v263_v42 = vpop.f32.mrf.mxu1 }
 0x226   : > { %v357_v43 = vpop.f32.mrf.mxu1 }
 0x227   : > { %v361_v44 = vmul.f32 0.35355338, %v357_v43 }
 0x229   : > { %v292_v45 = vpop.f32.mrf.mxu2  ;;  %v362_v46 = vadd.f32 %v577_v8, %v361_v44 }
 0x22a   : > { %v296_v47 = vmul.f32 0.35355338, %v292_v45 }
 0x22b   : > { %v363_v48 = vsel %vm208_vm0, %v362_v46, -inf }
 0x22c   : > { %364 = vmax.xlane.f32.xlu2 %v363_v48  ;;  %v297_v49 = vadd.f32 %v577_v8, %v296_v47 }
 0x22e   : > { %v359_v50 = vpop.f32.mrf.mxu1  ;;  %v298_v51 = vsel %vm208_vm0, %v297_v49, -inf }
 0x22f   : > { %299 = vmax.xlane.f32.xlu0 %v298_v51 }
 0x231   : > { %v294_v52 = vpop.f32.mrf.mxu2 }
 0x244   : > { %310 = vrot.lane.b32.xlu2 %v664_v25, %s605_s30 }
 0x29f   : > { %v365_v53 = vpop.xlane.xlu2 %364 }
 0x2a0   : > { %v366_v54 = vsub.f32 %v362_v46, %v365_v53 }
 0x2a2   : > { %v367_v56 = vmul.f32 1.442695, %v366_v54  ;;  %v300_v57 = vpop.xlane.xlu0 %299 }
 0x2a3   : > { %v301_v58 = vsub.f32 %v297_v49, %v300_v57 }
 0x2a4   : > { %582 = vpow2.f32 %v367_v56 }
 0x2a5   : > { %v302_v60 = vmul.f32 1.442695, %v301_v58 }
 0x2a7   : > { %584 = vpow2.f32 %v302_v60  ;;  %v311_v4 = vpop.permute.xlu2 %310 }
 0x2a8   : > { %586 = vpow2.f32 %v432_v61  ;;  %v316_v5 = vsel %vm248_vm1, %v311_v4, 0 }
 0x2a9   : > { %325 = vmatpush.bf16.msra.mxu3 %v316_v5 }
 0x2aa   : > { %v583_v62 = vpop.eup %582 }
 0x2ab   : > { %v369_v63 = vsel %vm208_vm0, %v583_v62, 0.0 }
 0x2ac   : > { %370 = vadd.xlane.f32.xlu1 %v369_v63 }
 0x2ad   : > { %v585_v0 = vpop.eup %584 }
 0x2ae   : > { %v304_v1 = vsel %vm208_vm0, %v585_v0, 0.0  ;;  %v587_v2 = vpop.eup %586 }
 0x2af   : > { %305 = vadd.xlane.f32.xlu0 %v304_v1  ;;  %v434_v3 = vsel %vm208_vm0, %v587_v2, 0.0 }
 0x2b7   : > { %435 = vadd.xlane.f32.xlu0 %v434_v3 }
 0x2c5   : > { %375 = vrot.lane.b32.xlu1 %v664_v25, %s603_s28 }
 0x2cb   : > { %440 = vrot.lane.b32.xlu0 %v664_v25, %s604_s29 }
 0x31f   : > { %v371_v9 = vpop.xlane.xlu1 %370 }
 0x322   : > { %v306_v6 = vpop.xlane.xlu0 %305 }
 0x323   : > { %588 = vrcp.f32 %v306_v6 }
 0x324   : > { %590 = vrcp.f32 %v371_v9 }
 0x329   : > { %v589_v7 = vpop.eup %588 }
 0x32a   : > { %v308_v8 = vmul.f32 %v589_v7, %v585_v0  ;;  %v436_v11 = vpop.xlane.xlu0 %435  ;;  %v591_v12 = vpop.eup %590 }
 0x32b   : > { %592 = vrcp.f32 %v436_v11  ;;  %v373_v14 = vmul.f32 %v591_v12, %v583_v62 }
 0x32c   : > { %v309_v10 = vpack.c.bf16 %v308_v8, %v308_v8 }
 0x32d   : > { %v374_v18 = vpack.c.bf16 %v373_v14, %v373_v14 }
 0x32e   : > { %554 = vmatmul.msk.bf16.vlgmr.msra.gmra.mxu3 %vm208_vm0, %v309_v10 }
 0x331   : > { %v593_v16 = vpop.eup %592 }
 0x332   : > { %v438_v17 = vmul.f32 %v593_v16, %v587_v2 }
 0x334   : > { %v439_v21 = vpack.c.bf16 %v438_v17, %v438_v17 }
 0x337   : > { %v376_v13 = vpop.permute.xlu1 %375 }
 0x338   : > { %v381_v15 = vsel %vm248_vm1, %v376_v13, 0 }
 0x339   : > { %390 = vmatpush.bf16.msrb.mxu3 %v381_v15 }
 0x33d   : > { %v441_v19 = vpop.permute.xlu0 %440 }
 0x33e   : > { %556 = vmatmul.msk.bf16.vlgmr.msrb.gmra.mxu3 %vm208_vm0, %v374_v18  ;;  %v446_v20 = vsel %vm248_vm1, %v441_v19, 0 }
 0x33f   : > { %455 = vmatpush.bf16.msrb.mxu2 %v446_v20 }
 0x342   : > { %558 = vmatmul.msk.bf16.vlgmr.msrb.gmra.mxu2 %vm208_vm0, %v439_v21 }
 0x3b1   : > { %v327_v22 = vpop.f32.mrf.mxu3 }
 0x3b2   : > { %v331_v23 = vpack.c.bf16 %v327_v22, %v327_v22 }
 0x3b4   : > { %333 = vrot.lane.b32.xlu2 %v331_v23, %s606_s4 }
 0x3b9   : > { %v329_v24 = vpop.f32.mrf.mxu3 }
 0x3c1   : > { %v392_v25 = vpop.f32.mrf.mxu3 }
 0x3c2   : > { %v396_v26 = vpack.c.bf16 %v392_v25, %v392_v25 }
 0x3c4   : > { %398 = vrot.lane.b32.xlu2 %v396_v26, %s607_s5 }
 0x3c5   : > { %v457_v27 = vpop.f32.mrf.mxu2 }
 0x3c6   : > { %v461_v28 = vpack.c.bf16 %v457_v27, %v457_v27 }
 0x3c8   : > { %463 = vrot.lane.b32.xlu0 %v461_v28, %s608_s6 }
 0x3c9   : > { %v394_v29 = vpop.f32.mrf.mxu3 }
 0x3cd   : > { %v459_v30 = vpop.f32.mrf.mxu2 }
 0x40e   : > { %v334_v31 = vpop.permute.xlu2 %333 }
 0x40f   : > { %337 = vst.msk [vmem:[%s643_s21] sm:$0xf] %vm336_vm3, %v334_v31 }
 0x41e   : > { %v399_v32 = vpop.permute.xlu2 %398 }
 0x41f   : > { %402 = vst.msk [vmem:[%s643_s21] sm:$0xf] %vm401_vm4, %v399_v32 }
 0x43a   : > { %v464_v33 = vpop.permute.xlu0 %463 }
 0x43b   : > { %467 = vst.msk [vmem:[%s643_s21] sm:$0xf] %vm466_vm5, %v464_v33 }
 0x43c PF: > { %s13_s12 = sadd.s32 1, %s600_s12  }
 0x43d   : > { %p10_p4 = scmp.ge.s32.totalorder %s13_s12, 4  }
 0x43f   :  { %12 = sbr.rel (!%p10_p4) target bundleno = 1 (0x1), region = 68 }

// kernel: transformer_forward.49
= control target key start
LH: loop header
LB: loop body
LE: loop exit
PB: predicated region body
PF: predicated region fallthrough
CT: control target
= control target key end

     0   :  { %s231_s1 = inlined_call_operand.vmem [shape: bf16[128,128], index: 1, kind: input, shape index: {}]   ;;  %s232_s2 = inlined_call_operand.vmem [shape: f32[1,128], index: 2, kind: input, shape index: {}]   ;;  %s233_s0 = inlined_call_operand.vmem [shape: bf16[16,128], index: 0, kind: input, shape index: {}]   ;;  %s234_s3 = inlined_call_operand.vmem [shape: f32[16,128], index: 3, kind: output, shape index: {}]  }
   0x1   :  { %v173_v0 = vld [vmem:[%s231_s1 + $0x38] sm:$0xff]  ;;  %v172_v1 = vld [vmem:[%s231_s1 + $0x30] sm:$0xff]  ;;  %v171_v2 = vld [vmem:[%s231_s1 + $0x28] sm:$0xff] }
   0x2   :  { %94 = vmatpush.bf16.msra.mxu0 %v173_v0  ;;  %v170_v3 = vld [vmem:[%s231_s1 + $0x20] sm:$0xff]  ;;  %v169_v4 = vld [vmem:[%s231_s1 + $0x18] sm:$0xff]  ;;  %v168_v5 = vld [vmem:[%s231_s1 + $0x10] sm:$0xff] }
   0x3   :  { %v167_v6 = vld [vmem:[%s231_s1 + $0x8] sm:$0xff]  ;;  %v166_v7 = vld [vmem:[%s231_s1] sm:$0xff] }
   0x4   :  { %v165_v8 = vld [vmem:[%s233_s0] sm:$0xff] }
   0x5   :  { %v174_v9 = vld [vmem:[%s232_s2] ss:$0 sm:$0xff] }
   0x6   :  { %95 = vmatpush.bf16.msra.mxu0 %v172_v1 }
   0xa   :  { %96 = vmatpush.bf16.msra.mxu0 %v171_v2 }
   0xe   :  { %97 = vmatpush.bf16.msra.mxu0 %v170_v3 }
  0x12   :  { %98 = vmatpush.bf16.msra.mxu0 %v169_v4 }
  0x16   :  { %99 = vmatpush.bf16.msra.mxu0 %v168_v5 }
  0x1a   :  { %100 = vmatpush.bf16.msra.mxu0 %v167_v6 }
  0x1e   :  { %101 = vmatpush.bf16.msra.mxu0 %v166_v7 }
  0x21   :  { %102 = vmatmul.bf16.vlgmr.msra.gmra.mxu0 %v165_v8 }
  0x9e   :  { %v103_v10 = vpop.f32.mrf.mxu0 }
  0x9f   :  { %v121_v11 = vadd.f32 %v174_v9, %v103_v10 }
  0xa1   :  { %123 = vst [vmem:[%s234_s3] sm:$0xff] %v121_v11 }
  0xa6   :  { %v105_v12 = vpop.f32.mrf.mxu0 }
  0xa7   :  { %v122_v13 = vadd.f32 %v174_v9, %v105_v12 }
  0xa9   :  { %124 = vst [vmem:[%s234_s3 + $0x8] sm:$0xff] %v122_v13 }

</bundles_post_ra>
